<compile_context>
chip_gen: v7x
topology: tpu7x:2x2x1
jax: 0.10.0
libtpu: 0.0.40
codegen_flags: <defaults>
</compile_context>

<pallas_src>
import math
import functools

import jax
import jax.numpy as jnp
from jax.experimental import pallas as pl
from jax.experimental.pallas import tpu as pltpu

F8_E5M2 = jnp.float8_e5m2
F8_E4M3 = jnp.float8_e4m3fn
F8_E5M2_MAX = 57344.0       # max finite float8_e5m2
F8_E4M3_MAX = 448.0         # max finite float8_e4m3fn
QBLOCK = 128                # fp8 activation quantization block (lane width)


def _choose_tile(dim, candidates):
    """Largest candidate dividing dim, else the full dim (full-extent block is legal)."""
    for c in candidates:
        if dim % c == 0:
            return c
    return dim


def _round_up(x, m):
    return ((x + m - 1) // m) * m


def _padded_k(k):
    """K padding rule shared by weight packing and the GEMM wrapper."""
    if k % QBLOCK == 0 or k < QBLOCK:
        return k
    return _round_up(k, QBLOCK)


# ---------------------------------------------------------------------------
# FP8 linear: tiled GEMM, cached activation quant, fused epilogue (scale+bias,
# optional GELU, optional residual add), bf16 in / bf16 out.
# ---------------------------------------------------------------------------
def _fp8_linear_kernel(*refs, q_dtype, q_max, nqb, has_res, act):
    if has_res:
        x_ref, wt_ref, ws_ref, b_ref, res_ref, o_ref, acc_ref, xq_ref = refs
    else:
        x_ref, wt_ref, ws_ref, b_ref, o_ref, acc_ref, xq_ref = refs
        res_ref = None

    j = pl.program_id(1)
    k_step = pl.program_id(2)

    @pl.when(k_step == 0)
    def _init():
        acc_ref[...] = jnp.zeros_like(acc_ref)

    # Fake-quantize the (i, k) activation block once (j == 0) and cache it in
    # VMEM; every other N tile re-uses the cached bf16 operand.
    @pl.when(j == 0)
    def _quantize():
        x = x_ref[...].astype(jnp.float32)                 # (tm, tk)
        tm, tk = x.shape
        xb = x.reshape(tm, nqb, tk // nqb)                 # 128-wide quant blocks
        amax = jnp.max(jnp.abs(xb), axis=-1, keepdims=True)
        s = jnp.maximum(amax, 1e-12) * (1.0 / q_max)
        x_dq = (xb / s).astype(q_dtype).astype(jnp.float32) * s
        xq_ref[k_step] = x_dq.reshape(tm, tk).astype(jnp.bfloat16)

    x_dq = xq_ref[k_step]                                  # (tm, tk) bf16
    w = wt_ref[...].astype(jnp.float32).astype(jnp.bfloat16)   # fp8 weight -> bf16
    acc_ref[...] += jnp.dot(x_dq, w, preferred_element_type=jnp.float32)

    @pl.when(k_step == pl.num_programs(2) - 1)
    def _finalize():
        y = acc_ref[...] * ws_ref[...] + b_ref[...]        # per-column scale + bias
        if act == "gelu":
            # TODO(synk): tanh-approx GELU (EUP); reference uses exact erf GELU.
            c0 = 0.7978845608028654
            y = 0.5 * y * (1.0 + jnp.tanh(c0 * (y + 0.044715 * y * y * y)))
        if res_ref is not None:
            y = y + res_ref[...].astype(jnp.float32)       # fused residual add
        o_ref[...] = y.astype(o_ref.dtype)


def fp8_linear(x, wt_q, ws_vec, bias_vec, *, q_dtype, q_max,
               residual=None, act=None, out_dtype=jnp.bfloat16):
    """y = dequant(quant(x)) @ dequant(W)^T * ws + bias [; gelu] [; + residual].

    wt_q:     (Kp, N) fp8 weight, pre-transposed / K-padded at init.
    ws_vec:   (1, N) f32 per-output-column scale.
    bias_vec: (1, N) f32 (zeros for bias-free layers).
    residual: optional array broadcastable to (*x.shape[:-1], N), added in epilogue.
    """
    lead = x.shape[:-1]
    K = x.shape[-1]
    Kp, N = wt_q.shape
    M = int(math.prod(lead))

    x2 = x.reshape(M, K).astype(jnp.bfloat16)
    if Kp != K:
        # TODO(synk): per-call pad; pick embed/mlp dims as multiples of 128 to avoid it.
        x2 = jnp.pad(x2, ((0, 0), (0, Kp - K)))

    res2 = None
    if residual is not None:
        res2 = residual.reshape(M, N).astype(jnp.bfloat16)

    Mp = M
    if M >= 128:
        Mp = _round_up(M, 128)
        tm = 256 if Mp % 256 == 0 else 128
        if Mp != M:
            x2 = jnp.pad(x2, ((0, Mp - M), (0, 0)))
            if res2 is not None:
                res2 = jnp.pad(res2, ((0, Mp - M), (0, 0)))
    else:
        tm = M                                             # single full-extent row block
    tn = _choose_tile(N, (512, 256, 128))
    tk = _choose_tile(Kp, (512, 256, 128))
    nk = Kp // tk
    nqb = tk // QBLOCK if tk % QBLOCK == 0 else 1          # tk < 128 => one quant block

    grid = (Mp // tm, N // tn, nk)
    in_specs = [
        pl.BlockSpec((tm, tk), lambda i, j, kk: (i, kk)),
        pl.BlockSpec((tk, tn), lambda i, j, kk: (kk, j)),
        pl.BlockSpec((1, tn), lambda i, j, kk: (0, j)),
        pl.BlockSpec((1, tn), lambda i, j, kk: (0, j)),
    ]
    args = [x2, wt_q, ws_vec, bias_vec]
    if res2 is not None:
        in_specs.append(pl.BlockSpec((tm, tn), lambda i, j, kk: (i, j)))
        args.append(res2)

    kernel = functools.partial(_fp8_linear_kernel, q_dtype=q_dtype, q_max=q_max,
                               nqb=nqb, has_res=res2 is not None, act=act)
    y = pl.pallas_call(
        kernel,
        out_shape=jax.ShapeDtypeStruct((Mp, N), out_dtype),
        grid=grid,
        in_specs=in_specs,
        out_specs=pl.BlockSpec((tm, tn), lambda i, j, kk: (i, j)),
        scratch_shapes=[pltpu.VMEM((tm, tn), jnp.float32),          # f32 accumulator
                        pltpu.VMEM((nk, tm, tk), jnp.bfloat16)],    # cached quantized x
        compiler_params=pltpu.CompilerParams(
            # j must stay un-partitioned so each core sees j == 0 (quant cache fill).
            dimension_semantics=("parallel", "arbitrary", "arbitrary")),
    )(*args)
    if Mp != M:
        y = y[:M]
    return y.reshape(*lead, N)


# ---------------------------------------------------------------------------
# Flash-style attention (online softmax, bf16 matmul operands)
# ---------------------------------------------------------------------------
def _flash_attn_kernel(*refs, has_mask):
    if has_mask:
        q_ref, k_ref, v_ref, m_ref, o_ref, m_sc, l_sc, acc_sc = refs
    else:
        q_ref, k_ref, v_ref, o_ref, m_sc, l_sc, acc_sc = refs
        m_ref = None

    kv = pl.program_id(3)

    @pl.when(kv == 0)
    def _init():
        m_sc[...] = jnp.full_like(m_sc, -1e30)
        l_sc[...] = jnp.zeros_like(l_sc)
        acc_sc[...] = jnp.zeros_like(acc_sc)

    q = q_ref[0, 0]                    # (tq, d) bf16; 1/sqrt(d) folded into QKV GEMM
    k = k_ref[0, 0]                    # (tkv, d) bf16
    v = v_ref[0, 0]                    # (tkv, d) bf16
    # q @ k^T without a materialized transpose; bf16 x bf16 -> f32 on the MXU.
    s = jax.lax.dot_general(q, k, (((1,), (1,)), ((), ())),
                            preferred_element_type=jnp.float32)    # (tq, tkv)
    if m_ref is not None:
        msk = m_ref[0]                 # (tq, tkv) dense or (1, tkv) key mask (broadcasts)
        # large finite negative instead of -inf: keeps fully-masked rows finite.
        s = jnp.where(msk == 0, -1e30, s)

    m_prev = m_sc[...]
    m_new = jnp.maximum(m_prev, jnp.max(s, axis=-1, keepdims=True))
    alpha = jnp.exp(m_prev - m_new)
    p = jnp.exp(s - m_new)
    l_sc[...] = alpha * l_sc[...] + jnp.sum(p, axis=-1, keepdims=True)
    acc_sc[...] = alpha * acc_sc[...] + jnp.dot(p.astype(jnp.bfloat16), v,
                                                preferred_element_type=jnp.float32)
    m_sc[...] = m_new

    @pl.when(kv == pl.num_programs(3) - 1)
    def _finalize():
        inv_l = pl.reciprocal(l_sc[...], approx=True)
        o_ref[0, 0] = (acc_sc[...] * inv_l).astype(o_ref.dtype)


def flash_attention(q, k, v, mask=None):
    """q,k,v: (B,H,T,d) bf16. mask: None, (B,1,T) key mask, or (B,T,T); nonzero = keep."""
    B, H, T, d = q.shape
    tq = _choose_tile(T, (128, 64, 32, 16, 8))     # cap q tile at 128 rows
    tkv = _choose_tile(T, (256, 128))              # lane-aligned kv tile (or full T)
    grid = (B, H, T // tq, T // tkv)

    in_specs = [
        pl.BlockSpec((1, 1, tq, d), lambda b, h, iq, ik: (b, h, iq, 0)),
        pl.BlockSpec((1, 1, tkv, d), lambda b, h, iq, ik: (b, h, ik, 0)),
        pl.BlockSpec((1, 1, tkv, d), lambda b, h, iq, ik: (b, h, ik, 0)),
    ]
    args = [q, k, v]
    has_mask = mask is not None
    if has_mask:
        if mask.ndim == 3 and mask.shape[1] == 1:   # (B,1,T) key mask: O(T) HBM traffic
            in_specs.append(pl.BlockSpec((1, 1, tkv), lambda b, h, iq, ik: (b, 0, ik)))
        else:                                       # (B,T,T) dense mask
            # TODO(synk): causal masks could be generated in-kernel from iota instead.
            in_specs.append(pl.BlockSpec((1, tq, tkv), lambda b, h, iq, ik: (b, iq, ik)))
        args.append(mask)

    kernel = functools.partial(_flash_attn_kernel, has_mask=has_mask)
    return pl.pallas_call(
        kernel,
        out_shape=jax.ShapeDtypeStruct((B, H, T, d), jnp.bfloat16),
        grid=grid,
        in_specs=in_specs,
        out_specs=pl.BlockSpec((1, 1, tq, d), lambda b, h, iq, ik: (b, h, iq, 0)),
        scratch_shapes=[pltpu.VMEM((tq, 1), jnp.float32),
                        pltpu.VMEM((tq, 1), jnp.float32),
                        pltpu.VMEM((tq, d), jnp.float32)],
        compiler_params=pltpu.CompilerParams(
            dimension_semantics=("parallel", "parallel", "parallel", "arbitrary")),
    )(*args)


# ---------------------------------------------------------------------------
# FP8LayerNorm (pure LN — residual adds are fused into the preceding GEMMs)
# ---------------------------------------------------------------------------
def _ln_kernel(x_ref, g_ref, b_ref, o_ref, *, eps):
    h = x_ref[...].astype(jnp.float32)
    mean = jnp.mean(h, axis=-1, keepdims=True)
    c = h - mean
    var = jnp.mean(c * c, axis=-1, keepdims=True)
    o_ref[...] = (c * jax.lax.rsqrt(var + eps) * g_ref[...] + b_ref[...]).astype(o_ref.dtype)


def fp8_layernorm(x, gamma, beta, eps=1e-5, out_dtype=jnp.bfloat16):
    B, T, C = x.shape
    M = B * T
    tm = _choose_tile(M, (512, 256, 128, 64, 32, 16, 8))
    y = pl.pallas_call(
        functools.partial(_ln_kernel, eps=eps),
        out_shape=jax.ShapeDtypeStruct((M, C), out_dtype),
        grid=(M // tm,),
        in_specs=[pl.BlockSpec((tm, C), lambda i: (i, 0)),
                  pl.BlockSpec((1, C), lambda i: (0, 0)),
                  pl.BlockSpec((1, C), lambda i: (0, 0))],
        out_specs=pl.BlockSpec((tm, C), lambda i: (i, 0)),
        compiler_params=pltpu.CompilerParams(dimension_semantics=("parallel",)),
    )(x.reshape(M, C), gamma, beta)
    return y.reshape(B, T, C)


# ---------------------------------------------------------------------------
# Parameter packing (done once at init -> no per-call dequant/transpose in HBM)
# ---------------------------------------------------------------------------
def _xavier(key, out_f, in_f):
    bound = math.sqrt(6.0 / (in_f + out_f))
    return jax.random.uniform(key, (out_f, in_f), minval=-bound, maxval=bound,
                              dtype=jnp.float32)


def _pack_fp8_weight(w32_list, fmt, block=QBLOCK):
    """Pack nn.Linear-style (out,in) weights: transpose, (maybe) K-pad, cast to fp8.

    Returns (wt_q (Kp, N) fp8, per-output-column scale (1, N) f32)."""
    in_f = w32_list[0].shape[1]
    kp = _padded_k(in_f)
    wt32 = jnp.concatenate([w.T for w in w32_list], axis=1)        # (in, N)
    if kp != in_f:
        wt32 = jnp.pad(wt32, ((0, kp - in_f), (0, 0)))
    wt_q = wt32.astype(fmt)
    scales = []
    for w in w32_list:
        out_i = w.shape[0]
        nb = math.ceil(out_i / block)
        ws = jnp.ones((nb,), jnp.float32)                          # FP8Linear init: ones
        scales.append(ws[jnp.arange(out_i) // block])
    ws_vec = jnp.concatenate(scales)[None, :].astype(jnp.float32)
    return wt_q, ws_vec


def _make_layernorm_params(dim, block=QBLOCK):
    nb = (dim + block - 1) // block
    w_q = jnp.ones((dim,), dtype=F8_E4M3)        # FP8LayerNorm.reset_parameters
    b_q = jnp.zeros((dim,), dtype=F8_E4M3)
    w_scale = jnp.ones((nb,), jnp.float32)
    b_scale = jnp.ones((nb,), jnp.float32)
    idx = jnp.arange(dim) // block
    gamma = (w_q.astype(jnp.float32) * w_scale[idx])[None, :]
    beta = (b_q.astype(jnp.float32) * b_scale[idx])[None, :]
    return gamma, beta


# ---------------------------------------------------------------------------
# Model
# ---------------------------------------------------------------------------
class FP8TransformerPallas:
    def __init__(self, num_layers, embed_dim, num_heads, mlp_dim,
                 dropout=0.1, block_size=QBLOCK, *, key):
        assert embed_dim % num_heads == 0
        assert block_size == QBLOCK, "kernel quant block is tied to the 128-lane tile"
        self.num_layers = num_layers
        self.embed_dim = embed_dim
        self.num_heads = num_heads
        self.head_dim = embed_dim // num_heads
        self.mlp_dim = mlp_dim
        # TODO(synk): dropout is identity here (eval semantics).
        keys = jax.random.split(key, num_layers * 6)
        attn_scale = 1.0 / math.sqrt(self.head_dim)
        self.layers = []
        for li in range(num_layers):
            kq, kk, kv, ko, k1, k2 = keys[li * 6:(li + 1) * 6]
            wq = _xavier(kq, embed_dim, embed_dim)
            wk = _xavier(kk, embed_dim, embed_dim)
            wv = _xavier(kv, embed_dim, embed_dim)
            wo = _xavier(ko, embed_dim, embed_dim)
            w1 = _xavier(k1, mlp_dim, embed_dim)
            w2 = _xavier(k2, embed_dim, mlp_dim)
            zeros_c = jnp.zeros((1, embed_dim), jnp.float32)

            # fused QKV projection (E5M2, no bias); fold 1/sqrt(d) into q columns.
            wqkv_q, wqkv_s = _pack_fp8_weight([wq, wk, wv], F8_E5M2)
            fold = jnp.concatenate([
                jnp.full((embed_dim,), attn_scale, jnp.float32),
                jnp.ones((2 * embed_dim,), jnp.float32)])[None, :]
            wqkv_s = wqkv_s * fold

            layer = {
                "wqkv": (wqkv_q, wqkv_s, jnp.zeros((1, 3 * embed_dim), jnp.float32)),
                "wo":   (*_pack_fp8_weight([wo], F8_E5M2), zeros_c),
                # MLP (E4M3, bias=True -> zeros at init)
                "fc1":  (*_pack_fp8_weight([w1], F8_E4M3),
                         jnp.zeros((1, mlp_dim), jnp.float32)),
                "fc2":  (*_pack_fp8_weight([w2], F8_E4M3), zeros_c),
                "ln1":  _make_layernorm_params(embed_dim),
                "ln2":  _make_layernorm_params(embed_dim),
            }
            self.layers.append(layer)
        self.final_ln = _make_layernorm_params(embed_dim)

    @staticmethod
    def _canon_mask(attn_mask, B, T):
        if attn_mask is None:
            return None
        m = attn_mask.astype(jnp.float32)
        if m.ndim == 2:                              # (B, T) key mask -> O(T) blocks
            return m.reshape(B, 1, T)
        return m                                     # (B, T, T) dense

    def __call__(self, x, attn_mask=None):
        B, T, C = x.shape
        H, d = self.num_heads, self.head_dim
        mask = self._canon_mask(attn_mask, B, T)
        x = x.astype(jnp.bfloat16)

        for lp in self.layers:
            # --- self attention --------------------------------------------
            qkv = fp8_linear(x, *lp["wqkv"], q_dtype=F8_E5M2, q_max=F8_E5M2_MAX)
            q, k, v = jnp.split(qkv, 3, axis=-1)
            # TODO(synk): XLA-side head split/transpose; a head-packed lane-dense
            # attention layout would index the (B,T,3C) buffer directly.
            q = q.reshape(B, T, H, d).transpose(0, 2, 1, 3)
            k = k.reshape(B, T, H, d).transpose(0, 2, 1, 3)
            v = v.reshape(B, T, H, d).transpose(0, 2, 1, 3)
            ctx = flash_attention(q, k, v, mask)                     # (B,H,T,d) bf16
            ctx = ctx.transpose(0, 2, 1, 3).reshape(B, T, C)
            # x + out_proj(ctx): residual fused into the GEMM epilogue.
            h1 = fp8_linear(ctx, *lp["wo"], q_dtype=F8_E5M2, q_max=F8_E5M2_MAX,
                            residual=x)
            x = fp8_layernorm(h1, *lp["ln1"])                        # norm1

            # --- MLP ---------------------------------------------------------
            h = fp8_linear(x, *lp["fc1"], q_dtype=F8_E4M3, q_max=F8_E4M3_MAX,
                           act="gelu")                               # GELU fused
            h2 = fp8_linear(h, *lp["fc2"], q_dtype=F8_E4M3, q_max=F8_E4M3_MAX,
                            residual=x)                              # x + ffn
            x = fp8_layernorm(h2, *lp["ln2"])                        # norm2

        return fp8_layernorm(x, *self.final_ln, out_dtype=jnp.float32)


if __name__ == "__main__":
    B, T = 2, 8
    num_layers, embed_dim, num_heads, mlp_dim = 2, 32, 4, 64

    root = jax.random.PRNGKey(0)
    kx, kw = jax.random.split(root)
    x = jax.random.normal(kx, (B, T, embed_dim), dtype=jnp.float32)
    causal = jnp.tril(jnp.ones((T, T), dtype=jnp.float32))
    attn_mask = jnp.broadcast_to(causal, (B, T, T))

    model = FP8TransformerPallas(num_layers, embed_dim, num_heads, mlp_dim,
                                 dropout=0.1, key=kw)
    fwd = jax.jit(lambda xx, mm: model(xx, mm))
    out = fwd(x, attn_mask)
    jax.block_until_ready(out)

    assert out.shape == (B, T, embed_dim)
    assert bool(jnp.all(jnp.isfinite(out)))
    print("KERNEL_OK")
</pallas_src>

<mosaic_0001>
module attributes {stable_mosaic.version = 11 : i64} {
  func.func @_fp8_linear_kernel(%arg0: i32, %arg1: i32, %arg2: i32, %arg3: memref<16x32xbf16, #tpu.memory_space<vmem>>, %arg4: memref<32x96xf8E5M2, #tpu.memory_space<vmem>>, %arg5: memref<1x96xf32, #tpu.memory_space<vmem>>, %arg6: memref<1x96xf32, #tpu.memory_space<vmem>>, %arg7: memref<16x96xbf16, #tpu.memory_space<vmem>>, %arg8: memref<16x96xf32, #tpu.memory_space<vmem>>, %arg9: memref<1x16x32xbf16, #tpu.memory_space<vmem>>) attributes {dimension_semantics = [#tpu.dimension_semantics<parallel>, #tpu.dimension_semantics<arbitrary>, #tpu.dimension_semantics<arbitrary>], iteration_bounds = array<i64: 1, 1, 1>, scalar_prefetch = 0 : i64, scratch_operands = 2 : i64, tpu.core_type = #tpu.core_type<tc>, window_params = [{transform_indices = @transform_0, window_bounds = array<i64: 16, 32>}, {transform_indices = @transform_1, window_bounds = array<i64: 32, 96>}, {transform_indices = @transform_2, window_bounds = array<i64: 1, 96>}, {transform_indices = @transform_3, window_bounds = array<i64: 1, 96>}, {transform_indices = @transform_4, window_bounds = array<i64: 16, 96>}]} {
    %c0_i32 = arith.constant 0 : i32
    %0 = arith.cmpi eq, %arg2, %c0_i32 : i32
    %1 = arith.extui %0 : i1 to i32
    %c0_i32_0 = arith.constant 0 : i32
    %2 = arith.cmpi ne, %1, %c0_i32_0 : i32
    scf.if %2 {
      %cst_12 = arith.constant 0.000000e+00 : f32
      %19 = vector.broadcast %cst_12 : f32 to vector<16x96xf32>
      %c0_13 = arith.constant 0 : index
      %c0_14 = arith.constant 0 : index
      %20 = vector.load %arg8[%c0_13, %c0_14] : memref<16x96xf32, #tpu.memory_space<vmem>>, vector<16x96xf32>
      tpu.vector_store %arg8[%c0_13, %c0_14], %19 {strides = array<i32>} : memref<16x96xf32, #tpu.memory_space<vmem>>, vector<16x96xf32>,
    } else {
    }
    %c0_i32_1 = arith.constant 0 : i32
    %3 = arith.cmpi eq, %arg1, %c0_i32_1 : i32
    %4 = arith.extui %3 : i1 to i32
    %c0_i32_2 = arith.constant 0 : i32
    %5 = arith.cmpi ne, %4, %c0_i32_2 : i32
    scf.if %5 {
      %c0_12 = arith.constant 0 : index
      %c0_13 = arith.constant 0 : index
      %19 = vector.load %arg3[%c0_12, %c0_13] : memref<16x32xbf16, #tpu.memory_space<vmem>>, vector<16x32xbf16>
      %20 = arith.extf %19 : vector<16x32xbf16> to vector<16x32xf32>
      %21 = vector.shape_cast %20 : vector<16x32xf32> to vector<16x1x32xf32>
      %22 = math.absf %21 : vector<16x1x32xf32>
      %cst_14 = arith.constant dense<0xFF800000> : vector<16x1xf32>
      %23 = vector.multi_reduction <maximumf>, %22, %cst_14 [2] : vector<16x1x32xf32> to vector<16x1xf32>
      %24 = vector.shape_cast %23 : vector<16x1xf32> to vector<16x1x1xf32>
      %cst_15 = arith.constant 9.99999996E-13 : f32
      %25 = vector.broadcast %cst_15 : f32 to vector<16x1x1xf32>
      %26 = arith.maximumf %24, %25 : vector<16x1x1xf32>
      %cst_16 = arith.constant 1.74386169E-5 : f32
      %27 = vector.broadcast %cst_16 : f32 to vector<16x1x1xf32>
      %28 = arith.mulf %26, %27 : vector<16x1x1xf32>
      %29 = vector.broadcast %28 : vector<16x1x1xf32> to vector<16x1x32xf32>
      %30 = arith.divf %21, %29 : vector<16x1x32xf32>
      %31 = arith.truncf %30 : vector<16x1x32xf32> to vector<16x1x32xf8E5M2>
      %32 = arith.extf %31 : vector<16x1x32xf8E5M2> to vector<16x1x32xf32>
      %33 = vector.broadcast %28 : vector<16x1x1xf32> to vector<16x1x32xf32>
      %34 = arith.mulf %32, %33 : vector<16x1x32xf32>
      %35 = vector.shape_cast %34 : vector<16x1x32xf32> to vector<16x32xf32>
      %36 = arith.truncf %35 : vector<16x32xf32> to vector<16x32xbf16>
      %37 = arith.index_cast %arg2 : i32 to index
      %c0_17 = arith.constant 0 : index
      %c0_18 = arith.constant 0 : index
      %38 = vector.load %arg9[%37, %c0_17, %c0_18] : memref<1x16x32xbf16, #tpu.memory_space<vmem>>, vector<1x16x32xbf16>
      %39 = vector.shape_cast %38 : vector<1x16x32xbf16> to vector<16x32xbf16>
      %40 = vector.shape_cast %36 : vector<16x32xbf16> to vector<1x16x32xbf16>
      tpu.vector_store %arg9[%37, %c0_17, %c0_18], %40 {strides = array<i32>} : memref<1x16x32xbf16, #tpu.memory_space<vmem>>, vector<1x16x32xbf16>,
    } else {
    }
    %6 = arith.index_cast %arg2 : i32 to index
    %c0 = arith.constant 0 : index
    %c0_3 = arith.constant 0 : index
    %7 = vector.load %arg9[%6, %c0, %c0_3] : memref<1x16x32xbf16, #tpu.memory_space<vmem>>, vector<1x16x32xbf16>
    %8 = vector.shape_cast %7 : vector<1x16x32xbf16> to vector<16x32xbf16>
    %c0_4 = arith.constant 0 : index
    %c0_5 = arith.constant 0 : index
    %9 = vector.load %arg4[%c0_4, %c0_5] : memref<32x96xf8E5M2, #tpu.memory_space<vmem>>, vector<32x96xf8E5M2>
    %10 = arith.extf %9 : vector<32x96xf8E5M2> to vector<32x96xf32>
    %11 = arith.truncf %10 : vector<32x96xf32> to vector<32x96xbf16>
    %c0_6 = arith.constant 0 : index
    %c0_7 = arith.constant 0 : index
    %12 = vector.load %arg8[%c0_6, %c0_7] : memref<16x96xf32, #tpu.memory_space<vmem>>, vector<16x96xf32>
    %cst = arith.constant dense<0.000000e+00> : vector<16x96xf32>
    %13 = tpu.matmul %8, %11, %cst {dimension_numbers = #tpu.dot_dimension_numbers<[1], [0], [0], [1], [0, 0, 1, 1], [], []>} : vector<16x32xbf16>, vector<32x96xbf16>, vector<16x96xf32> -> vector<16x96xf32>
    %14 = arith.addf %12, %13 : vector<16x96xf32>
    %c0_8 = arith.constant 0 : index
    %c0_9 = arith.constant 0 : index
    %15 = vector.load %arg8[%c0_8, %c0_9] : memref<16x96xf32, #tpu.memory_space<vmem>>, vector<16x96xf32>
    tpu.vector_store %arg8[%c0_8, %c0_9], %14 {strides = array<i32>} : memref<16x96xf32, #tpu.memory_space<vmem>>, vector<16x96xf32>,
    %c0_i32_10 = arith.constant 0 : i32
    %16 = arith.cmpi eq, %arg2, %c0_i32_10 : i32
    %17 = arith.extui %16 : i1 to i32
    %c0_i32_11 = arith.constant 0 : i32
    %18 = arith.cmpi ne, %17, %c0_i32_11 : i32
    scf.if %18 {
      %c0_12 = arith.constant 0 : index
      %c0_13 = arith.constant 0 : index
      %19 = vector.load %arg8[%c0_12, %c0_13] : memref<16x96xf32, #tpu.memory_space<vmem>>, vector<16x96xf32>
      %c0_14 = arith.constant 0 : index
      %c0_15 = arith.constant 0 : index
      %20 = vector.load %arg5[%c0_14, %c0_15] : memref<1x96xf32, #tpu.memory_space<vmem>>, vector<1x96xf32>
      %21 = vector.broadcast %20 : vector<1x96xf32> to vector<16x96xf32>
      %22 = arith.mulf %19, %21 : vector<16x96xf32>
      %c0_16 = arith.constant 0 : index
      %c0_17 = arith.constant 0 : index
      %23 = vector.load %arg6[%c0_16, %c0_17] : memref<1x96xf32, #tpu.memory_space<vmem>>, vector<1x96xf32>
      %24 = vector.broadcast %23 : vector<1x96xf32> to vector<16x96xf32>
      %25 = arith.addf %22, %24 : vector<16x96xf32>
      %26 = arith.truncf %25 : vector<16x96xf32> to vector<16x96xbf16>
      %c0_18 = arith.constant 0 : index
      %c0_19 = arith.constant 0 : index
      %27 = vector.load %arg7[%c0_18, %c0_19] : memref<16x96xbf16, #tpu.memory_space<vmem>>, vector<16x96xbf16>
      tpu.vector_store %arg7[%c0_18, %c0_19], %26 {strides = array<i32>} : memref<16x96xbf16, #tpu.memory_space<vmem>>, vector<16x96xbf16>,
    } else {
    }
    return
  }
  func.func @transform_0(%arg0: i32, %arg1: i32, %arg2: i32) -> (i32, i32) {
    %c0_i32 = arith.constant 0 : i32
    return %arg0, %arg2 : i32, i32
  }
  func.func @transform_1(%arg0: i32, %arg1: i32, %arg2: i32) -> (i32, i32) {
    %c0_i32 = arith.constant 0 : i32
    return %arg2, %arg1 : i32, i32
  }
  func.func @transform_2(%arg0: i32, %arg1: i32, %arg2: i32) -> (i32, i32) {
    %c0_i32 = arith.constant 0 : i32
    %c0_i32_0 = arith.constant 0 : i32
    return %c0_i32, %arg1 : i32, i32
  }
  func.func @transform_3(%arg0: i32, %arg1: i32, %arg2: i32) -> (i32, i32) {
    %c0_i32 = arith.constant 0 : i32
    %c0_i32_0 = arith.constant 0 : i32
    return %c0_i32, %arg1 : i32, i32
  }
  func.func @transform_4(%arg0: i32, %arg1: i32, %arg2: i32) -> (i32, i32) {
    %c0_i32 = arith.constant 0 : i32
    return %arg0, %arg1 : i32, i32
  }
}

module attributes {stable_mosaic.version = 11 : i64} {
  func.func @_flash_attn_kernel(%arg0: i32, %arg1: i32, %arg2: i32, %arg3: i32, %arg4: memref<1x1x8x8xbf16, #tpu.memory_space<vmem>>, %arg5: memref<1x1x8x8xbf16, #tpu.memory_space<vmem>>, %arg6: memref<1x1x8x8xbf16, #tpu.memory_space<vmem>>, %arg7: memref<1x8x8xf32, #tpu.memory_space<vmem>>, %arg8: memref<1x1x8x8xbf16, #tpu.memory_space<vmem>>, %arg9: memref<8x1xf32, #tpu.memory_space<vmem>>, %arg10: memref<8x1xf32, #tpu.memory_space<vmem>>, %arg11: memref<8x8xf32, #tpu.memory_space<vmem>>) attributes {dimension_semantics = [#tpu.dimension_semantics<parallel>, #tpu.dimension_semantics<parallel>, #tpu.dimension_semantics<parallel>, #tpu.dimension_semantics<arbitrary>], iteration_bounds = array<i64: 2, 4, 1, 1>, scalar_prefetch = 0 : i64, scratch_operands = 3 : i64, tpu.core_type = #tpu.core_type<tc>, window_params = [{transform_indices = @transform_0, window_bounds = array<i64: 1, 1, 8, 8>}, {transform_indices = @transform_1, window_bounds = array<i64: 1, 1, 8, 8>}, {transform_indices = @transform_2, window_bounds = array<i64: 1, 1, 8, 8>}, {transform_indices = @transform_3, window_bounds = array<i64: 1, 8, 8>}, {transform_indices = @transform_4, window_bounds = array<i64: 1, 1, 8, 8>}]} {
    %c0_i32 = arith.constant 0 : i32
    %0 = arith.cmpi eq, %arg3, %c0_i32 : i32
    %1 = arith.extui %0 : i1 to i32
    %c0_i32_0 = arith.constant 0 : i32
    %2 = arith.cmpi ne, %1, %c0_i32_0 : i32
    scf.if %2 {
      %cst_34 = arith.constant -1.000000e+30 : f32
      %42 = vector.broadcast %cst_34 : f32 to vector<8x1xf32>
      %c0_35 = arith.constant 0 : index
      %c0_36 = arith.constant 0 : index
      %43 = vector.load %arg9[%c0_35, %c0_36] : memref<8x1xf32, #tpu.memory_space<vmem>>, vector<8x1xf32>
      tpu.vector_store %arg9[%c0_35, %c0_36], %42 {strides = array<i32>} : memref<8x1xf32, #tpu.memory_space<vmem>>, vector<8x1xf32>,
      %cst_37 = arith.constant 0.000000e+00 : f32
      %44 = vector.broadcast %cst_37 : f32 to vector<8x1xf32>
      %c0_38 = arith.constant 0 : index
      %c0_39 = arith.constant 0 : index
      %45 = vector.load %arg10[%c0_38, %c0_39] : memref<8x1xf32, #tpu.memory_space<vmem>>, vector<8x1xf32>
      tpu.vector_store %arg10[%c0_38, %c0_39], %44 {strides = array<i32>} : memref<8x1xf32, #tpu.memory_space<vmem>>, vector<8x1xf32>,
      %cst_40 = arith.constant 0.000000e+00 : f32
      %46 = vector.broadcast %cst_40 : f32 to vector<8x8xf32>
      %c0_41 = arith.constant 0 : index
      %c0_42 = arith.constant 0 : index
      %47 = vector.load %arg11[%c0_41, %c0_42] : memref<8x8xf32, #tpu.memory_space<vmem>>, vector<8x8xf32>
      tpu.vector_store %arg11[%c0_41, %c0_42], %46 {strides = array<i32>} : memref<8x8xf32, #tpu.memory_space<vmem>>, vector<8x8xf32>,
    } else {
    }
    %c0 = arith.constant 0 : index
    %c0_1 = arith.constant 0 : index
    %c0_2 = arith.constant 0 : index
    %c0_3 = arith.constant 0 : index
    %3 = vector.load %arg4[%c0, %c0_1, %c0_2, %c0_3] : memref<1x1x8x8xbf16, #tpu.memory_space<vmem>>, vector<1x1x8x8xbf16>
    %4 = vector.shape_cast %3 : vector<1x1x8x8xbf16> to vector<8x8xbf16>
    %c0_4 = arith.constant 0 : index
    %c0_5 = arith.constant 0 : index
    %c0_6 = arith.constant 0 : index
    %c0_7 = arith.constant 0 : index
    %5 = vector.load %arg5[%c0_4, %c0_5, %c0_6, %c0_7] : memref<1x1x8x8xbf16, #tpu.memory_space<vmem>>, vector<1x1x8x8xbf16>
    %6 = vector.shape_cast %5 : vector<1x1x8x8xbf16> to vector<8x8xbf16>
    %c0_8 = arith.constant 0 : index
    %c0_9 = arith.constant 0 : index
    %c0_10 = arith.constant 0 : index
    %c0_11 = arith.constant 0 : index
    %7 = vector.load %arg6[%c0_8, %c0_9, %c0_10, %c0_11] : memref<1x1x8x8xbf16, #tpu.memory_space<vmem>>, vector<1x1x8x8xbf16>
    %8 = vector.shape_cast %7 : vector<1x1x8x8xbf16> to vector<8x8xbf16>
    %cst = arith.constant dense<0.000000e+00> : vector<8x8xf32>
    %9 = tpu.matmul %4, %6, %cst {dimension_numbers = #tpu.dot_dimension_numbers<[1], [1], [0], [0], [0, 0, 1, 0], [], []>} : vector<8x8xbf16>, vector<8x8xbf16>, vector<8x8xf32> -> vector<8x8xf32>
    %c0_12 = arith.constant 0 : index
    %c0_13 = arith.constant 0 : index
    %c0_14 = arith.constant 0 : index
    %10 = vector.load %arg7[%c0_12, %c0_13, %c0_14] : memref<1x8x8xf32, #tpu.memory_space<vmem>>, vector<1x8x8xf32>
    %11 = vector.shape_cast %10 : vector<1x8x8xf32> to vector<8x8xf32>
    %cst_15 = arith.constant 0.000000e+00 : f32
    %12 = vector.broadcast %cst_15 : f32 to vector<8x8xf32>
    %13 = arith.cmpf oeq, %11, %12 : vector<8x8xf32>
    %cst_16 = arith.constant -1.000000e+30 : f32
    %14 = vector.broadcast %cst_16 : f32 to vector<8x8xf32>
    %15 = arith.select %13, %14, %9 : vector<8x8xi1>, vector<8x8xf32>
    %c0_17 = arith.constant 0 : index
    %c0_18 = arith.constant 0 : index
    %16 = vector.load %arg9[%c0_17, %c0_18] : memref<8x1xf32, #tpu.memory_space<vmem>>, vector<8x1xf32>
    %cst_19 = arith.constant dense<0xFF800000> : vector<8xf32>
    %17 = vector.multi_reduction <maximumf>, %15, %cst_19 [1] : vector<8x8xf32> to vector<8xf32>
    %18 = vector.shape_cast %17 : vector<8xf32> to vector<8x1xf32>
    %19 = arith.maximumf %16, %18 : vector<8x1xf32>
    %20 = arith.subf %16, %19 : vector<8x1xf32>
    %21 = math.exp %20 : vector<8x1xf32>
    %22 = vector.broadcast %19 : vector<8x1xf32> to vector<8x8xf32>
    %23 = arith.subf %15, %22 : vector<8x8xf32>
    %24 = math.exp %23 : vector<8x8xf32>
    %c0_20 = arith.constant 0 : index
    %c0_21 = arith.constant 0 : index
    %25 = vector.load %arg10[%c0_20, %c0_21] : memref<8x1xf32, #tpu.memory_space<vmem>>, vector<8x1xf32>
    %26 = arith.mulf %21, %25 : vector<8x1xf32>
    %cst_22 = arith.constant dense<0.000000e+00> : vector<8xf32>
    %27 = vector.multi_reduction <add>, %24, %cst_22 [1] : vector<8x8xf32> to vector<8xf32>
    %28 = vector.shape_cast %27 : vector<8xf32> to vector<8x1xf32>
    %29 = arith.addf %26, %28 : vector<8x1xf32>
    %c0_23 = arith.constant 0 : index
    %c0_24 = arith.constant 0 : index
    %30 = vector.load %arg10[%c0_23, %c0_24] : memref<8x1xf32, #tpu.memory_space<vmem>>, vector<8x1xf32>
    tpu.vector_store %arg10[%c0_23, %c0_24], %29 {strides = array<i32>} : memref<8x1xf32, #tpu.memory_space<vmem>>, vector<8x1xf32>,
    %c0_25 = arith.constant 0 : index
    %c0_26 = arith.constant 0 : index
    %31 = vector.load %arg11[%c0_25, %c0_26] : memref<8x8xf32, #tpu.memory_space<vmem>>, vector<8x8xf32>
    %32 = vector.broadcast %21 : vector<8x1xf32> to vector<8x8xf32>
    %33 = arith.mulf %32, %31 : vector<8x8xf32>
    %34 = arith.truncf %24 : vector<8x8xf32> to vector<8x8xbf16>
    %cst_27 = arith.constant dense<0.000000e+00> : vector<8x8xf32>
    %35 = tpu.matmul %34, %8, %cst_27 {dimension_numbers = #tpu.dot_dimension_numbers<[1], [0], [0], [1], [0, 0, 1, 1], [], []>} : vector<8x8xbf16>, vector<8x8xbf16>, vector<8x8xf32> -> vector<8x8xf32>
    %36 = arith.addf %33, %35 : vector<8x8xf32>
    %c0_28 = arith.constant 0 : index
    %c0_29 = arith.constant 0 : index
    %37 = vector.load %arg11[%c0_28, %c0_29] : memref<8x8xf32, #tpu.memory_space<vmem>>, vector<8x8xf32>
    tpu.vector_store %arg11[%c0_28, %c0_29], %36 {strides = array<i32>} : memref<8x8xf32, #tpu.memory_space<vmem>>, vector<8x8xf32>,
    %c0_30 = arith.constant 0 : index
    %c0_31 = arith.constant 0 : index
    %38 = vector.load %arg9[%c0_30, %c0_31] : memref<8x1xf32, #tpu.memory_space<vmem>>, vector<8x1xf32>
    tpu.vector_store %arg9[%c0_30, %c0_31], %19 {strides = array<i32>} : memref<8x1xf32, #tpu.memory_space<vmem>>, vector<8x1xf32>,
    %c0_i32_32 = arith.constant 0 : i32
    %39 = arith.cmpi eq, %arg3, %c0_i32_32 : i32
    %40 = arith.extui %39 : i1 to i32
    %c0_i32_33 = arith.constant 0 : i32
    %41 = arith.cmpi ne, %40, %c0_i32_33 : i32
    scf.if %41 {
      %c0_34 = arith.constant 0 : index
      %c0_35 = arith.constant 0 : index
      %42 = vector.load %arg10[%c0_34, %c0_35] : memref<8x1xf32, #tpu.memory_space<vmem>>, vector<8x1xf32>
      %43 = tpu.reciprocal %42 {approx = true} : vector<8x1xf32> -> vector<8x1xf32>
      %c0_36 = arith.constant 0 : index
      %c0_37 = arith.constant 0 : index
      %44 = vector.load %arg11[%c0_36, %c0_37] : memref<8x8xf32, #tpu.memory_space<vmem>>, vector<8x8xf32>
      %45 = vector.broadcast %43 : vector<8x1xf32> to vector<8x8xf32>
      %46 = arith.mulf %44, %45 : vector<8x8xf32>
      %47 = arith.truncf %46 : vector<8x8xf32> to vector<8x8xbf16>
      %c0_38 = arith.constant 0 : index
      %c0_39 = arith.constant 0 : index
      %c0_40 = arith.constant 0 : index
      %c0_41 = arith.constant 0 : index
      %48 = vector.load %arg8[%c0_38, %c0_39, %c0_40, %c0_41] : memref<1x1x8x8xbf16, #tpu.memory_space<vmem>>, vector<1x1x8x8xbf16>
      %49 = vector.shape_cast %48 : vector<1x1x8x8xbf16> to vector<8x8xbf16>
      %50 = vector.shape_cast %47 : vector<8x8xbf16> to vector<1x1x8x8xbf16>
      tpu.vector_store %arg8[%c0_38, %c0_39, %c0_40, %c0_41], %50 {strides = array<i32>} : memref<1x1x8x8xbf16, #tpu.memory_space<vmem>>, vector<1x1x8x8xbf16>,
    } else {
    }
    return
  }
  func.func @transform_0(%arg0: i32, %arg1: i32, %arg2: i32, %arg3: i32) -> (i32, i32, i32, i32) {
    %c0_i32 = arith.constant 0 : i32
    %c0_i32_0 = arith.constant 0 : i32
    return %arg0, %arg1, %arg2, %c0_i32 : i32, i32, i32, i32
  }
  func.func @transform_1(%arg0: i32, %arg1: i32, %arg2: i32, %arg3: i32) -> (i32, i32, i32, i32) {
    %c0_i32 = arith.constant 0 : i32
    %c0_i32_0 = arith.constant 0 : i32
    return %arg0, %arg1, %arg3, %c0_i32 : i32, i32, i32, i32
  }
  func.func @transform_2(%arg0: i32, %arg1: i32, %arg2: i32, %arg3: i32) -> (i32, i32, i32, i32) {
    %c0_i32 = arith.constant 0 : i32
    %c0_i32_0 = arith.constant 0 : i32
    return %arg0, %arg1, %arg3, %c0_i32 : i32, i32, i32, i32
  }
  func.func @transform_3(%arg0: i32, %arg1: i32, %arg2: i32, %arg3: i32) -> (i32, i32, i32) {
    %c0_i32 = arith.constant 0 : i32
    return %arg0, %arg2, %arg3 : i32, i32, i32
  }
  func.func @transform_4(%arg0: i32, %arg1: i32, %arg2: i32, %arg3: i32) -> (i32, i32, i32, i32) {
    %c0_i32 = arith.constant 0 : i32
    %c0_i32_0 = arith.constant 0 : i32
    return %arg0, %arg1, %arg2, %c0_i32 : i32, i32, i32, i32
  }
}

module attributes {stable_mosaic.version = 11 : i64} {
  func.func @_fp8_linear_kernel(%arg0: i32, %arg1: i32, %arg2: i32, %arg3: memref<16x32xbf16, #tpu.memory_space<vmem>>, %arg4: memref<32x32xf8E5M2, #tpu.memory_space<vmem>>, %arg5: memref<1x32xf32, #tpu.memory_space<vmem>>, %arg6: memref<1x32xf32, #tpu.memory_space<vmem>>, %arg7: memref<16x32xbf16, #tpu.memory_space<vmem>>, %arg8: memref<16x32xbf16, #tpu.memory_space<vmem>>, %arg9: memref<16x32xf32, #tpu.memory_space<vmem>>, %arg10: memref<1x16x32xbf16, #tpu.memory_space<vmem>>) attributes {dimension_semantics = [#tpu.dimension_semantics<parallel>, #tpu.dimension_semantics<arbitrary>, #tpu.dimension_semantics<arbitrary>], iteration_bounds = array<i64: 1, 1, 1>, scalar_prefetch = 0 : i64, scratch_operands = 2 : i64, tpu.core_type = #tpu.core_type<tc>, window_params = [{transform_indices = @transform_0, window_bounds = array<i64: 16, 32>}, {transform_indices = @transform_1, window_bounds = array<i64: 32, 32>}, {transform_indices = @transform_2, window_bounds = array<i64: 1, 32>}, {transform_indices = @transform_3, window_bounds = array<i64: 1, 32>}, {transform_indices = @transform_4, window_bounds = array<i64: 16, 32>}, {transform_indices = @transform_5, window_bounds = array<i64: 16, 32>}]} {
    %c0_i32 = arith.constant 0 : i32
    %0 = arith.cmpi eq, %arg2, %c0_i32 : i32
    %1 = arith.extui %0 : i1 to i32
    %c0_i32_0 = arith.constant 0 : i32
    %2 = arith.cmpi ne, %1, %c0_i32_0 : i32
    scf.if %2 {
      %cst_12 = arith.constant 0.000000e+00 : f32
      %19 = vector.broadcast %cst_12 : f32 to vector<16x32xf32>
      %c0_13 = arith.constant 0 : index
      %c0_14 = arith.constant 0 : index
      %20 = vector.load %arg9[%c0_13, %c0_14] : memref<16x32xf32, #tpu.memory_space<vmem>>, vector<16x32xf32>
      tpu.vector_store %arg9[%c0_13, %c0_14], %19 {strides = array<i32>} : memref<16x32xf32, #tpu.memory_space<vmem>>, vector<16x32xf32>,
    } else {
    }
    %c0_i32_1 = arith.constant 0 : i32
    %3 = arith.cmpi eq, %arg1, %c0_i32_1 : i32
    %4 = arith.extui %3 : i1 to i32
    %c0_i32_2 = arith.constant 0 : i32
    %5 = arith.cmpi ne, %4, %c0_i32_2 : i32
    scf.if %5 {
      %c0_12 = arith.constant 0 : index
      %c0_13 = arith.constant 0 : index
      %19 = vector.load %arg3[%c0_12, %c0_13] : memref<16x32xbf16, #tpu.memory_space<vmem>>, vector<16x32xbf16>
      %20 = arith.extf %19 : vector<16x32xbf16> to vector<16x32xf32>
      %21 = vector.shape_cast %20 : vector<16x32xf32> to vector<16x1x32xf32>
      %22 = math.absf %21 : vector<16x1x32xf32>
      %cst_14 = arith.constant dense<0xFF800000> : vector<16x1xf32>
      %23 = vector.multi_reduction <maximumf>, %22, %cst_14 [2] : vector<16x1x32xf32> to vector<16x1xf32>
      %24 = vector.shape_cast %23 : vector<16x1xf32> to vector<16x1x1xf32>
      %cst_15 = arith.constant 9.99999996E-13 : f32
      %25 = vector.broadcast %cst_15 : f32 to vector<16x1x1xf32>
      %26 = arith.maximumf %24, %25 : vector<16x1x1xf32>
      %cst_16 = arith.constant 1.74386169E-5 : f32
      %27 = vector.broadcast %cst_16 : f32 to vector<16x1x1xf32>
      %28 = arith.mulf %26, %27 : vector<16x1x1xf32>
      %29 = vector.broadcast %28 : vector<16x1x1xf32> to vector<16x1x32xf32>
      %30 = arith.divf %21, %29 : vector<16x1x32xf32>
      %31 = arith.truncf %30 : vector<16x1x32xf32> to vector<16x1x32xf8E5M2>
      %32 = arith.extf %31 : vector<16x1x32xf8E5M2> to vector<16x1x32xf32>
      %33 = vector.broadcast %28 : vector<16x1x1xf32> to vector<16x1x32xf32>
      %34 = arith.mulf %32, %33 : vector<16x1x32xf32>
      %35 = vector.shape_cast %34 : vector<16x1x32xf32> to vector<16x32xf32>
      %36 = arith.truncf %35 : vector<16x32xf32> to vector<16x32xbf16>
      %37 = arith.index_cast %arg2 : i32 to index
      %c0_17 = arith.constant 0 : index
      %c0_18 = arith.constant 0 : index
      %38 = vector.load %arg10[%37, %c0_17, %c0_18] : memref<1x16x32xbf16, #tpu.memory_space<vmem>>, vector<1x16x32xbf16>
      %39 = vector.shape_cast %38 : vector<1x16x32xbf16> to vector<16x32xbf16>
      %40 = vector.shape_cast %36 : vector<16x32xbf16> to vector<1x16x32xbf16>
      tpu.vector_store %arg10[%37, %c0_17, %c0_18], %40 {strides = array<i32>} : memref<1x16x32xbf16, #tpu.memory_space<vmem>>, vector<1x16x32xbf16>,
    } else {
    }
    %6 = arith.index_cast %arg2 : i32 to index
    %c0 = arith.constant 0 : index
    %c0_3 = arith.constant 0 : index
    %7 = vector.load %arg10[%6, %c0, %c0_3] : memref<1x16x32xbf16, #tpu.memory_space<vmem>>, vector<1x16x32xbf16>
    %8 = vector.shape_cast %7 : vector<1x16x32xbf16> to vector<16x32xbf16>
    %c0_4 = arith.constant 0 : index
    %c0_5 = arith.constant 0 : index
    %9 = vector.load %arg4[%c0_4, %c0_5] : memref<32x32xf8E5M2, #tpu.memory_space<vmem>>, vector<32x32xf8E5M2>
    %10 = arith.extf %9 : vector<32x32xf8E5M2> to vector<32x32xf32>
    %11 = arith.truncf %10 : vector<32x32xf32> to vector<32x32xbf16>
    %c0_6 = arith.constant 0 : index
    %c0_7 = arith.constant 0 : index
    %12 = vector.load %arg9[%c0_6, %c0_7] : memref<16x32xf32, #tpu.memory_space<vmem>>, vector<16x32xf32>
    %cst = arith.constant dense<0.000000e+00> : vector<16x32xf32>
    %13 = tpu.matmul %8, %11, %cst {dimension_numbers = #tpu.dot_dimension_numbers<[1], [0], [0], [1], [0, 0, 1, 1], [], []>} : vector<16x32xbf16>, vector<32x32xbf16>, vector<16x32xf32> -> vector<16x32xf32>
    %14 = arith.addf %12, %13 : vector<16x32xf32>
    %c0_8 = arith.constant 0 : index
    %c0_9 = arith.constant 0 : index
    %15 = vector.load %arg9[%c0_8, %c0_9] : memref<16x32xf32, #tpu.memory_space<vmem>>, vector<16x32xf32>
    tpu.vector_store %arg9[%c0_8, %c0_9], %14 {strides = array<i32>} : memref<16x32xf32, #tpu.memory_space<vmem>>, vector<16x32xf32>,
    %c0_i32_10 = arith.constant 0 : i32
    %16 = arith.cmpi eq, %arg2, %c0_i32_10 : i32
    %17 = arith.extui %16 : i1 to i32
    %c0_i32_11 = arith.constant 0 : i32
    %18 = arith.cmpi ne, %17, %c0_i32_11 : i32
    scf.if %18 {
      %c0_12 = arith.constant 0 : index
      %c0_13 = arith.constant 0 : index
      %19 = vector.load %arg9[%c0_12, %c0_13] : memref<16x32xf32, #tpu.memory_space<vmem>>, vector<16x32xf32>
      %c0_14 = arith.constant 0 : index
      %c0_15 = arith.constant 0 : index
      %20 = vector.load %arg5[%c0_14, %c0_15] : memref<1x32xf32, #tpu.memory_space<vmem>>, vector<1x32xf32>
      %21 = vector.broadcast %20 : vector<1x32xf32> to vector<16x32xf32>
      %22 = arith.mulf %19, %21 : vector<16x32xf32>
      %c0_16 = arith.constant 0 : index
      %c0_17 = arith.constant 0 : index
      %23 = vector.load %arg6[%c0_16, %c0_17] : memref<1x32xf32, #tpu.memory_space<vmem>>, vector<1x32xf32>
      %24 = vector.broadcast %23 : vector<1x32xf32> to vector<16x32xf32>
      %25 = arith.addf %22, %24 : vector<16x32xf32>
      %c0_18 = arith.constant 0 : index
      %c0_19 = arith.constant 0 : index
      %26 = vector.load %arg7[%c0_18, %c0_19] : memref<16x32xbf16, #tpu.memory_space<vmem>>, vector<16x32xbf16>
      %27 = arith.extf %26 : vector<16x32xbf16> to vector<16x32xf32>
      %28 = arith.addf %25, %27 : vector<16x32xf32>
      %29 = arith.truncf %28 : vector<16x32xf32> to vector<16x32xbf16>
      %c0_20 = arith.constant 0 : index
      %c0_21 = arith.constant 0 : index
      %30 = vector.load %arg8[%c0_20, %c0_21] : memref<16x32xbf16, #tpu.memory_space<vmem>>, vector<16x32xbf16>
      tpu.vector_store %arg8[%c0_20, %c0_21], %29 {strides = array<i32>} : memref<16x32xbf16, #tpu.memory_space<vmem>>, vector<16x32xbf16>,
    } else {
    }
    return
  }
  func.func @transform_0(%arg0: i32, %arg1: i32, %arg2: i32) -> (i32, i32) {
    %c0_i32 = arith.constant 0 : i32
    return %arg0, %arg2 : i32, i32
  }
  func.func @transform_1(%arg0: i32, %arg1: i32, %arg2: i32) -> (i32, i32) {
    %c0_i32 = arith.constant 0 : i32
    return %arg2, %arg1 : i32, i32
  }
  func.func @transform_2(%arg0: i32, %arg1: i32, %arg2: i32) -> (i32, i32) {
    %c0_i32 = arith.constant 0 : i32
    %c0_i32_0 = arith.constant 0 : i32
    return %c0_i32, %arg1 : i32, i32
  }
  func.func @transform_3(%arg0: i32, %arg1: i32, %arg2: i32) -> (i32, i32) {
    %c0_i32 = arith.constant 0 : i32
    %c0_i32_0 = arith.constant 0 : i32
    return %c0_i32, %arg1 : i32, i32
  }
  func.func @transform_4(%arg0: i32, %arg1: i32, %arg2: i32) -> (i32, i32) {
    %c0_i32 = arith.constant 0 : i32
    return %arg0, %arg1 : i32, i32
  }
  func.func @transform_5(%arg0: i32, %arg1: i32, %arg2: i32) -> (i32, i32) {
    %c0_i32 = arith.constant 0 : i32
    return %arg0, %arg1 : i32, i32
  }
}

module attributes {stable_mosaic.version = 11 : i64} {
  func.func @_ln_kernel(%arg0: i32, %arg1: memref<16x32xbf16, #tpu.memory_space<vmem>>, %arg2: memref<1x32xf32, #tpu.memory_space<vmem>>, %arg3: memref<1x32xf32, #tpu.memory_space<vmem>>, %arg4: memref<16x32xbf16, #tpu.memory_space<vmem>>) attributes {dimension_semantics = [#tpu.dimension_semantics<parallel>], iteration_bounds = array<i64: 1>, scalar_prefetch = 0 : i64, scratch_operands = 0 : i64, tpu.core_type = #tpu.core_type<tc>, window_params = [{transform_indices = @transform_0, window_bounds = array<i64: 16, 32>}, {pipeline_mode = #tpu.pipeline_mode<synchronous>, transform_indices = @transform_1, window_bounds = array<i64: 1, 32>}, {pipeline_mode = #tpu.pipeline_mode<synchronous>, transform_indices = @transform_2, window_bounds = array<i64: 1, 32>}, {transform_indices = @transform_3, window_bounds = array<i64: 16, 32>}]} {
    %c0 = arith.constant 0 : index
    %c0_0 = arith.constant 0 : index
    %0 = vector.load %arg1[%c0, %c0_0] : memref<16x32xbf16, #tpu.memory_space<vmem>>, vector<16x32xbf16>
    %1 = arith.extf %0 : vector<16x32xbf16> to vector<16x32xf32>
    %cst = arith.constant dense<0.000000e+00> : vector<16xf32>
    %2 = vector.multi_reduction <add>, %1, %cst [1] : vector<16x32xf32> to vector<16xf32>
    %3 = vector.shape_cast %2 : vector<16xf32> to vector<16x1xf32>
    %cst_1 = arith.constant 3.200000e+01 : f32
    %4 = vector.broadcast %cst_1 : f32 to vector<16x1xf32>
    %5 = arith.divf %3, %4 : vector<16x1xf32>
    %6 = vector.broadcast %5 : vector<16x1xf32> to vector<16x32xf32>
    %7 = arith.subf %1, %6 : vector<16x32xf32>
    %8 = arith.mulf %7, %7 : vector<16x32xf32>
    %cst_2 = arith.constant dense<0.000000e+00> : vector<16xf32>
    %9 = vector.multi_reduction <add>, %8, %cst_2 [1] : vector<16x32xf32> to vector<16xf32>
    %10 = vector.shape_cast %9 : vector<16xf32> to vector<16x1xf32>
    %cst_3 = arith.constant 3.200000e+01 : f32
    %11 = vector.broadcast %cst_3 : f32 to vector<16x1xf32>
    %12 = arith.divf %10, %11 : vector<16x1xf32>
    %cst_4 = arith.constant 9.99999974E-6 : f32
    %13 = vector.broadcast %cst_4 : f32 to vector<16x1xf32>
    %14 = arith.addf %12, %13 : vector<16x1xf32>
    %15 = math.rsqrt %14 : vector<16x1xf32>
    %16 = vector.broadcast %15 : vector<16x1xf32> to vector<16x32xf32>
    %17 = arith.mulf %7, %16 : vector<16x32xf32>
    %c0_5 = arith.constant 0 : index
    %c0_6 = arith.constant 0 : index
    %18 = vector.load %arg2[%c0_5, %c0_6] : memref<1x32xf32, #tpu.memory_space<vmem>>, vector<1x32xf32>
    %19 = vector.broadcast %18 : vector<1x32xf32> to vector<16x32xf32>
    %20 = arith.mulf %17, %19 : vector<16x32xf32>
    %c0_7 = arith.constant 0 : index
    %c0_8 = arith.constant 0 : index
    %21 = vector.load %arg3[%c0_7, %c0_8] : memref<1x32xf32, #tpu.memory_space<vmem>>, vector<1x32xf32>
    %22 = vector.broadcast %21 : vector<1x32xf32> to vector<16x32xf32>
    %23 = arith.addf %20, %22 : vector<16x32xf32>
    %24 = arith.truncf %23 : vector<16x32xf32> to vector<16x32xbf16>
    %c0_9 = arith.constant 0 : index
    %c0_10 = arith.constant 0 : index
    %25 = vector.load %arg4[%c0_9, %c0_10] : memref<16x32xbf16, #tpu.memory_space<vmem>>, vector<16x32xbf16>
    tpu.vector_store %arg4[%c0_9, %c0_10], %24 {strides = array<i32>} : memref<16x32xbf16, #tpu.memory_space<vmem>>, vector<16x32xbf16>,
    return
  }
  func.func @transform_0(%arg0: i32) -> (i32, i32) {
    %c0_i32 = arith.constant 0 : i32
    %c0_i32_0 = arith.constant 0 : i32
    return %arg0, %c0_i32 : i32, i32
  }
  func.func @transform_1(%arg0: i32) -> (i32, i32) {
    %c0_i32 = arith.constant 0 : i32
    %c0_i32_0 = arith.constant 0 : i32
    %c0_i32_1 = arith.constant 0 : i32
    return %c0_i32, %c0_i32_0 : i32, i32
  }
  func.func @transform_2(%arg0: i32) -> (i32, i32) {
    %c0_i32 = arith.constant 0 : i32
    %c0_i32_0 = arith.constant 0 : i32
    %c0_i32_1 = arith.constant 0 : i32
    return %c0_i32, %c0_i32_0 : i32, i32
  }
  func.func @transform_3(%arg0: i32) -> (i32, i32) {
    %c0_i32 = arith.constant 0 : i32
    %c0_i32_0 = arith.constant 0 : i32
    return %arg0, %c0_i32 : i32, i32
  }
}

module attributes {stable_mosaic.version = 11 : i64} {
  func.func @_fp8_linear_kernel(%arg0: i32, %arg1: i32, %arg2: i32, %arg3: memref<16x32xbf16, #tpu.memory_space<vmem>>, %arg4: memref<32x64xf8E4M3FN, #tpu.memory_space<vmem>>, %arg5: memref<1x64xf32, #tpu.memory_space<vmem>>, %arg6: memref<1x64xf32, #tpu.memory_space<vmem>>, %arg7: memref<16x64xbf16, #tpu.memory_space<vmem>>, %arg8: memref<16x64xf32, #tpu.memory_space<vmem>>, %arg9: memref<1x16x32xbf16, #tpu.memory_space<vmem>>) attributes {dimension_semantics = [#tpu.dimension_semantics<parallel>, #tpu.dimension_semantics<arbitrary>, #tpu.dimension_semantics<arbitrary>], iteration_bounds = array<i64: 1, 1, 1>, scalar_prefetch = 0 : i64, scratch_operands = 2 : i64, tpu.core_type = #tpu.core_type<tc>, window_params = [{transform_indices = @transform_0, window_bounds = array<i64: 16, 32>}, {transform_indices = @transform_1, window_bounds = array<i64: 32, 64>}, {transform_indices = @transform_2, window_bounds = array<i64: 1, 64>}, {transform_indices = @transform_3, window_bounds = array<i64: 1, 64>}, {transform_indices = @transform_4, window_bounds = array<i64: 16, 64>}]} {
    %c0_i32 = arith.constant 0 : i32
    %0 = arith.cmpi eq, %arg2, %c0_i32 : i32
    %1 = arith.extui %0 : i1 to i32
    %c0_i32_0 = arith.constant 0 : i32
    %2 = arith.cmpi ne, %1, %c0_i32_0 : i32
    scf.if %2 {
      %cst_12 = arith.constant 0.000000e+00 : f32
      %19 = vector.broadcast %cst_12 : f32 to vector<16x64xf32>
      %c0_13 = arith.constant 0 : index
      %c0_14 = arith.constant 0 : index
      %20 = vector.load %arg8[%c0_13, %c0_14] : memref<16x64xf32, #tpu.memory_space<vmem>>, vector<16x64xf32>
      tpu.vector_store %arg8[%c0_13, %c0_14], %19 {strides = array<i32>} : memref<16x64xf32, #tpu.memory_space<vmem>>, vector<16x64xf32>,
    } else {
    }
    %c0_i32_1 = arith.constant 0 : i32
    %3 = arith.cmpi eq, %arg1, %c0_i32_1 : i32
    %4 = arith.extui %3 : i1 to i32
    %c0_i32_2 = arith.constant 0 : i32
    %5 = arith.cmpi ne, %4, %c0_i32_2 : i32
    scf.if %5 {
      %c0_12 = arith.constant 0 : index
      %c0_13 = arith.constant 0 : index
      %19 = vector.load %arg3[%c0_12, %c0_13] : memref<16x32xbf16, #tpu.memory_space<vmem>>, vector<16x32xbf16>
      %20 = arith.extf %19 : vector<16x32xbf16> to vector<16x32xf32>
      %21 = vector.shape_cast %20 : vector<16x32xf32> to vector<16x1x32xf32>
      %22 = math.absf %21 : vector<16x1x32xf32>
      %cst_14 = arith.constant dense<0xFF800000> : vector<16x1xf32>
      %23 = vector.multi_reduction <maximumf>, %22, %cst_14 [2] : vector<16x1x32xf32> to vector<16x1xf32>
      %24 = vector.shape_cast %23 : vector<16x1xf32> to vector<16x1x1xf32>
      %cst_15 = arith.constant 9.99999996E-13 : f32
      %25 = vector.broadcast %cst_15 : f32 to vector<16x1x1xf32>
      %26 = arith.maximumf %24, %25 : vector<16x1x1xf32>
      %cst_16 = arith.constant 0.00223214296 : f32
      %27 = vector.broadcast %cst_16 : f32 to vector<16x1x1xf32>
      %28 = arith.mulf %26, %27 : vector<16x1x1xf32>
      %29 = vector.broadcast %28 : vector<16x1x1xf32> to vector<16x1x32xf32>
      %30 = arith.divf %21, %29 : vector<16x1x32xf32>
      %31 = arith.truncf %30 : vector<16x1x32xf32> to vector<16x1x32xf8E4M3FN>
      %32 = arith.extf %31 : vector<16x1x32xf8E4M3FN> to vector<16x1x32xf32>
      %33 = vector.broadcast %28 : vector<16x1x1xf32> to vector<16x1x32xf32>
      %34 = arith.mulf %32, %33 : vector<16x1x32xf32>
      %35 = vector.shape_cast %34 : vector<16x1x32xf32> to vector<16x32xf32>
      %36 = arith.truncf %35 : vector<16x32xf32> to vector<16x32xbf16>
      %37 = arith.index_cast %arg2 : i32 to index
      %c0_17 = arith.constant 0 : index
      %c0_18 = arith.constant 0 : index
      %38 = vector.load %arg9[%37, %c0_17, %c0_18] : memref<1x16x32xbf16, #tpu.memory_space<vmem>>, vector<1x16x32xbf16>
      %39 = vector.shape_cast %38 : vector<1x16x32xbf16> to vector<16x32xbf16>
      %40 = vector.shape_cast %36 : vector<16x32xbf16> to vector<1x16x32xbf16>
      tpu.vector_store %arg9[%37, %c0_17, %c0_18], %40 {strides = array<i32>} : memref<1x16x32xbf16, #tpu.memory_space<vmem>>, vector<1x16x32xbf16>,
    } else {
    }
    %6 = arith.index_cast %arg2 : i32 to index
    %c0 = arith.constant 0 : index
    %c0_3 = arith.constant 0 : index
    %7 = vector.load %arg9[%6, %c0, %c0_3] : memref<1x16x32xbf16, #tpu.memory_space<vmem>>, vector<1x16x32xbf16>
    %8 = vector.shape_cast %7 : vector<1x16x32xbf16> to vector<16x32xbf16>
    %c0_4 = arith.constant 0 : index
    %c0_5 = arith.constant 0 : index
    %9 = vector.load %arg4[%c0_4, %c0_5] : memref<32x64xf8E4M3FN, #tpu.memory_space<vmem>>, vector<32x64xf8E4M3FN>
    %10 = arith.extf %9 : vector<32x64xf8E4M3FN> to vector<32x64xf32>
    %11 = arith.truncf %10 : vector<32x64xf32> to vector<32x64xbf16>
    %c0_6 = arith.constant 0 : index
    %c0_7 = arith.constant 0 : index
    %12 = vector.load %arg8[%c0_6, %c0_7] : memref<16x64xf32, #tpu.memory_space<vmem>>, vector<16x64xf32>
    %cst = arith.constant dense<0.000000e+00> : vector<16x64xf32>
    %13 = tpu.matmul %8, %11, %cst {dimension_numbers = #tpu.dot_dimension_numbers<[1], [0], [0], [1], [0, 0, 1, 1], [], []>} : vector<16x32xbf16>, vector<32x64xbf16>, vector<16x64xf32> -> vector<16x64xf32>
    %14 = arith.addf %12, %13 : vector<16x64xf32>
    %c0_8 = arith.constant 0 : index
    %c0_9 = arith.constant 0 : index
    %15 = vector.load %arg8[%c0_8, %c0_9] : memref<16x64xf32, #tpu.memory_space<vmem>>, vector<16x64xf32>
    tpu.vector_store %arg8[%c0_8, %c0_9], %14 {strides = array<i32>} : memref<16x64xf32, #tpu.memory_space<vmem>>, vector<16x64xf32>,
    %c0_i32_10 = arith.constant 0 : i32
    %16 = arith.cmpi eq, %arg2, %c0_i32_10 : i32
    %17 = arith.extui %16 : i1 to i32
    %c0_i32_11 = arith.constant 0 : i32
    %18 = arith.cmpi ne, %17, %c0_i32_11 : i32
    scf.if %18 {
      %c0_12 = arith.constant 0 : index
      %c0_13 = arith.constant 0 : index
      %19 = vector.load %arg8[%c0_12, %c0_13] : memref<16x64xf32, #tpu.memory_space<vmem>>, vector<16x64xf32>
      %c0_14 = arith.constant 0 : index
      %c0_15 = arith.constant 0 : index
      %20 = vector.load %arg5[%c0_14, %c0_15] : memref<1x64xf32, #tpu.memory_space<vmem>>, vector<1x64xf32>
      %21 = vector.broadcast %20 : vector<1x64xf32> to vector<16x64xf32>
      %22 = arith.mulf %19, %21 : vector<16x64xf32>
      %c0_16 = arith.constant 0 : index
      %c0_17 = arith.constant 0 : index
      %23 = vector.load %arg6[%c0_16, %c0_17] : memref<1x64xf32, #tpu.memory_space<vmem>>, vector<1x64xf32>
      %24 = vector.broadcast %23 : vector<1x64xf32> to vector<16x64xf32>
      %25 = arith.addf %22, %24 : vector<16x64xf32>
      %cst_18 = arith.constant 5.000000e-01 : f32
      %26 = vector.broadcast %cst_18 : f32 to vector<16x64xf32>
      %27 = arith.mulf %26, %25 : vector<16x64xf32>
      %cst_19 = arith.constant 4.471500e-02 : f32
      %28 = vector.broadcast %cst_19 : f32 to vector<16x64xf32>
      %29 = arith.mulf %28, %25 : vector<16x64xf32>
      %30 = arith.mulf %29, %25 : vector<16x64xf32>
      %31 = arith.mulf %30, %25 : vector<16x64xf32>
      %32 = arith.addf %25, %31 : vector<16x64xf32>
      %cst_20 = arith.constant 0.797884583 : f32
      %33 = vector.broadcast %cst_20 : f32 to vector<16x64xf32>
      %34 = arith.mulf %33, %32 : vector<16x64xf32>
      %35 = math.tanh %34 : vector<16x64xf32>
      %cst_21 = arith.constant 1.000000e+00 : f32
      %36 = vector.broadcast %cst_21 : f32 to vector<16x64xf32>
      %37 = arith.addf %36, %35 : vector<16x64xf32>
      %38 = arith.mulf %27, %37 : vector<16x64xf32>
      %39 = arith.truncf %38 : vector<16x64xf32> to vector<16x64xbf16>
      %c0_22 = arith.constant 0 : index
      %c0_23 = arith.constant 0 : index
      %40 = vector.load %arg7[%c0_22, %c0_23] : memref<16x64xbf16, #tpu.memory_space<vmem>>, vector<16x64xbf16>
      tpu.vector_store %arg7[%c0_22, %c0_23], %39 {strides = array<i32>} : memref<16x64xbf16, #tpu.memory_space<vmem>>, vector<16x64xbf16>,
    } else {
    }
    return
  }
  func.func @transform_0(%arg0: i32, %arg1: i32, %arg2: i32) -> (i32, i32) {
    %c0_i32 = arith.constant 0 : i32
    return %arg0, %arg2 : i32, i32
  }
  func.func @transform_1(%arg0: i32, %arg1: i32, %arg2: i32) -> (i32, i32) {
    %c0_i32 = arith.constant 0 : i32
    return %arg2, %arg1 : i32, i32
  }
  func.func @transform_2(%arg0: i32, %arg1: i32, %arg2: i32) -> (i32, i32) {
    %c0_i32 = arith.constant 0 : i32
    %c0_i32_0 = arith.constant 0 : i32
    return %c0_i32, %arg1 : i32, i32
  }
  func.func @transform_3(%arg0: i32, %arg1: i32, %arg2: i32) -> (i32, i32) {
    %c0_i32 = arith.constant 0 : i32
    %c0_i32_0 = arith.constant 0 : i32
    return %c0_i32, %arg1 : i32, i32
  }
  func.func @transform_4(%arg0: i32, %arg1: i32, %arg2: i32) -> (i32, i32) {
    %c0_i32 = arith.constant 0 : i32
    return %arg0, %arg1 : i32, i32
  }
}

module attributes {stable_mosaic.version = 11 : i64} {
  func.func @_fp8_linear_kernel(%arg0: i32, %arg1: i32, %arg2: i32, %arg3: memref<16x64xbf16, #tpu.memory_space<vmem>>, %arg4: memref<64x32xf8E4M3FN, #tpu.memory_space<vmem>>, %arg5: memref<1x32xf32, #tpu.memory_space<vmem>>, %arg6: memref<1x32xf32, #tpu.memory_space<vmem>>, %arg7: memref<16x32xbf16, #tpu.memory_space<vmem>>, %arg8: memref<16x32xbf16, #tpu.memory_space<vmem>>, %arg9: memref<16x32xf32, #tpu.memory_space<vmem>>, %arg10: memref<1x16x64xbf16, #tpu.memory_space<vmem>>) attributes {dimension_semantics = [#tpu.dimension_semantics<parallel>, #tpu.dimension_semantics<arbitrary>, #tpu.dimension_semantics<arbitrary>], iteration_bounds = array<i64: 1, 1, 1>, scalar_prefetch = 0 : i64, scratch_operands = 2 : i64, tpu.core_type = #tpu.core_type<tc>, window_params = [{transform_indices = @transform_0, window_bounds = array<i64: 16, 64>}, {transform_indices = @transform_1, window_bounds = array<i64: 64, 32>}, {transform_indices = @transform_2, window_bounds = array<i64: 1, 32>}, {transform_indices = @transform_3, window_bounds = array<i64: 1, 32>}, {transform_indices = @transform_4, window_bounds = array<i64: 16, 32>}, {transform_indices = @transform_5, window_bounds = array<i64: 16, 32>}]} {
    %c0_i32 = arith.constant 0 : i32
    %0 = arith.cmpi eq, %arg2, %c0_i32 : i32
    %1 = arith.extui %0 : i1 to i32
    %c0_i32_0 = arith.constant 0 : i32
    %2 = arith.cmpi ne, %1, %c0_i32_0 : i32
    scf.if %2 {
      %cst_12 = arith.constant 0.000000e+00 : f32
      %19 = vector.broadcast %cst_12 : f32 to vector<16x32xf32>
      %c0_13 = arith.constant 0 : index
      %c0_14 = arith.constant 0 : index
      %20 = vector.load %arg9[%c0_13, %c0_14] : memref<16x32xf32, #tpu.memory_space<vmem>>, vector<16x32xf32>
      tpu.vector_store %arg9[%c0_13, %c0_14], %19 {strides = array<i32>} : memref<16x32xf32, #tpu.memory_space<vmem>>, vector<16x32xf32>,
    } else {
    }
    %c0_i32_1 = arith.constant 0 : i32
    %3 = arith.cmpi eq, %arg1, %c0_i32_1 : i32
    %4 = arith.extui %3 : i1 to i32
    %c0_i32_2 = arith.constant 0 : i32
    %5 = arith.cmpi ne, %4, %c0_i32_2 : i32
    scf.if %5 {
      %c0_12 = arith.constant 0 : index
      %c0_13 = arith.constant 0 : index
      %19 = vector.load %arg3[%c0_12, %c0_13] : memref<16x64xbf16, #tpu.memory_space<vmem>>, vector<16x64xbf16>
      %20 = arith.extf %19 : vector<16x64xbf16> to vector<16x64xf32>
      %21 = vector.shape_cast %20 : vector<16x64xf32> to vector<16x1x64xf32>
      %22 = math.absf %21 : vector<16x1x64xf32>
      %cst_14 = arith.constant dense<0xFF800000> : vector<16x1xf32>
      %23 = vector.multi_reduction <maximumf>, %22, %cst_14 [2] : vector<16x1x64xf32> to vector<16x1xf32>
      %24 = vector.shape_cast %23 : vector<16x1xf32> to vector<16x1x1xf32>
      %cst_15 = arith.constant 9.99999996E-13 : f32
      %25 = vector.broadcast %cst_15 : f32 to vector<16x1x1xf32>
      %26 = arith.maximumf %24, %25 : vector<16x1x1xf32>
      %cst_16 = arith.constant 0.00223214296 : f32
      %27 = vector.broadcast %cst_16 : f32 to vector<16x1x1xf32>
      %28 = arith.mulf %26, %27 : vector<16x1x1xf32>
      %29 = vector.broadcast %28 : vector<16x1x1xf32> to vector<16x1x64xf32>
      %30 = arith.divf %21, %29 : vector<16x1x64xf32>
      %31 = arith.truncf %30 : vector<16x1x64xf32> to vector<16x1x64xf8E4M3FN>
      %32 = arith.extf %31 : vector<16x1x64xf8E4M3FN> to vector<16x1x64xf32>
      %33 = vector.broadcast %28 : vector<16x1x1xf32> to vector<16x1x64xf32>
      %34 = arith.mulf %32, %33 : vector<16x1x64xf32>
      %35 = vector.shape_cast %34 : vector<16x1x64xf32> to vector<16x64xf32>
      %36 = arith.truncf %35 : vector<16x64xf32> to vector<16x64xbf16>
      %37 = arith.index_cast %arg2 : i32 to index
      %c0_17 = arith.constant 0 : index
      %c0_18 = arith.constant 0 : index
      %38 = vector.load %arg10[%37, %c0_17, %c0_18] : memref<1x16x64xbf16, #tpu.memory_space<vmem>>, vector<1x16x64xbf16>
      %39 = vector.shape_cast %38 : vector<1x16x64xbf16> to vector<16x64xbf16>
      %40 = vector.shape_cast %36 : vector<16x64xbf16> to vector<1x16x64xbf16>
      tpu.vector_store %arg10[%37, %c0_17, %c0_18], %40 {strides = array<i32>} : memref<1x16x64xbf16, #tpu.memory_space<vmem>>, vector<1x16x64xbf16>,
    } else {
    }
    %6 = arith.index_cast %arg2 : i32 to index
    %c0 = arith.constant 0 : index
    %c0_3 = arith.constant 0 : index
    %7 = vector.load %arg10[%6, %c0, %c0_3] : memref<1x16x64xbf16, #tpu.memory_space<vmem>>, vector<1x16x64xbf16>
    %8 = vector.shape_cast %7 : vector<1x16x64xbf16> to vector<16x64xbf16>
    %c0_4 = arith.constant 0 : index
    %c0_5 = arith.constant 0 : index
    %9 = vector.load %arg4[%c0_4, %c0_5] : memref<64x32xf8E4M3FN, #tpu.memory_space<vmem>>, vector<64x32xf8E4M3FN>
    %10 = arith.extf %9 : vector<64x32xf8E4M3FN> to vector<64x32xf32>
    %11 = arith.truncf %10 : vector<64x32xf32> to vector<64x32xbf16>
    %c0_6 = arith.constant 0 : index
    %c0_7 = arith.constant 0 : index
    %12 = vector.load %arg9[%c0_6, %c0_7] : memref<16x32xf32, #tpu.memory_space<vmem>>, vector<16x32xf32>
    %cst = arith.constant dense<0.000000e+00> : vector<16x32xf32>
    %13 = tpu.matmul %8, %11, %cst {dimension_numbers = #tpu.dot_dimension_numbers<[1], [0], [0], [1], [0, 0, 1, 1], [], []>} : vector<16x64xbf16>, vector<64x32xbf16>, vector<16x32xf32> -> vector<16x32xf32>
    %14 = arith.addf %12, %13 : vector<16x32xf32>
    %c0_8 = arith.constant 0 : index
    %c0_9 = arith.constant 0 : index
    %15 = vector.load %arg9[%c0_8, %c0_9] : memref<16x32xf32, #tpu.memory_space<vmem>>, vector<16x32xf32>
    tpu.vector_store %arg9[%c0_8, %c0_9], %14 {strides = array<i32>} : memref<16x32xf32, #tpu.memory_space<vmem>>, vector<16x32xf32>,
    %c0_i32_10 = arith.constant 0 : i32
    %16 = arith.cmpi eq, %arg2, %c0_i32_10 : i32
    %17 = arith.extui %16 : i1 to i32
    %c0_i32_11 = arith.constant 0 : i32
    %18 = arith.cmpi ne, %17, %c0_i32_11 : i32
    scf.if %18 {
      %c0_12 = arith.constant 0 : index
      %c0_13 = arith.constant 0 : index
      %19 = vector.load %arg9[%c0_12, %c0_13] : memref<16x32xf32, #tpu.memory_space<vmem>>, vector<16x32xf32>
      %c0_14 = arith.constant 0 : index
      %c0_15 = arith.constant 0 : index
      %20 = vector.load %arg5[%c0_14, %c0_15] : memref<1x32xf32, #tpu.memory_space<vmem>>, vector<1x32xf32>
      %21 = vector.broadcast %20 : vector<1x32xf32> to vector<16x32xf32>
      %22 = arith.mulf %19, %21 : vector<16x32xf32>
      %c0_16 = arith.constant 0 : index
      %c0_17 = arith.constant 0 : index
      %23 = vector.load %arg6[%c0_16, %c0_17] : memref<1x32xf32, #tpu.memory_space<vmem>>, vector<1x32xf32>
      %24 = vector.broadcast %23 : vector<1x32xf32> to vector<16x32xf32>
      %25 = arith.addf %22, %24 : vector<16x32xf32>
      %c0_18 = arith.constant 0 : index
      %c0_19 = arith.constant 0 : index
      %26 = vector.load %arg7[%c0_18, %c0_19] : memref<16x32xbf16, #tpu.memory_space<vmem>>, vector<16x32xbf16>
      %27 = arith.extf %26 : vector<16x32xbf16> to vector<16x32xf32>
      %28 = arith.addf %25, %27 : vector<16x32xf32>
      %29 = arith.truncf %28 : vector<16x32xf32> to vector<16x32xbf16>
      %c0_20 = arith.constant 0 : index
      %c0_21 = arith.constant 0 : index
      %30 = vector.load %arg8[%c0_20, %c0_21] : memref<16x32xbf16, #tpu.memory_space<vmem>>, vector<16x32xbf16>
      tpu.vector_store %arg8[%c0_20, %c0_21], %29 {strides = array<i32>} : memref<16x32xbf16, #tpu.memory_space<vmem>>, vector<16x32xbf16>,
    } else {
    }
    return
  }
  func.func @transform_0(%arg0: i32, %arg1: i32, %arg2: i32) -> (i32, i32) {
    %c0_i32 = arith.constant 0 : i32
    return %arg0, %arg2 : i32, i32
  }
  func.func @transform_1(%arg0: i32, %arg1: i32, %arg2: i32) -> (i32, i32) {
    %c0_i32 = arith.constant 0 : i32
    return %arg2, %arg1 : i32, i32
  }
  func.func @transform_2(%arg0: i32, %arg1: i32, %arg2: i32) -> (i32, i32) {
    %c0_i32 = arith.constant 0 : i32
    %c0_i32_0 = arith.constant 0 : i32
    return %c0_i32, %arg1 : i32, i32
  }
  func.func @transform_3(%arg0: i32, %arg1: i32, %arg2: i32) -> (i32, i32) {
    %c0_i32 = arith.constant 0 : i32
    %c0_i32_0 = arith.constant 0 : i32
    return %c0_i32, %arg1 : i32, i32
  }
  func.func @transform_4(%arg0: i32, %arg1: i32, %arg2: i32) -> (i32, i32) {
    %c0_i32 = arith.constant 0 : i32
    return %arg0, %arg1 : i32, i32
  }
  func.func @transform_5(%arg0: i32, %arg1: i32, %arg2: i32) -> (i32, i32) {
    %c0_i32 = arith.constant 0 : i32
    return %arg0, %arg1 : i32, i32
  }
}

module attributes {stable_mosaic.version = 11 : i64} {
  func.func @_ln_kernel(%arg0: i32, %arg1: memref<16x32xbf16, #tpu.memory_space<vmem>>, %arg2: memref<1x32xf32, #tpu.memory_space<vmem>>, %arg3: memref<1x32xf32, #tpu.memory_space<vmem>>, %arg4: memref<16x32xf32, #tpu.memory_space<vmem>>) attributes {dimension_semantics = [#tpu.dimension_semantics<parallel>], iteration_bounds = array<i64: 1>, scalar_prefetch = 0 : i64, scratch_operands = 0 : i64, tpu.core_type = #tpu.core_type<tc>, window_params = [{transform_indices = @transform_0, window_bounds = array<i64: 16, 32>}, {pipeline_mode = #tpu.pipeline_mode<synchronous>, transform_indices = @transform_1, window_bounds = array<i64: 1, 32>}, {pipeline_mode = #tpu.pipeline_mode<synchronous>, transform_indices = @transform_2, window_bounds = array<i64: 1, 32>}, {transform_indices = @transform_3, window_bounds = array<i64: 16, 32>}]} {
    %c0 = arith.constant 0 : index
    %c0_0 = arith.constant 0 : index
    %0 = vector.load %arg1[%c0, %c0_0] : memref<16x32xbf16, #tpu.memory_space<vmem>>, vector<16x32xbf16>
    %1 = arith.extf %0 : vector<16x32xbf16> to vector<16x32xf32>
    %cst = arith.constant dense<0.000000e+00> : vector<16xf32>
    %2 = vector.multi_reduction <add>, %1, %cst [1] : vector<16x32xf32> to vector<16xf32>
    %3 = vector.shape_cast %2 : vector<16xf32> to vector<16x1xf32>
    %cst_1 = arith.constant 3.200000e+01 : f32
    %4 = vector.broadcast %cst_1 : f32 to vector<16x1xf32>
    %5 = arith.divf %3, %4 : vector<16x1xf32>
    %6 = vector.broadcast %5 : vector<16x1xf32> to vector<16x32xf32>
    %7 = arith.subf %1, %6 : vector<16x32xf32>
    %8 = arith.mulf %7, %7 : vector<16x32xf32>
    %cst_2 = arith.constant dense<0.000000e+00> : vector<16xf32>
    %9 = vector.multi_reduction <add>, %8, %cst_2 [1] : vector<16x32xf32> to vector<16xf32>
    %10 = vector.shape_cast %9 : vector<16xf32> to vector<16x1xf32>
    %cst_3 = arith.constant 3.200000e+01 : f32
    %11 = vector.broadcast %cst_3 : f32 to vector<16x1xf32>
    %12 = arith.divf %10, %11 : vector<16x1xf32>
    %cst_4 = arith.constant 9.99999974E-6 : f32
    %13 = vector.broadcast %cst_4 : f32 to vector<16x1xf32>
    %14 = arith.addf %12, %13 : vector<16x1xf32>
    %15 = math.rsqrt %14 : vector<16x1xf32>
    %16 = vector.broadcast %15 : vector<16x1xf32> to vector<16x32xf32>
    %17 = arith.mulf %7, %16 : vector<16x32xf32>
    %c0_5 = arith.constant 0 : index
    %c0_6 = arith.constant 0 : index
    %18 = vector.load %arg2[%c0_5, %c0_6] : memref<1x32xf32, #tpu.memory_space<vmem>>, vector<1x32xf32>
    %19 = vector.broadcast %18 : vector<1x32xf32> to vector<16x32xf32>
    %20 = arith.mulf %17, %19 : vector<16x32xf32>
    %c0_7 = arith.constant 0 : index
    %c0_8 = arith.constant 0 : index
    %21 = vector.load %arg3[%c0_7, %c0_8] : memref<1x32xf32, #tpu.memory_space<vmem>>, vector<1x32xf32>
    %22 = vector.broadcast %21 : vector<1x32xf32> to vector<16x32xf32>
    %23 = arith.addf %20, %22 : vector<16x32xf32>
    %c0_9 = arith.constant 0 : index
    %c0_10 = arith.constant 0 : index
    %24 = vector.load %arg4[%c0_9, %c0_10] : memref<16x32xf32, #tpu.memory_space<vmem>>, vector<16x32xf32>
    tpu.vector_store %arg4[%c0_9, %c0_10], %23 {strides = array<i32>} : memref<16x32xf32, #tpu.memory_space<vmem>>, vector<16x32xf32>,
    return
  }
  func.func @transform_0(%arg0: i32) -> (i32, i32) {
    %c0_i32 = arith.constant 0 : i32
    %c0_i32_0 = arith.constant 0 : i32
    return %arg0, %c0_i32 : i32, i32
  }
  func.func @transform_1(%arg0: i32) -> (i32, i32) {
    %c0_i32 = arith.constant 0 : i32
    %c0_i32_0 = arith.constant 0 : i32
    %c0_i32_1 = arith.constant 0 : i32
    return %c0_i32, %c0_i32_0 : i32, i32
  }
  func.func @transform_2(%arg0: i32) -> (i32, i32) {
    %c0_i32 = arith.constant 0 : i32
    %c0_i32_0 = arith.constant 0 : i32
    %c0_i32_1 = arith.constant 0 : i32
    return %c0_i32, %c0_i32_0 : i32, i32
  }
  func.func @transform_3(%arg0: i32) -> (i32, i32) {
    %c0_i32 = arith.constant 0 : i32
    %c0_i32_0 = arith.constant 0 : i32
    return %arg0, %c0_i32 : i32, i32
  }
}

</mosaic_0001>

<bundles_post_ra>
// kernel: _lambda_.15
= control target key start
LH: loop header
LB: loop body
LE: loop exit
PB: predicated region body
PF: predicated region fallthrough
CT: control target
= control target key end

     0   :  { %v39_v0 = vlaneseq  ;;  %v648_v2 = vmov 1966171168   ;;  %vm165_vm0 = vcmask 253952   ;;  %vm650_vm1 = vmmov 0   ;;  %s871_s0 = inlined_call_operand.vmem [shape: bf16[16,32], index: 0, kind: input, shape index: {}]   ;;  %s872_s1 = inlined_call_operand.vmem [shape: f8e5m2[32,96], index: 1, kind: input, shape index: {}]   ;;  %s873_s2 = inlined_call_operand.vmem [shape: f32[1,96], index: 2, kind: input, shape index: {}]   ;;  %s874_s3 = inlined_call_operand.vmem [shape: f32[1,96], index: 3, kind: input, shape index: {}]   ;;  %s875_s4 = inlined_call_operand.vmem [shape: bf16[16,96], index: 4, kind: output, shape index: {}]  }
   0x1   :  { %v599_v1 = vld [vmem:[%s871_s0] sm:$0xff]   ;;  %v37_v3 = vunpack.c.l.s4 %v648_v2  ;;  %vm22_vm2 = vcmask 785408   ;;  %vm455_vm3 = vcmask 1041409   ;;  %vm458_vm4 = vcmask 1042434  }
   0x2   :  { %v601_v4 = vunpack.c.h.bf16 %v599_v1  ;;  %v40_v5 = vshrl.u32 %v39_v0, 7  ;;  %v600_v6 = vunpack.c.l.bf16 %v599_v1  ;;  %vm461_vm5 = vcmask 1043459  }
   0x3   :  { %v38_v7 = vunpack.c.0.s8 %v37_v3  ;;  %v649_v3 = vmov 0.0   ;;  %vm464_vm6 = vcmask 1044484   ;;  %vm467_vm7 = vcmask 1045509  }
   0x4   :  { %v84_v8 = vcombine.high %v601_v4, %v601_v4  ;;  %v35_v9 = vcombine.high %v600_v6, %v600_v6  ;;  %605 = vmatprep.subr.bf16.mxu0 %v649_v3  ;;  %609 = vmatprep.mubr.msk.bf16.mxu0 %vm650_vm1, %v649_v3  ;;  %23 = vst.msk [vmem:[#allocation2] sm:$0xff] %vm22_vm2, %v649_v3  ;;  %24 = vst.msk [vmem:[#allocation2 + $0x8] sm:$0xff] %vm22_vm2, %v649_v3  ;;  %vm470_vm8 = vcmask 1046534   ;;  %vm473_vm9 = vcmask 1047559  }
   0x5   :  { %v41_v10 = vsub.s32 %v38_v7, %v40_v5  ;;  %vm491_vm10 = vcmask 261120   ;;  %vm584_vm11 = vcmask 781312  }
   0x7   :  { %v98_v11 = vrot.slane %v84_v8, %v41_v10  ;;  %v42_v12 = vrot.slane %v600_v6, %v41_v10  ;;  %v91_v13 = vrot.slane %v601_v4, %v41_v10  ;;  %v49_v14 = vrot.slane %v35_v9, %v41_v10  ;;  %v494_v4 = vld [vmem:[%s872_s1] sm:$0xff] }
   0x8   :  { %v495_v5 = vunpack.c.0.bf8 %v494_v4  ;;  %v496_v6 = vunpack.c.1.bf8 %v494_v4  ;;  %v497_v7 = vunpack.c.2.bf8 %v494_v4  ;;  %v498_v8 = vunpack.c.3.bf8 %v494_v4 }
   0x9   :  { %v679_v15 = vrot.slane %v98_v11, %v41_v10  ;;  %v681_v16 = vrot.slane %v42_v12, %v41_v10  ;;  %v50_v17 = vcombine.high %v42_v12, %v42_v12  ;;  %v683_v18 = vrot.slane %v91_v13, %v41_v10 }
   0xa   :  { %v685_v19 = vrot.slane %v49_v14, %v41_v10  ;;  %v99_v20 = vcombine.high %v91_v13, %v91_v13  ;;  %v100_v37 = vcombine.high %v98_v11, %v98_v11  ;;  %v51_v38 = vcombine.high %v49_v14, %v49_v14 }
   0xb   :  { %v161_v21 = vand.u32 2147483647, %v679_v15  ;;  %v149_v22 = vand.u32 2147483647, %v681_v16  ;;  %v157_v23 = vand.u32 2147483647, %v683_v18  ;;  %v692_v24 = vcombine.high %v681_v16, %v681_v16 }
   0xc   :  { %v696_v25 = vcombine.high %v683_v18, %v683_v18  ;;  %v698_v26 = vrot.slane %v50_v17, %v41_v10  ;;  %v153_v30 = vand.u32 2147483647, %v685_v19  ;;  %v704_v31 = vrot.slane %v99_v20, %v41_v10 }
   0xd   :  { %v202_v27 = vsel %vm165_vm0, %v161_v21, -inf  ;;  %v166_v28 = vsel %vm165_vm0, %v149_v22, -inf  ;;  %v151_v29 = vand.u32 2147483647, %v692_v24  ;;  %v190_v32 = vsel %vm165_vm0, %v157_v23, -inf }
   0xe   :  { %203 = vmax.xlane.f32.xlu1 %v202_v27  ;;  %167 = vmax.xlane.f32.xlu0 %v166_v28  ;;  %v159_v34 = vand.u32 2147483647, %v696_v25  ;;  %v711_v35 = vcombine.high %v698_v26, %v698_v26  ;;  %v178_v36 = vsel %vm165_vm0, %v153_v30, -inf  ;;  %v150_v41 = vand.u32 2147483647, %v698_v26 }
   0xf   :  { %v172_v33 = vsel %vm165_vm0, %v151_v29, -inf  ;;  %v719_v42 = vcombine.high %v704_v31, %v704_v31  ;;  %v158_v43 = vand.u32 2147483647, %v704_v31  ;;  %v722_v44 = vrot.slane %v100_v37, %v41_v10 }
  0x10   :  { %v196_v39 = vsel %vm165_vm0, %v159_v34, -inf  ;;  %v152_v40 = vand.u32 2147483647, %v711_v35  ;;  %v169_v46 = vsel %vm165_vm0, %v150_v41, -inf  ;;  %v727_v48 = vrot.slane %v51_v38, %v41_v10 }
  0x11   :  { %v160_v47 = vand.u32 2147483647, %v719_v42  ;;  %v193_v49 = vsel %vm165_vm0, %v158_v43, -inf  ;;  %v162_v50 = vand.u32 2147483647, %v722_v44  ;;  %v735_v53 = vcombine.high %v679_v15, %v679_v15 }
  0x12   :  { %191 = vmax.xlane.f32.xlu0 %v190_v32  ;;  %173 = vmax.xlane.f32.xlu1 %v172_v33  ;;  %v175_v45 = vsel %vm165_vm0, %v152_v40, -inf  ;;  %v154_v52 = vand.u32 2147483647, %v727_v48  ;;  %v739_v54 = vcombine.high %v685_v19, %v685_v19  ;;  %v744_v56 = vcombine.high %v722_v44, %v722_v44 }
  0x13   :  { %v199_v51 = vsel %vm165_vm0, %v160_v47, -inf  ;;  %v205_v55 = vsel %vm165_vm0, %v162_v50, -inf  ;;  %v163_v58 = vand.u32 2147483647, %v735_v53  ;;  %v751_v60 = vcombine.high %v727_v48, %v727_v48 }
  0x14   :  { %v181_v57 = vsel %vm165_vm0, %v154_v52, -inf  ;;  %v155_v59 = vand.u32 2147483647, %v739_v54  ;;  %v164_v63 = vand.u32 2147483647, %v744_v56  ;;  %v499_v9 = vpack.c.bf16 %v496_v6, %v495_v5 }
  0x15   :  { %v208_v61 = vsel %vm165_vm0, %v163_v58, -inf  ;;  %v156_v0 = vand.u32 2147483647, %v751_v60  ;;  %v500_v10 = vpack.c.bf16 %v498_v8, %v497_v7 }
  0x16   :  { %197 = vmax.xlane.f32.xlu1 %v196_v39  ;;  %179 = vmax.xlane.f32.xlu0 %v178_v36  ;;  %v184_v62 = vsel %vm165_vm0, %v155_v59, -inf  ;;  %v211_v1 = vsel %vm165_vm0, %v164_v63, -inf }
  0x17   :  { %v187_v2 = vsel %vm165_vm0, %v156_v0, -inf  ;;  %606 = vmatpush3.bf16.msra.mxu0 %v499_v9 }
  0x18   :  { %607 = vmatprep.subr.bf16.mxu0 %v649_v3 }
  0x1a   :  { %176 = vmax.xlane.f32.xlu1 %v175_v45  ;;  %170 = vmax.xlane.f32.xlu0 %v169_v46 }
  0x1b   :  { %608 = vmatpush3.bf16.msra.mxu0 %v500_v10 }
  0x1e   :  { %200 = vmax.xlane.f32.xlu1 %v199_v51  ;;  %194 = vmax.xlane.f32.xlu0 %v193_v49 }
  0x22   :  { %206 = vmax.xlane.f32.xlu1 %v205_v55  ;;  %182 = vmax.xlane.f32.xlu0 %v181_v57 }
  0x26   :  { %209 = vmax.xlane.f32.xlu1 %v208_v61  ;;  %185 = vmax.xlane.f32.xlu0 %v184_v62 }
  0x2a   :  { %212 = vmax.xlane.f32.xlu1 %v211_v1  ;;  %188 = vmax.xlane.f32.xlu0 %v187_v2 }
  0x9b   :  { %v204_v11 = vpop.xlane.xlu1 %203  ;;  %v168_v12 = vpop.xlane.xlu0 %167 }
  0x9c   :  { %v226_v17 = vmax.f32 %v204_v11, 1e-12  ;;  %v214_v22 = vmax.f32 %v168_v12, 1e-12 }
  0x9e   :  { %v764_v23 = vmul.f32 1.7438617e-05, %v226_v17  ;;  %v766_v33 = vmul.f32 1.7438617e-05, %v214_v22 }
  0x9f   :  { %v192_v13 = vpop.xlane.xlu0 %191  ;;  %v174_v14 = vpop.xlane.xlu1 %173 }
  0xa0   :  { %v222_v27 = vmax.f32 %v192_v13, 1e-12  ;;  %616 = vrcp.f32 %v764_v23  ;;  %v216_v37 = vmax.f32 %v174_v14, 1e-12 }
  0xa2   :  { %v771_v36 = vmul.f32 1.7438617e-05, %v222_v27  ;;  %v782_v49 = vmul.f32 1.7438617e-05, %v216_v37 }
  0xa3   :  { %v198_v20 = vpop.xlane.xlu1 %197  ;;  %v180_v21 = vpop.xlane.xlu0 %179 }
  0xa4   :  { %v224_v30 = vmax.f32 %v198_v20, 1e-12  ;;  %v218_v52 = vmax.f32 %v180_v21, 1e-12 }
  0xa6   :  { %v773_v40 = vmul.f32 1.7438617e-05, %v224_v30  ;;  %v792_v62 = vmul.f32 1.7438617e-05, %v218_v52 }
  0xa7   :  { %v177_v28 = vpop.xlane.xlu1 %176  ;;  %v171_v29 = vpop.xlane.xlu0 %170 }
  0xa8   :  { %v215_v32 = vmax.f32 %v171_v29, 1e-12  ;;  %v217_v45 = vmax.f32 %v177_v28, 1e-12 }
  0xaa   :  { %v768_v34 = vmul.f32 1.7438617e-05, %v215_v32  ;;  %v785_v57 = vmul.f32 1.7438617e-05, %v217_v45  ;;  %v617_v63 = vpop.eup %616 }
  0xab   :  { %v201_v38 = vpop.xlane.xlu1 %200  ;;  %v195_v39 = vpop.xlane.xlu0 %194  ;;  %v271_v4 = vmul.f32 %v617_v63, %v679_v15 }
  0xac   :  { %v225_v41 = vmax.f32 %v201_v38, 1e-12  ;;  %v223_v43 = vmax.f32 %v195_v39, 1e-12  ;;  %618 = vrcp.f32 %v768_v34 }
  0xad   :  { %620 = vrcp.f32 %v766_v33  ;;  %v350_v12 = vpack.c.f32.eXmY %v271_v4, %v271_v4, 57749 }
  0xae   :  { %v777_v46 = vmul.f32 1.7438617e-05, %v225_v41  ;;  %v779_v47 = vmul.f32 1.7438617e-05, %v223_v43  ;;  %622 = vrcp.f32 %v771_v36 }
  0xaf   :  { %v207_v50 = vpop.xlane.xlu1 %206  ;;  %v183_v51 = vpop.xlane.xlu0 %182  ;;  %624 = vrcp.f32 %v773_v40 }
  0xb0   :  { %v227_v55 = vmax.f32 %v207_v50, 1e-12  ;;  %626 = vrcp.f32 %v779_v47  ;;  %v219_v58 = vmax.f32 %v183_v51, 1e-12 }
  0xb1   :  { %628 = vrcp.f32 %v777_v46 }
  0xb2   :  { %v789_v59 = vmul.f32 1.7438617e-05, %v227_v55  ;;  %630 = vrcp.f32 %v782_v49  ;;  %v795_v0 = vmul.f32 1.7438617e-05, %v219_v58 }
  0xb3   :  { %v210_v61 = vpop.xlane.xlu1 %209  ;;  %632 = vrcp.f32 %v785_v57  ;;  %v186_v22 = vpop.xlane.xlu0 %185 }
  0xb4   :  { %634 = vrcp.f32 %v789_v59  ;;  %v228_v1 = vmax.f32 %v210_v61, 1e-12  ;;  %v220_v51 = vmax.f32 %v186_v22, 1e-12 }
  0xb5   :  { %636 = vrcp.f32 %v792_v62 }
  0xb6   :  { %v619_v2 = vpop.eup %618  ;;  %638 = vrcp.f32 %v795_v0  ;;  %v802_v8 = vmul.f32 1.7438617e-05, %v228_v1 }
  0xb7   :  { %v621_v3 = vpop.eup %620  ;;  %v249_v7 = vmul.f32 %v619_v2, %v698_v26  ;;  %v213_v38 = vpop.xlane.xlu1 %212  ;;  %v814_v2 = vmul.f32 1.7438617e-05, %v220_v51 }
  0xb8   :  { %v623_v5 = vpop.eup %622  ;;  %v247_v10 = vmul.f32 %v621_v3, %v681_v16  ;;  %640 = vrcp.f32 %v802_v8  ;;  %v354_v16 = vpack.c.b8 %v350_v12, %v350_v12  ;;  %v229_v58 = vmax.f32 %v213_v38, 1e-12  ;;  %v189_v61 = vpop.xlane.xlu0 %188 }
  0xb9   :  { %v625_v6 = vpop.eup %624  ;;  %v263_v15 = vmul.f32 %v623_v5, %v683_v18  ;;  %v284_v20 = vpack.c.f32.eXmY %v249_v7, %v249_v7, 57749  ;;  %642 = vrcp.f32 %v814_v2 }
  0xba   :  { %v627_v9 = vpop.eup %626  ;;  %v267_v17 = vmul.f32 %v625_v6, %v696_v25  ;;  %v278_v27 = vpack.c.f32.eXmY %v247_v10, %v247_v10, 57749  ;;  %v386_v52 = vunpack.c.0.bf8 %v354_v16  ;;  %v817_v5 = vmul.f32 1.7438617e-05, %v229_v58 }
  0xbb   :  { %v629_v11 = vpop.eup %628  ;;  %v265_v13 = vmul.f32 %v627_v9, %v704_v31  ;;  %v326_v31 = vpack.c.f32.eXmY %v263_v15, %v263_v15, 57749  ;;  %v288_v39 = vpack.c.b8 %v284_v20, %v284_v20  ;;  %v221_v9 = vmax.f32 %v189_v61, 1e-12 }
  0xbc   :  { %v631_v14 = vpop.eup %630  ;;  %v269_v28 = vmul.f32 %v629_v11, %v719_v42  ;;  %v338_v37 = vpack.c.f32.eXmY %v267_v17, %v267_v17, 57749  ;;  %v282_v43 = vpack.c.b8 %v278_v27, %v278_v27  ;;  %644 = vrcp.f32 %v817_v5 }
  0xbd   :  { %v332_v21 = vpack.c.f32.eXmY %v265_v13, %v265_v13, 57749  ;;  %v633_v26 = vpop.eup %632  ;;  %v251_v30 = vmul.f32 %v631_v14, %v692_v24  ;;  %v330_v24 = vpack.c.b8 %v326_v31, %v326_v31  ;;  %v402_v13 = vmul.f32 %v386_v52, %v764_v23 }
  0xbe   :  { %v635_v29 = vpop.eup %634  ;;  %v253_v25 = vmul.f32 %v633_v26, %v711_v35  ;;  %v344_v45 = vpack.c.f32.eXmY %v269_v28, %v269_v28, 57749  ;;  %v342_v63 = vpack.c.b8 %v338_v37, %v338_v37  ;;  %v375_v35 = vunpack.c.0.bf8 %v288_v39 }
  0xbf   :  { %v336_v32 = vpack.c.b8 %v332_v21, %v332_v21  ;;  %v637_v18 = vpop.eup %636  ;;  %v273_v50 = vmul.f32 %v635_v29, %v722_v44  ;;  %v290_v42 = vpack.c.f32.eXmY %v251_v30, %v251_v30, 57749  ;;  %v374_v10 = vunpack.c.0.bf8 %v282_v43 }
  0xc0   :  { %v639_v41 = vpop.eup %638  ;;  %v255_v1 = vmul.f32 %v637_v18, %v685_v19  ;;  %v296_v3 = vpack.c.f32.eXmY %v253_v25, %v253_v25, 57749  ;;  %v348_v44 = vpack.c.b8 %v344_v45, %v344_v45  ;;  %v384_v14 = vunpack.c.0.bf8 %v342_v63 }
  0xc1   :  { %v383_v55 = vunpack.c.0.bf8 %v336_v32  ;;  %v257_v4 = vmul.f32 %v639_v41, %v727_v48  ;;  %v356_v7 = vpack.c.f32.eXmY %v273_v50, %v273_v50, 57749  ;;  %v294_v11 = vpack.c.b8 %v290_v42, %v290_v42 }
  0xc2   :  { %v641_v6 = vpop.eup %640  ;;  %v302_v15 = vpack.c.f32.eXmY %v255_v1, %v255_v1, 57749  ;;  %v382_v48 = vunpack.c.0.bf8 %v330_v24  ;;  %v300_v17 = vpack.c.b8 %v296_v3, %v296_v3  ;;  %v391_v22 = vmul.f32 %v375_v35, %v768_v34 }
  0xc3   :  { %v399_v12 = vmul.f32 %v383_v55, %v779_v47  ;;  %v275_v19 = vmul.f32 %v641_v6, %v735_v53  ;;  %v308_v20 = vpack.c.f32.eXmY %v257_v4, %v257_v4, 57749  ;;  %v385_v26 = vunpack.c.0.bf8 %v348_v44  ;;  %v643_v41 = vpop.eup %642 }
  0xc4   :  { %v360_v27 = vpack.c.b8 %v356_v7, %v356_v7  ;;  %v825_v28 = vmul.f32 1.7438617e-05, %v221_v9  ;;  %v390_v47 = vmul.f32 %v374_v10, %v766_v33  ;;  %v376_v29 = vunpack.c.0.bf8 %v294_v11 }
  0xc5   :  { %v362_v21 = vpack.c.f32.eXmY %v275_v19, %v275_v19, 57749  ;;  %v415_v53 = vpack.c.bf16 %v399_v12, %v399_v12  ;;  %v400_v23 = vmul.f32 %v384_v14, %v773_v40  ;;  %v306_v16 = vpack.c.b8 %v302_v15, %v302_v15 }
  0xc6   :  { %646 = vrcp.f32 %v825_v28  ;;  %v418_v32 = vpack.c.bf16 %v402_v13, %v402_v13  ;;  %v398_v31 = vmul.f32 %v382_v48, %v771_v36  ;;  %v312_v37 = vpack.c.b8 %v308_v20, %v308_v20  ;;  %v645_v55 = vpop.eup %644 }
  0xc7   :  { %v366_v30 = vpack.c.b8 %v362_v21, %v362_v21  ;;  %v377_v38 = vunpack.c.0.bf8 %v300_v17  ;;  %v407_v34 = vpack.c.bf16 %v391_v22, %v391_v22  ;;  %v401_v18 = vmul.f32 %v385_v26, %v777_v46 }
  0xc8   :  { %v387_v25 = vunpack.c.0.bf8 %v360_v27  ;;  %v406_v39 = vpack.c.bf16 %v390_v47, %v390_v47  ;;  %v447_v33 = vunpack.c.l.b16 %v415_v53  ;;  %v392_v43 = vmul.f32 %v376_v29, %v782_v49 }
  0xc9   :  { %v416_v40 = vpack.c.bf16 %v400_v23, %v400_v23  ;;  %v378_v45 = vunpack.c.0.bf8 %v306_v16  ;;  %v388_v50 = vunpack.c.0.bf8 %v366_v30  ;;  %v833_v51 = vunpack.c.l.b16 %v418_v32 }
  0xca   :  { %v414_v52 = vpack.c.bf16 %v398_v31, %v398_v31  ;;  %v379_v36 = vunpack.c.0.bf8 %v312_v37  ;;  %v259_v42 = vmul.f32 %v643_v41, %v739_v54  ;;  %v393_v46 = vmul.f32 %v377_v38, %v785_v57 }
  0xcb   :  { %v439_v58 = vunpack.c.l.b16 %v407_v34  ;;  %v417_v61 = vpack.c.bf16 %v401_v18, %v401_v18  ;;  %v403_v24 = vmul.f32 %v387_v25, %v789_v59  ;;  %v438_v63 = vunpack.c.l.b16 %v406_v39 }
  0xcc   :  { %v475_v1 = vrot.slane %v447_v33, 7  ;;  %v314_v49 = vpack.c.f32.eXmY %v259_v42, %v259_v42, 57749  ;;  %v277_v3 = vmul.f32 %v645_v55, %v744_v56  ;;  %v408_v35 = vpack.c.bf16 %v392_v43, %v392_v43 }
  0xcd   :  { %v448_v4 = vunpack.c.l.b16 %v416_v40  ;;  %v394_v6 = vmul.f32 %v378_v45, %v792_v62  ;;  %v404_v44 = vmul.f32 %v388_v50, %v802_v8  ;;  %v446_v7 = vunpack.c.l.b16 %v414_v52 }
  0xce   :  { %v395_v54 = vmul.f32 %v379_v36, %v795_v0  ;;  %v318_v9 = vpack.c.b8 %v314_v49, %v314_v49  ;;  %v368_v57 = vpack.c.f32.eXmY %v277_v3, %v277_v3, 57749  ;;  %v409_v11 = vpack.c.bf16 %v393_v46, %v393_v46 }
  0xcf   :  { %v454_v12 = vrot.slane %v439_v58, 7  ;;  %v449_v59 = vunpack.c.l.b16 %v417_v61  ;;  %v419_v19 = vpack.c.bf16 %v403_v24, %v403_v24  ;;  %v476_v13 = vsel %vm455_vm3, %v475_v1, %v446_v7  ;;  %v502_v7 = vld [vmem:[#allocation2 + $0x8] sm:$0xff] }
  0xd0   :  { %v647_v10 = vpop.eup %646  ;;  %v380_v14 = vunpack.c.0.bf8 %v318_v9  ;;  %v372_v56 = vpack.c.b8 %v368_v57, %v368_v57  ;;  %v440_v48 = vunpack.c.l.b16 %v408_v35  ;;  %v477_v62 = vrot.slane %v448_v4, 6 }
  0xd1   :  { %v261_v15 = vmul.f32 %v647_v10, %v751_v60  ;;  %v410_v17 = vpack.c.bf16 %v394_v6, %v394_v6  ;;  %v420_v8 = vpack.c.bf16 %v404_v44, %v404_v44  ;;  %v411_v20 = vpack.c.bf16 %v395_v54, %v395_v54  ;;  %v501_v6 = vld [vmem:[#allocation2] sm:$0xff] }
  0xd2   :  { %v396_v0 = vmul.f32 %v380_v14, %v814_v2  ;;  %v389_v21 = vunpack.c.0.bf8 %v372_v56  ;;  %v441_v26 = vunpack.c.l.b16 %v409_v11  ;;  %v456_v27 = vsel %vm455_vm3, %v454_v12, %v438_v63  ;;  %v592_v12 = vld [vmem:[%s873_s2] ss:$0 sm:$0xff] }
  0xd3   :  { %v320_v22 = vpack.c.f32.eXmY %v261_v15, %v261_v15, 57749  ;;  %v479_v47 = vrot.slane %v449_v59, 5  ;;  %v478_v29 = vsel %vm458_vm4, %v477_v62, %v476_v13  ;;  %v451_v53 = vunpack.c.l.b16 %v419_v19  ;;  %v593_v19 = vld [vmem:[%s874_s3] ss:$0 sm:$0xff] }
  0xd4   :  { %v412_v23 = vpack.c.bf16 %v396_v0, %v396_v0  ;;  %v405_v16 = vmul.f32 %v389_v21, %v817_v5  ;;  %v457_v30 = vrot.slane %v440_v48, 6  ;;  %v452_v32 = vunpack.c.l.b16 %v420_v8 }
  0xd5   :  { %v324_v60 = vpack.c.b8 %v320_v22, %v320_v22  ;;  %v480_v31 = vsel %vm461_vm5, %v479_v47, %v478_v29  ;;  %v443_v2 = vunpack.c.l.b16 %v411_v20  ;;  %v481_v34 = vrot.slane %v833_v51, 4 }
  0xd6   :  { %v421_v37 = vpack.c.bf16 %v405_v16, %v405_v16  ;;  %v442_v18 = vunpack.c.l.b16 %v410_v17  ;;  %v459_v25 = vsel %vm458_vm4, %v457_v30, %v456_v27  ;;  %v444_v39 = vunpack.c.l.b16 %v412_v23 }
  0xd7   :  { %v381_v38 = vunpack.c.0.bf8 %v324_v60  ;;  %v460_v33 = vrot.slane %v441_v26, 5  ;;  %v483_v41 = vrot.slane %v451_v53, 3  ;;  %v482_v40 = vsel %vm464_vm6, %v481_v34, %v480_v31 }
  0xd8   :  { %v453_v43 = vunpack.c.l.b16 %v421_v37  ;;  %v485_v45 = vrot.slane %v452_v32, 2  ;;  %v466_v52 = vrot.slane %v443_v2, 3  ;;  %v463_v51 = vrot.slane %v442_v18, 4 }
  0xd9   :  { %v397_v5 = vmul.f32 %v381_v38, %v825_v28  ;;  %v462_v50 = vsel %vm461_vm5, %v460_v33, %v459_v25  ;;  %v469_v55 = vrot.slane %v444_v39, 2  ;;  %v484_v46 = vsel %vm467_vm7, %v483_v41, %v482_v40 }
  0xda   :  { %v487_v36 = vrot.slane %v453_v43, 1  ;;  %v465_v61 = vsel %vm464_vm6, %v463_v51, %v462_v50  ;;  %v486_v24 = vsel %vm470_vm8, %v485_v45, %v484_v46 }
  0xdb   :  { %v413_v42 = vpack.c.bf16 %v397_v5, %v397_v5  ;;  %v468_v28 = vsel %vm467_vm7, %v466_v52, %v465_v61 }
  0xdc   :  { %v488_v1 = vsel %vm473_vm9, %v487_v36, %v486_v24  ;;  %v471_v49 = vsel %vm470_vm8, %v469_v55, %v468_v28 }
  0xdd   :  { %v445_v58 = vunpack.c.l.b16 %v413_v42 }
  0xdf   :  { %v472_v63 = vrot.slane %v445_v58, 1 }
  0xe1   :  { %v474_v3 = vsel %vm473_vm9, %v472_v63, %v471_v49 }
  0xe2   :  { %v489_v35 = vpack.c.b16 %v488_v1, %v474_v3 }
  0xe4   :  { %492 = vst.msk [vmem:[#allocation3] sm:$0xff] %vm491_vm10, %v489_v35 }
  0xeb   :  { %v493_v4 = vld [vmem:[#allocation3] sm:$0xff] }
  0xec   :  { %610 = vmatmul.mubr.msk.bf16.vlgmr.msra.gmra.mrb[0].mxu0 %vm491_vm10, %v493_v4 }
 0x1bf   :  { %v541_v44 = vpop.f32.mrb[0].mxu0 }
 0x1c0   :  { %v548_v54 = vadd.f32 %v541_v44, %v501_v6  ;;  %v611_v9 = vpop.f32.mrb[1].mxu0 }
 0x1c1   :  { %v544_v57 = vpop.f32.mrb[2].mxu0 }
 0x1c2   :  { %551 = vst.msk [vmem:[#allocation2] sm:$0xff] %vm22_vm2, %v548_v54  ;;  %v549_v10 = vadd.f32 %v544_v57, %v502_v7  ;;  %v612_v11 = vpop.f32.mrb[3].mxu0 }
 0x1c4   :  { %552 = vst.msk [vmem:[#allocation2 + $0x8] sm:$0xff] %vm22_vm2, %v549_v10 }
 0x1c9   :  { %v556_v59 = vld [vmem:[#allocation2] sm:$0xff] }
 0x1ca   :  { %v565_v13 = vmul.f32 %v592_v12, %v556_v59 }
 0x1cb   :  { %v557_v14 = vld [vmem:[#allocation2 + $0x8] sm:$0xff] }
 0x1cc   :  { %v574_v56 = vadd.f32 %v593_v19, %v565_v13  ;;  %v566_v15 = vmul.f32 %v592_v12, %v557_v14 }
 0x1ce   :  { %v596_v48 = vpack.c.bf16 %v574_v56, %v574_v56  ;;  %v575_v62 = vadd.f32 %v593_v19, %v566_v15 }
 0x1d0   :  { %585 = vst.msk [vmem:[%s875_s4] sm:$0xf] %vm584_vm11, %v596_v48  ;;  %v597_v17 = vpack.c.bf16 %v575_v62, %v575_v62 }
 0x1d2   :  { %586 = vst.msk [vmem:[%s875_s4 + $0x4] sm:$0xf] %vm584_vm11, %v597_v17 }

// kernel: _lambda_.16
= control target key start
LH: loop header
LB: loop body
LE: loop exit
PB: predicated region body
PF: predicated region fallthrough
CT: control target
= control target key end

     0   :  { %s865_s15 = smov 0   ;;  %s867_s16 = smov 0   ;;  %s942_s0 = inlined_call_operand.vmem [shape: bf16[2,4,8,8], index: 0, kind: input, shape index: {}]   ;;  %s943_s1 = inlined_call_operand.vmem [shape: bf16[2,4,8,8], index: 1, kind: input, shape index: {}]   ;;  %s944_s2 = inlined_call_operand.vmem [shape: bf16[2,4,8,8], index: 2, kind: input, shape index: {}]   ;;  %s945_s3 = inlined_call_operand.vmem [shape: f32[2,8,8], index: 3, kind: input, shape index: {}]   ;;  %s946_s4 = inlined_call_operand.vmem [shape: bf16[2,4,8,8], index: 4, kind: output, shape index: {}]  }
   0x1   :  { %s869_s17 = smov 0   ;;  %s871_s18 = smov 0  }
   0x2   :  { %s873_s19 = smov 0  }
   0x3 LB: > { %s36_s20 = sadd.s32 1, %s826_s17  ;;  %s40_s21 = sadd.s32 1, %s830_s18  ;;  %s834_s19 = sphi %s873_s19, %s14_s19   ;;  %s830_s18 = sphi %s871_s18, %s950_s18   ;;  %s826_s17 = sphi %s869_s17, %s949_s17   ;;  %s822_s16 = sphi %s867_s16, %s948_s16   ;;  %s818_s15 = sphi %s865_s15, %s947_s15  }
   0x4   : > { %p38_p0 = scmp.ge.s32.totalorder %s36_s20, 4  ;;  %p714_p1 = scmp.ge.s32.totalorder %s834_s19, 1 }
   0x5   : > { %p261_p2 = scmp.lt.s32.totalorder %s834_s19, 9 }
   0x6   : > { %s952_s20 = smov (%p38_p0, %s36_s20), 0  ;;  %s954_s21 = smov (!%p38_p0, %s40_s21), %s830_s18 }
   0x7   : > { %p262_p3 = pnand %p714_p1, %p261_p2  ;;  %p42_p4 = scmp.ge.s32.totalorder %s954_s21, 2 }
   0x8   : > { %p331_p5 = scmp.lt.s32.totalorder (!%p262_p3), %s822_s16, 1  ;;  %p333_p6 = scmp.lt.s32.totalorder (!%p262_p3), %s818_s15, 3  ;;  %vm393_vm0 = vcmask (!%p262_p3), 64512   ;;  %v836_v0 = vmov (!%p262_p3), 0.0   ;;  %vm837_vm1 = vmmov (!%p262_p3), 0   ;;  %vm390_vm2 = vcmask (!%p262_p3), 7168  }
   0x9   : > { %s956_s21 = smov (%p42_p4, %s954_s21), 0  ;;  %265 = sbr.rel (%p262_p3) target bundleno = 828 (0x33c), region = 36 }
   0xa   : > { %732 = vmatprep.subr.bf16.mxu0 (!%p262_p3), %v836_v0  ;;  %394 = vst.msk [vmem:[#allocation4] sm:$0xff] (!%p262_p3), %vm393_vm0, %v836_v0  ;;  %734 = vmatprep.mubr.msk.bf16.mxu0 (!%p262_p3), %vm837_vm1, %v836_v0  ;;  %v838_v4 = vmov (!%p262_p3), -1e+30   ;;  %v839_v12 = vmov (!%p262_p3), 0   ;;  %vm483_vm4 = vcmask (!%p262_p3), 1043456   ;;  %vm543_vm5 = vcmask (!%p262_p3), 60416  }
   0xb   : > { %738 = vmatprep.subr.bf16.mxu1 (!%p262_p3), %v836_v0  ;;  %740 = vmatprep.mubr.msk.bf16.mxu1 (!%p262_p3), %vm837_vm1, %v836_v0  ;;  %391 = vst.msk [vmem:[#allocation2] sm:$0xff] (!%p262_p3), %vm390_vm2, %v838_v4  ;;  %392 = vst.msk [vmem:[#allocation3] sm:$0xff] (!%p262_p3), %vm390_vm2, %v836_v0 }
   0xc   : > { %788 = vset.pattern.permute.xlu0 (!%p262_p3), %v839_v12  ;;  %789 = vset.pattern.permute.xlu1 (!%p262_p3), %v839_v12 }
  0x10   : > { %s958_s16 = smov (!%p331_p5, %s822_s16), 1  ;;  %s960_s15 = smov (!%p333_p6, %s818_s15), 3 }
  0x11   : > { %s715_s22 = sshll.u32 %s958_s16, 2  ;;  %s721_s5 = sshll.u32 %s958_s16, 3  ;;  %v472_v33 = vld [vmem:[#allocation4] sm:$0xff] }
  0x12   : > { %s339_s23 = sadd.s32 %s715_s22, %s960_s15  ;;  %s373_s8 = scalar_lea.vmem %s945_s3, %s721_s5  ;;  %v448_v13 = vld [vmem:[#allocation2] sm:$0xff]  ;;  %v464_v27 = vld [vmem:[#allocation3] sm:$0xff] }
  0x13   : > { %s896_s24 = sshll.u32 %s339_s23, 2  ;;  %v445_v5 = vld [vmem:[%s373_s8] sm:$0xff] }
  0x14   : > { %s352_s27 = scalar_lea.vmem %s943_s1, %s896_s24  ;;  %s341_s30 = scalar_lea.vmem %s942_s0, %s896_s24  ;;  %vm446_vm3 = vcmp.eq.f32.partialorder %v445_v5, 0.0 }
  0x15   : > { %v396_v1 = vld [vmem:[%s352_s27] sm:$0xf]  ;;  %s363_s11 = scalar_lea.vmem %s944_s2, %s896_s24  ;;  %s384_s14 = scalar_lea.vmem %s946_s4, %s896_s24 }
  0x16   : > { %v403_v2 = vsel %vm393_vm0, %v396_v1, 0  ;;  %v395_v3 = vld [vmem:[%s341_s30] sm:$0xf] }
  0x17   : > { %733 = vmatpush3.bf16.xpose.msra.mxu0 %v403_v2  ;;  %v397_v17 = vld [vmem:[%s363_s11] sm:$0xf] }
  0x18   : > { %v485_v18 = vsel %vm483_vm4, %v397_v17, 0 }
  0x19   : > { %739 = vmatpush3.bf16.msra.mxu1 %v485_v18 }
  0x1e   : > { %735 = vmatmul.mubr.msk.bf16.vlgmr.msra.gmra.mrb[0].mxu0 %vm393_vm0, %v395_v3 }
  0xf1   : > { %v439_v6 = vpop.f32.mrb[0].mxu0 }
  0xf2   : > { %v447_v7 = vsel %vm446_vm3, -1e+30, %v439_v6  ;;  %v736_v8 = vpop.f32.mrb[1].mxu0 }
  0xf3   : > { %v442_v9 = vpop.f32.mrb[2].mxu0  ;;  %v449_v10 = vsel %vm393_vm0, %v447_v7, -inf }
  0xf4   : > { %450 = vmax.xlane.f32.xlu0 %v449_v10  ;;  %v737_v11 = vpop.f32.mrb[3].mxu0 }
 0x181   : > { %v451_v14 = vpop.xlane.xlu0 %450 }
 0x182   : > { %v452_v15 = vmax.f32 %v448_v13, %v451_v14 }
 0x184   : > { %v453_v16 = vsub.f32 %v448_v13, %v452_v15  ;;  %529 = vst.msk [vmem:[#allocation2] sm:$0xff] %vm390_vm2, %v452_v15  ;;  %458 = vperm.xlu0 %788, %v452_v15  }
 0x186   : > { %v454_v25 = vmul.f32 1.442695, %v453_v16 }
 0x203   : > { %v459_v19 = vpop.permute.xlu0 %458 }
 0x204   : > { %v461_v20 = vsub.f32 %v447_v7, %v459_v19 }
 0x206   : > { %v462_v21 = vmul.f32 1.442695, %v461_v20 }
 0x208   : > { %790 = vpow2.f32 %v462_v21 }
 0x209   : > { %792 = vpow2.f32 %v454_v25 }
 0x212   : > { %v791_v22 = vpop.eup %790 }
 0x213   : > { %v466_v23 = vsel %vm393_vm0, %v791_v22, 0.0  ;;  %v479_v24 = vpack.c.bf16 %v791_v22, %v791_v22  ;;  %v793_v26 = vpop.eup %792 }
 0x214   : > { %467 = vadd.xlane.f32.xlu1 %v466_v23  ;;  %v465_v28 = vmul.f32 %v793_v26, %v464_v27 }
 0x215   : > { %741 = vmatmul.mubr.msk.bf16.vlgmr.msra.gmra.mrb[0].mxu1 %vm393_vm0, %v479_v24 }
 0x225   : > { %475 = vperm.xlu1 %789, %v793_v26  }
 0x2a1   : > { %v468_v29 = vpop.xlane.xlu1 %467 }
 0x2a2   : > { %v469_v30 = vadd.f32 %v468_v29, %v465_v28 }
 0x2a4   : > { %471 = vst.msk [vmem:[#allocation3] sm:$0xff] %vm390_vm2, %v469_v30 }
 0x2a5   : > { %v476_v34 = vpop.permute.xlu1 %475 }
 0x2a6   : > { %v478_v35 = vmul.f32 %v476_v34, %v472_v33 }
 0x2ab   : > { %v533_v31 = vld [vmem:[#allocation3] sm:$0xff] }
 0x2ac   : > { %794 = vrcp.f32 %v533_v31 }
 0x2b6   : > { %v795_v32 = vpop.eup %794 }
 0x2b7   : > { %538 = vperm.xlu1 %789, %v795_v32  }
 0x2e8   : > { %v521_v36 = vpop.f32.mrb[0].mxu1 }
 0x2e9   : > { %v527_v37 = vadd.f32 %v521_v36, %v478_v35  ;;  %v742_v38 = vpop.f32.mrb[1].mxu1 }
 0x2ea   : > { %v524_v39 = vpop.f32.mrb[2].mxu1 }
 0x2eb   : > { %528 = vst.msk [vmem:[#allocation4] sm:$0xff] %vm393_vm0, %v527_v37  ;;  %v743_v40 = vpop.f32.mrb[3].mxu1 }
 0x2f2   : > { %v535_v41 = vld [vmem:[#allocation4] sm:$0xff] }
 0x336   : > { %v539_v42 = vpop.permute.xlu1 %538 }
 0x337   : > { %v541_v43 = vmul.f32 %v539_v42, %v535_v41 }
 0x339   : > { %v542_v44 = vpack.c.bf16 %v541_v43, %v541_v43 }
 0x33b   : > { %544 = vst.msk [vmem:[%s384_s14] sm:$0xf] %vm543_vm5, %v542_v44 }
 0x33c PF: > { %s14_s19 = sadd.s32 1, %s834_s19   ;;  %s947_s15 = smov %s826_s17 }
 0x33d   : > { %p11_p7 = scmp.ge.s32.totalorder %s14_s19, 10   ;;  %s948_s16 = smov %s830_s18 }
 0x33e   : > { %s949_s17 = smov %s952_s20  ;;  %s950_s18 = smov %s956_s21 }
 0x33f   :  { %13 = sbr.rel (!%p11_p7) target bundleno = 3 (0x3), region = 83 }

// kernel: _lambda_.17
= control target key start
LH: loop header
LB: loop body
LE: loop exit
PB: predicated region body
PF: predicated region fallthrough
CT: control target
= control target key end

     0   :  { %v42_v0 = vlaneseq  ;;  %v660_v2 = vmov 1966171168   ;;  %vm168_vm0 = vcmask 253952   ;;  %vm662_vm1 = vmmov 0   ;;  %s893_s0 = inlined_call_operand.vmem [shape: bf16[16,32], index: 0, kind: input, shape index: {}]   ;;  %s894_s1 = inlined_call_operand.vmem [shape: f8e5m2[32,32], index: 1, kind: input, shape index: {}]   ;;  %s895_s2 = inlined_call_operand.vmem [shape: f32[1,32], index: 2, kind: input, shape index: {}]   ;;  %s896_s4 = inlined_call_operand.vmem [shape: bf16[16,32], index: 4, kind: input, shape index: {}]   ;;  %s897_s3 = inlined_call_operand.vmem [shape: f32[1,32], index: 3, kind: input, shape index: {}]   ;;  %s898_s5 = inlined_call_operand.vmem [shape: bf16[16,32], index: 5, kind: output, shape index: {}]  }
   0x1   :  { %v607_v1 = vld [vmem:[%s893_s0] sm:$0xff]   ;;  %v40_v3 = vunpack.c.l.s4 %v660_v2  ;;  %vm25_vm2 = vcmask 261120   ;;  %vm458_vm3 = vcmask 1041409   ;;  %vm461_vm4 = vcmask 1042434  }
   0x2   :  { %v609_v4 = vunpack.c.h.bf16 %v607_v1  ;;  %v43_v5 = vshrl.u32 %v42_v0, 7  ;;  %v608_v6 = vunpack.c.l.bf16 %v607_v1  ;;  %vm464_vm5 = vcmask 1043459  }
   0x3   :  { %v41_v7 = vunpack.c.0.s8 %v40_v3  ;;  %v497_v3 = vld [vmem:[%s894_s1] sm:$0xff]  ;;  %vm467_vm6 = vcmask 1044484   ;;  %vm470_vm7 = vcmask 1045509   ;;  %vm473_vm8 = vcmask 1046534  }
   0x4   :  { %v87_v8 = vcombine.high %v609_v4, %v609_v4  ;;  %v38_v9 = vcombine.high %v608_v6, %v608_v6  ;;  %vm476_vm9 = vcmask 1047559   ;;  %vm592_vm10 = vcmask 257024  }
   0x5   :  { %v44_v10 = vsub.s32 %v41_v7, %v43_v5  ;;  %v499_v5 = vunpack.c.1.bf8 %v497_v3  ;;  %v501_v7 = vunpack.c.3.bf8 %v497_v3 }
   0x7   :  { %v101_v11 = vrot.slane %v87_v8, %v44_v10  ;;  %v45_v12 = vrot.slane %v608_v6, %v44_v10  ;;  %v94_v13 = vrot.slane %v609_v4, %v44_v10  ;;  %v52_v14 = vrot.slane %v38_v9, %v44_v10 }
   0x8   :  { %v498_v4 = vunpack.c.0.bf8 %v497_v3  ;;  %v500_v6 = vunpack.c.2.bf8 %v497_v3  ;;  %v661_v8 = vmov 0.0  }
   0x9   :  { %v696_v15 = vrot.slane %v101_v11, %v44_v10  ;;  %v698_v16 = vrot.slane %v45_v12, %v44_v10  ;;  %v53_v17 = vcombine.high %v45_v12, %v45_v12  ;;  %v700_v18 = vrot.slane %v94_v13, %v44_v10  ;;  %617 = vmatprep.subr.bf16.mxu0 %v661_v8 }
   0xa   :  { %v702_v19 = vrot.slane %v52_v14, %v44_v10  ;;  %v102_v20 = vcombine.high %v94_v13, %v94_v13  ;;  %v103_v37 = vcombine.high %v101_v11, %v101_v11  ;;  %v54_v38 = vcombine.high %v52_v14, %v52_v14  ;;  %621 = vmatprep.mubr.msk.bf16.mxu0 %vm662_vm1, %v661_v8 }
   0xb   :  { %v164_v21 = vand.u32 2147483647, %v696_v15  ;;  %v152_v22 = vand.u32 2147483647, %v698_v16  ;;  %v160_v23 = vand.u32 2147483647, %v700_v18  ;;  %v709_v24 = vcombine.high %v698_v16, %v698_v16 }
   0xc   :  { %v713_v25 = vcombine.high %v700_v18, %v700_v18  ;;  %v715_v26 = vrot.slane %v53_v17, %v44_v10  ;;  %v156_v30 = vand.u32 2147483647, %v702_v19  ;;  %v721_v31 = vrot.slane %v102_v20, %v44_v10  ;;  %26 = vst.msk [vmem:[#allocation2] sm:$0xff] %vm25_vm2, %v661_v8  ;;  %27 = vst.msk [vmem:[#allocation2 + $0x8] sm:$0xff] %vm25_vm2, %v661_v8 }
   0xd   :  { %v205_v27 = vsel %vm168_vm0, %v164_v21, -inf  ;;  %v169_v28 = vsel %vm168_vm0, %v152_v22, -inf  ;;  %v154_v29 = vand.u32 2147483647, %v709_v24  ;;  %v193_v32 = vsel %vm168_vm0, %v160_v23, -inf }
   0xe   :  { %206 = vmax.xlane.f32.xlu1 %v205_v27  ;;  %170 = vmax.xlane.f32.xlu0 %v169_v28  ;;  %v162_v34 = vand.u32 2147483647, %v713_v25  ;;  %v728_v35 = vcombine.high %v715_v26, %v715_v26  ;;  %v181_v36 = vsel %vm168_vm0, %v156_v30, -inf  ;;  %v153_v41 = vand.u32 2147483647, %v715_v26 }
   0xf   :  { %v175_v33 = vsel %vm168_vm0, %v154_v29, -inf  ;;  %v736_v42 = vcombine.high %v721_v31, %v721_v31  ;;  %v161_v43 = vand.u32 2147483647, %v721_v31  ;;  %v739_v44 = vrot.slane %v103_v37, %v44_v10 }
  0x10   :  { %v199_v39 = vsel %vm168_vm0, %v162_v34, -inf  ;;  %v155_v40 = vand.u32 2147483647, %v728_v35  ;;  %v172_v46 = vsel %vm168_vm0, %v153_v41, -inf  ;;  %v744_v48 = vrot.slane %v54_v38, %v44_v10 }
  0x11   :  { %v163_v47 = vand.u32 2147483647, %v736_v42  ;;  %v196_v49 = vsel %vm168_vm0, %v161_v43, -inf  ;;  %v165_v50 = vand.u32 2147483647, %v739_v44  ;;  %v752_v53 = vcombine.high %v696_v15, %v696_v15 }
  0x12   :  { %194 = vmax.xlane.f32.xlu0 %v193_v32  ;;  %176 = vmax.xlane.f32.xlu1 %v175_v33  ;;  %v178_v45 = vsel %vm168_vm0, %v155_v40, -inf  ;;  %v157_v52 = vand.u32 2147483647, %v744_v48  ;;  %v756_v54 = vcombine.high %v702_v19, %v702_v19  ;;  %v761_v56 = vcombine.high %v739_v44, %v739_v44 }
  0x13   :  { %v202_v51 = vsel %vm168_vm0, %v163_v47, -inf  ;;  %v208_v55 = vsel %vm168_vm0, %v165_v50, -inf  ;;  %v166_v58 = vand.u32 2147483647, %v752_v53  ;;  %v768_v60 = vcombine.high %v744_v48, %v744_v48 }
  0x14   :  { %v184_v57 = vsel %vm168_vm0, %v157_v52, -inf  ;;  %v158_v59 = vand.u32 2147483647, %v756_v54  ;;  %v167_v63 = vand.u32 2147483647, %v761_v56  ;;  %v502_v9 = vpack.c.bf16 %v499_v5, %v498_v4 }
  0x15   :  { %v211_v61 = vsel %vm168_vm0, %v166_v58, -inf  ;;  %v159_v0 = vand.u32 2147483647, %v768_v60  ;;  %v503_v10 = vpack.c.bf16 %v501_v7, %v500_v6 }
  0x16   :  { %200 = vmax.xlane.f32.xlu1 %v199_v39  ;;  %182 = vmax.xlane.f32.xlu0 %v181_v36  ;;  %v187_v62 = vsel %vm168_vm0, %v158_v59, -inf  ;;  %v214_v1 = vsel %vm168_vm0, %v167_v63, -inf }
  0x17   :  { %v190_v2 = vsel %vm168_vm0, %v159_v0, -inf  ;;  %618 = vmatpush3.bf16.msra.mxu0 %v502_v9 }
  0x18   :  { %619 = vmatprep.subr.bf16.mxu0 %v661_v8 }
  0x1a   :  { %179 = vmax.xlane.f32.xlu1 %v178_v45  ;;  %173 = vmax.xlane.f32.xlu0 %v172_v46 }
  0x1b   :  { %620 = vmatpush3.bf16.msra.mxu0 %v503_v10 }
  0x1e   :  { %203 = vmax.xlane.f32.xlu1 %v202_v51  ;;  %197 = vmax.xlane.f32.xlu0 %v196_v49 }
  0x22   :  { %209 = vmax.xlane.f32.xlu1 %v208_v55  ;;  %185 = vmax.xlane.f32.xlu0 %v184_v57 }
  0x26   :  { %212 = vmax.xlane.f32.xlu1 %v211_v61  ;;  %188 = vmax.xlane.f32.xlu0 %v187_v62 }
  0x2a   :  { %215 = vmax.xlane.f32.xlu1 %v214_v1  ;;  %191 = vmax.xlane.f32.xlu0 %v190_v2 }
  0x9b   :  { %v207_v11 = vpop.xlane.xlu1 %206  ;;  %v171_v12 = vpop.xlane.xlu0 %170 }
  0x9c   :  { %v229_v17 = vmax.f32 %v207_v11, 1e-12  ;;  %v217_v22 = vmax.f32 %v171_v12, 1e-12 }
  0x9e   :  { %v781_v23 = vmul.f32 1.7438617e-05, %v229_v17  ;;  %v783_v33 = vmul.f32 1.7438617e-05, %v217_v22 }
  0x9f   :  { %v195_v13 = vpop.xlane.xlu0 %194  ;;  %v177_v14 = vpop.xlane.xlu1 %176 }
  0xa0   :  { %v225_v27 = vmax.f32 %v195_v13, 1e-12  ;;  %628 = vrcp.f32 %v781_v23  ;;  %v219_v37 = vmax.f32 %v177_v14, 1e-12 }
  0xa2   :  { %v788_v36 = vmul.f32 1.7438617e-05, %v225_v27  ;;  %v799_v49 = vmul.f32 1.7438617e-05, %v219_v37 }
  0xa3   :  { %v201_v20 = vpop.xlane.xlu1 %200  ;;  %v183_v21 = vpop.xlane.xlu0 %182 }
  0xa4   :  { %v227_v30 = vmax.f32 %v201_v20, 1e-12  ;;  %v221_v52 = vmax.f32 %v183_v21, 1e-12 }
  0xa6   :  { %v790_v40 = vmul.f32 1.7438617e-05, %v227_v30  ;;  %v809_v62 = vmul.f32 1.7438617e-05, %v221_v52 }
  0xa7   :  { %v180_v28 = vpop.xlane.xlu1 %179  ;;  %v174_v29 = vpop.xlane.xlu0 %173 }
  0xa8   :  { %v218_v32 = vmax.f32 %v174_v29, 1e-12  ;;  %v220_v45 = vmax.f32 %v180_v28, 1e-12 }
  0xaa   :  { %v785_v34 = vmul.f32 1.7438617e-05, %v218_v32  ;;  %v802_v57 = vmul.f32 1.7438617e-05, %v220_v45  ;;  %v629_v63 = vpop.eup %628 }
  0xab   :  { %v204_v38 = vpop.xlane.xlu1 %203  ;;  %v198_v39 = vpop.xlane.xlu0 %197  ;;  %v274_v4 = vmul.f32 %v629_v63, %v696_v15 }
  0xac   :  { %v228_v41 = vmax.f32 %v204_v38, 1e-12  ;;  %v226_v43 = vmax.f32 %v198_v39, 1e-12  ;;  %630 = vrcp.f32 %v785_v34 }
  0xad   :  { %632 = vrcp.f32 %v783_v33  ;;  %v353_v12 = vpack.c.f32.eXmY %v274_v4, %v274_v4, 57749 }
  0xae   :  { %v794_v46 = vmul.f32 1.7438617e-05, %v228_v41  ;;  %v796_v47 = vmul.f32 1.7438617e-05, %v226_v43  ;;  %634 = vrcp.f32 %v788_v36 }
  0xaf   :  { %v210_v50 = vpop.xlane.xlu1 %209  ;;  %v186_v51 = vpop.xlane.xlu0 %185  ;;  %636 = vrcp.f32 %v790_v40 }
  0xb0   :  { %v230_v55 = vmax.f32 %v210_v50, 1e-12  ;;  %638 = vrcp.f32 %v796_v47  ;;  %v222_v58 = vmax.f32 %v186_v51, 1e-12 }
  0xb1   :  { %640 = vrcp.f32 %v794_v46 }
  0xb2   :  { %v806_v59 = vmul.f32 1.7438617e-05, %v230_v55  ;;  %642 = vrcp.f32 %v799_v49  ;;  %v812_v0 = vmul.f32 1.7438617e-05, %v222_v58 }
  0xb3   :  { %v213_v61 = vpop.xlane.xlu1 %212  ;;  %644 = vrcp.f32 %v802_v57  ;;  %v189_v22 = vpop.xlane.xlu0 %188 }
  0xb4   :  { %646 = vrcp.f32 %v806_v59  ;;  %v231_v1 = vmax.f32 %v213_v61, 1e-12  ;;  %v223_v51 = vmax.f32 %v189_v22, 1e-12 }
  0xb5   :  { %648 = vrcp.f32 %v809_v62 }
  0xb6   :  { %v631_v2 = vpop.eup %630  ;;  %650 = vrcp.f32 %v812_v0  ;;  %v819_v8 = vmul.f32 1.7438617e-05, %v231_v1 }
  0xb7   :  { %v633_v3 = vpop.eup %632  ;;  %v252_v7 = vmul.f32 %v631_v2, %v715_v26  ;;  %v216_v38 = vpop.xlane.xlu1 %215  ;;  %v831_v2 = vmul.f32 1.7438617e-05, %v223_v51 }
  0xb8   :  { %v635_v5 = vpop.eup %634  ;;  %v250_v10 = vmul.f32 %v633_v3, %v698_v16  ;;  %652 = vrcp.f32 %v819_v8  ;;  %v357_v16 = vpack.c.b8 %v353_v12, %v353_v12  ;;  %v232_v58 = vmax.f32 %v216_v38, 1e-12  ;;  %v192_v61 = vpop.xlane.xlu0 %191 }
  0xb9   :  { %v637_v6 = vpop.eup %636  ;;  %v266_v15 = vmul.f32 %v635_v5, %v700_v18  ;;  %v287_v20 = vpack.c.f32.eXmY %v252_v7, %v252_v7, 57749  ;;  %654 = vrcp.f32 %v831_v2 }
  0xba   :  { %v639_v9 = vpop.eup %638  ;;  %v270_v17 = vmul.f32 %v637_v6, %v713_v25  ;;  %v281_v27 = vpack.c.f32.eXmY %v250_v10, %v250_v10, 57749  ;;  %v389_v52 = vunpack.c.0.bf8 %v357_v16  ;;  %v834_v5 = vmul.f32 1.7438617e-05, %v232_v58 }
  0xbb   :  { %v641_v11 = vpop.eup %640  ;;  %v268_v13 = vmul.f32 %v639_v9, %v721_v31  ;;  %v329_v31 = vpack.c.f32.eXmY %v266_v15, %v266_v15, 57749  ;;  %v291_v39 = vpack.c.b8 %v287_v20, %v287_v20  ;;  %v224_v9 = vmax.f32 %v192_v61, 1e-12 }
  0xbc   :  { %v643_v14 = vpop.eup %642  ;;  %v272_v28 = vmul.f32 %v641_v11, %v736_v42  ;;  %v341_v37 = vpack.c.f32.eXmY %v270_v17, %v270_v17, 57749  ;;  %v285_v43 = vpack.c.b8 %v281_v27, %v281_v27  ;;  %656 = vrcp.f32 %v834_v5 }
  0xbd   :  { %v335_v21 = vpack.c.f32.eXmY %v268_v13, %v268_v13, 57749  ;;  %v645_v26 = vpop.eup %644  ;;  %v254_v30 = vmul.f32 %v643_v14, %v709_v24  ;;  %v333_v24 = vpack.c.b8 %v329_v31, %v329_v31  ;;  %v405_v13 = vmul.f32 %v389_v52, %v781_v23 }
  0xbe   :  { %v647_v29 = vpop.eup %646  ;;  %v256_v25 = vmul.f32 %v645_v26, %v728_v35  ;;  %v347_v45 = vpack.c.f32.eXmY %v272_v28, %v272_v28, 57749  ;;  %v345_v63 = vpack.c.b8 %v341_v37, %v341_v37  ;;  %v378_v35 = vunpack.c.0.bf8 %v291_v39 }
  0xbf   :  { %v339_v32 = vpack.c.b8 %v335_v21, %v335_v21  ;;  %v649_v18 = vpop.eup %648  ;;  %v276_v50 = vmul.f32 %v647_v29, %v739_v44  ;;  %v293_v42 = vpack.c.f32.eXmY %v254_v30, %v254_v30, 57749  ;;  %v377_v10 = vunpack.c.0.bf8 %v285_v43 }
  0xc0   :  { %v651_v41 = vpop.eup %650  ;;  %v258_v1 = vmul.f32 %v649_v18, %v702_v19  ;;  %v299_v3 = vpack.c.f32.eXmY %v256_v25, %v256_v25, 57749  ;;  %v351_v44 = vpack.c.b8 %v347_v45, %v347_v45  ;;  %v387_v14 = vunpack.c.0.bf8 %v345_v63 }
  0xc1   :  { %v386_v55 = vunpack.c.0.bf8 %v339_v32  ;;  %v260_v4 = vmul.f32 %v651_v41, %v744_v48  ;;  %v359_v7 = vpack.c.f32.eXmY %v276_v50, %v276_v50, 57749  ;;  %v297_v11 = vpack.c.b8 %v293_v42, %v293_v42 }
  0xc2   :  { %v653_v6 = vpop.eup %652  ;;  %v305_v15 = vpack.c.f32.eXmY %v258_v1, %v258_v1, 57749  ;;  %v385_v48 = vunpack.c.0.bf8 %v333_v24  ;;  %v303_v17 = vpack.c.b8 %v299_v3, %v299_v3  ;;  %v394_v22 = vmul.f32 %v378_v35, %v785_v34 }
  0xc3   :  { %v402_v12 = vmul.f32 %v386_v55, %v796_v47  ;;  %v278_v19 = vmul.f32 %v653_v6, %v752_v53  ;;  %v311_v20 = vpack.c.f32.eXmY %v260_v4, %v260_v4, 57749  ;;  %v388_v26 = vunpack.c.0.bf8 %v351_v44  ;;  %v655_v41 = vpop.eup %654 }
  0xc4   :  { %v363_v27 = vpack.c.b8 %v359_v7, %v359_v7  ;;  %v842_v28 = vmul.f32 1.7438617e-05, %v224_v9  ;;  %v393_v47 = vmul.f32 %v377_v10, %v783_v33  ;;  %v379_v29 = vunpack.c.0.bf8 %v297_v11 }
  0xc5   :  { %v365_v21 = vpack.c.f32.eXmY %v278_v19, %v278_v19, 57749  ;;  %v418_v53 = vpack.c.bf16 %v402_v12, %v402_v12  ;;  %v403_v23 = vmul.f32 %v387_v14, %v790_v40  ;;  %v309_v16 = vpack.c.b8 %v305_v15, %v305_v15 }
  0xc6   :  { %658 = vrcp.f32 %v842_v28  ;;  %v421_v32 = vpack.c.bf16 %v405_v13, %v405_v13  ;;  %v401_v31 = vmul.f32 %v385_v48, %v788_v36  ;;  %v315_v37 = vpack.c.b8 %v311_v20, %v311_v20  ;;  %v657_v55 = vpop.eup %656 }
  0xc7   :  { %v369_v30 = vpack.c.b8 %v365_v21, %v365_v21  ;;  %v380_v38 = vunpack.c.0.bf8 %v303_v17  ;;  %v410_v34 = vpack.c.bf16 %v394_v22, %v394_v22  ;;  %v404_v18 = vmul.f32 %v388_v26, %v794_v46 }
  0xc8   :  { %v390_v25 = vunpack.c.0.bf8 %v363_v27  ;;  %v409_v39 = vpack.c.bf16 %v393_v47, %v393_v47  ;;  %v450_v33 = vunpack.c.l.b16 %v418_v53  ;;  %v395_v43 = vmul.f32 %v379_v29, %v799_v49 }
  0xc9   :  { %v419_v40 = vpack.c.bf16 %v403_v23, %v403_v23  ;;  %v381_v45 = vunpack.c.0.bf8 %v309_v16  ;;  %v391_v50 = vunpack.c.0.bf8 %v369_v30  ;;  %v850_v51 = vunpack.c.l.b16 %v421_v32 }
  0xca   :  { %v417_v52 = vpack.c.bf16 %v401_v31, %v401_v31  ;;  %v382_v36 = vunpack.c.0.bf8 %v315_v37  ;;  %v262_v42 = vmul.f32 %v655_v41, %v756_v54  ;;  %v396_v46 = vmul.f32 %v380_v38, %v802_v57 }
  0xcb   :  { %v442_v58 = vunpack.c.l.b16 %v410_v34  ;;  %v420_v61 = vpack.c.bf16 %v404_v18, %v404_v18  ;;  %v406_v24 = vmul.f32 %v390_v25, %v806_v59  ;;  %v441_v63 = vunpack.c.l.b16 %v409_v39 }
  0xcc   :  { %v478_v1 = vrot.slane %v450_v33, 7  ;;  %v317_v49 = vpack.c.f32.eXmY %v262_v42, %v262_v42, 57749  ;;  %v280_v3 = vmul.f32 %v657_v55, %v761_v56  ;;  %v411_v35 = vpack.c.bf16 %v395_v43, %v395_v43 }
  0xcd   :  { %v451_v4 = vunpack.c.l.b16 %v419_v40  ;;  %v397_v6 = vmul.f32 %v381_v45, %v809_v62  ;;  %v407_v44 = vmul.f32 %v391_v50, %v819_v8  ;;  %v449_v7 = vunpack.c.l.b16 %v417_v52 }
  0xce   :  { %v398_v54 = vmul.f32 %v382_v36, %v812_v0  ;;  %v321_v9 = vpack.c.b8 %v317_v49, %v317_v49  ;;  %v371_v57 = vpack.c.f32.eXmY %v280_v3, %v280_v3, 57749  ;;  %v412_v11 = vpack.c.bf16 %v396_v46, %v396_v46 }
  0xcf   :  { %v457_v12 = vrot.slane %v442_v58, 7  ;;  %v452_v59 = vunpack.c.l.b16 %v420_v61  ;;  %v422_v19 = vpack.c.bf16 %v406_v24, %v406_v24  ;;  %v479_v13 = vsel %vm458_vm3, %v478_v1, %v449_v7  ;;  %v505_v7 = vld [vmem:[#allocation2 + $0x8] sm:$0xff] }
  0xd0   :  { %v659_v10 = vpop.eup %658  ;;  %v383_v14 = vunpack.c.0.bf8 %v321_v9  ;;  %v375_v56 = vpack.c.b8 %v371_v57, %v371_v57  ;;  %v443_v48 = vunpack.c.l.b16 %v411_v35  ;;  %v480_v62 = vrot.slane %v451_v4, 6 }
  0xd1   :  { %v264_v15 = vmul.f32 %v659_v10, %v768_v60  ;;  %v413_v17 = vpack.c.bf16 %v397_v6, %v397_v6  ;;  %v423_v8 = vpack.c.bf16 %v407_v44, %v407_v44  ;;  %v414_v20 = vpack.c.bf16 %v398_v54, %v398_v54  ;;  %v504_v6 = vld [vmem:[#allocation2] sm:$0xff] }
  0xd2   :  { %v399_v0 = vmul.f32 %v383_v14, %v831_v2  ;;  %v392_v21 = vunpack.c.0.bf8 %v375_v56  ;;  %v444_v26 = vunpack.c.l.b16 %v412_v11  ;;  %v459_v27 = vsel %vm458_vm3, %v457_v12, %v441_v63  ;;  %v600_v12 = vld [vmem:[%s895_s2] ss:$0 sm:$0xff] }
  0xd3   :  { %v323_v22 = vpack.c.f32.eXmY %v264_v15, %v264_v15, 57749  ;;  %v482_v47 = vrot.slane %v452_v59, 5  ;;  %v481_v29 = vsel %vm461_vm4, %v480_v62, %v479_v13  ;;  %v454_v53 = vunpack.c.l.b16 %v422_v19  ;;  %v611_v59 = vld [vmem:[%s896_s4] sm:$0xff]  }
  0xd4   :  { %v415_v23 = vpack.c.bf16 %v399_v0, %v399_v0  ;;  %v408_v16 = vmul.f32 %v392_v21, %v834_v5  ;;  %v460_v30 = vrot.slane %v443_v48, 6  ;;  %v455_v32 = vunpack.c.l.b16 %v423_v8  ;;  %v601_v13 = vld [vmem:[%s897_s3] ss:$0 sm:$0xff] }
  0xd5   :  { %v327_v60 = vpack.c.b8 %v323_v22, %v323_v22  ;;  %v483_v31 = vsel %vm464_vm5, %v482_v47, %v481_v29  ;;  %v446_v2 = vunpack.c.l.b16 %v414_v20  ;;  %v484_v34 = vrot.slane %v850_v51, 4 }
  0xd6   :  { %v424_v37 = vpack.c.bf16 %v408_v16, %v408_v16  ;;  %v445_v18 = vunpack.c.l.b16 %v413_v17  ;;  %v462_v25 = vsel %vm461_vm4, %v460_v30, %v459_v27  ;;  %v447_v39 = vunpack.c.l.b16 %v415_v23 }
  0xd7   :  { %v384_v38 = vunpack.c.0.bf8 %v327_v60  ;;  %v463_v33 = vrot.slane %v444_v26, 5  ;;  %v486_v41 = vrot.slane %v454_v53, 3  ;;  %v485_v40 = vsel %vm467_vm6, %v484_v34, %v483_v31 }
  0xd8   :  { %v456_v43 = vunpack.c.l.b16 %v424_v37  ;;  %v488_v45 = vrot.slane %v455_v32, 2  ;;  %v469_v52 = vrot.slane %v446_v2, 3  ;;  %v466_v51 = vrot.slane %v445_v18, 4 }
  0xd9   :  { %v400_v5 = vmul.f32 %v384_v38, %v842_v28  ;;  %v465_v50 = vsel %vm464_vm5, %v463_v33, %v462_v25  ;;  %v472_v55 = vrot.slane %v447_v39, 2  ;;  %v487_v46 = vsel %vm470_vm7, %v486_v41, %v485_v40 }
  0xda   :  { %v490_v36 = vrot.slane %v456_v43, 1  ;;  %v468_v61 = vsel %vm467_vm6, %v466_v51, %v465_v50  ;;  %v489_v24 = vsel %vm473_vm8, %v488_v45, %v487_v46  ;;  %v612_v56 = vunpack.c.l.bf16 %v611_v59 }
  0xdb   :  { %v416_v42 = vpack.c.bf16 %v400_v5, %v400_v5  ;;  %v471_v28 = vsel %vm470_vm7, %v469_v52, %v468_v61  ;;  %v613_v17 = vunpack.c.h.bf16 %v611_v59 }
  0xdc   :  { %v491_v63 = vsel %vm476_vm9, %v490_v36, %v489_v24  ;;  %v474_v49 = vsel %vm473_vm8, %v472_v55, %v471_v28 }
  0xdd   :  { %v448_v58 = vunpack.c.l.b16 %v416_v42 }
  0xdf   :  { %v475_v1 = vrot.slane %v448_v58, 1 }
  0xe1   :  { %v477_v3 = vsel %vm476_vm9, %v475_v1, %v474_v49 }
  0xe2   :  { %v492_v35 = vpack.c.b16 %v491_v63, %v477_v3 }
  0xe4   :  { %495 = vst.msk [vmem:[#allocation3] sm:$0xff] %vm25_vm2, %v492_v35 }
  0xeb   :  { %v496_v4 = vld [vmem:[#allocation3] sm:$0xff] }
  0xec   :  { %622 = vmatmul.mubr.msk.bf16.vlgmr.msra.gmra.mrb[0].mxu0 %vm25_vm2, %v496_v4 }
 0x1bf   :  { %v544_v44 = vpop.f32.mrb[0].mxu0 }
 0x1c0   :  { %v551_v54 = vadd.f32 %v544_v44, %v504_v6  ;;  %v623_v9 = vpop.f32.mrb[1].mxu0 }
 0x1c1   :  { %v547_v57 = vpop.f32.mrb[2].mxu0 }
 0x1c2   :  { %553 = vst.msk [vmem:[#allocation2] sm:$0xff] %vm25_vm2, %v551_v54  ;;  %v552_v10 = vadd.f32 %v547_v57, %v505_v7  ;;  %v624_v11 = vpop.f32.mrb[3].mxu0 }
 0x1c4   :  { %554 = vst.msk [vmem:[#allocation2 + $0x8] sm:$0xff] %vm25_vm2, %v552_v10 }
 0x1c9   :  { %v558_v19 = vld [vmem:[#allocation2] sm:$0xff] }
 0x1ca   :  { %v567_v14 = vmul.f32 %v600_v12, %v558_v19 }
 0x1cb   :  { %v559_v15 = vld [vmem:[#allocation2 + $0x8] sm:$0xff] }
 0x1cc   :  { %v576_v48 = vadd.f32 %v601_v13, %v567_v14  ;;  %v568_v62 = vmul.f32 %v600_v12, %v559_v15 }
 0x1ce   :  { %v582_v8 = vadd.f32 %v612_v56, %v576_v48  ;;  %v577_v20 = vadd.f32 %v601_v13, %v568_v62 }
 0x1d0   :  { %v604_v0 = vpack.c.bf16 %v582_v8, %v582_v8  ;;  %v583_v21 = vadd.f32 %v613_v17, %v577_v20 }
 0x1d2   :  { %593 = vst.msk [vmem:[%s898_s5] sm:$0xf] %vm592_vm10, %v604_v0  ;;  %v605_v22 = vpack.c.bf16 %v583_v21, %v583_v21 }
 0x1d4   :  { %594 = vst.msk [vmem:[%s898_s5 + $0x4] sm:$0xf] %vm592_vm10, %v605_v22 }

// kernel: _lambda_.18
= control target key start
LH: loop header
LB: loop body
LE: loop exit
PB: predicated region body
PF: predicated region fallthrough
CT: control target
= control target key end

     0   :  { %vm18_vm0 = vcmask 261120   ;;  %vm72_vm1 = vcmask 257024   ;;  %s132_s0 = inlined_call_operand.vmem [shape: bf16[16,32], index: 0, kind: input, shape index: {}]   ;;  %s133_s1 = inlined_call_operand.vmem [shape: f32[1,32], index: 1, kind: input, shape index: {}]   ;;  %s134_s2 = inlined_call_operand.vmem [shape: f32[1,32], index: 2, kind: input, shape index: {}]   ;;  %s135_s3 = inlined_call_operand.vmem [shape: bf16[16,32], index: 3, kind: output, shape index: {}]  }
   0x1   :  { %v86_v0 = vld [vmem:[%s132_s0] sm:$0xff]  }
   0x2   :  { %v87_v1 = vunpack.c.l.bf16 %v86_v0  ;;  %v88_v2 = vunpack.c.h.bf16 %v86_v0  ;;  %v79_v22 = vld [vmem:[%s133_s1] ss:$0 sm:$0xff] }
   0x3   :  { %v80_v24 = vld [vmem:[%s134_s2] ss:$0 sm:$0xff] }
   0x4   :  { %v19_v3 = vsel %vm18_vm0, %v87_v1, 0.0  ;;  %v22_v4 = vsel %vm18_vm0, %v88_v2, 0.0 }
   0x5   :  { %20 = vadd.xlane.f32.xlu0 %v19_v3 }
   0x9   :  { %23 = vadd.xlane.f32.xlu0 %v22_v4 }
  0x92   :  { %v21_v5 = vpop.xlane.xlu0 %20 }
  0x93   :  { %v26_v6 = vmul.f32 0.03125, %v21_v5 }
  0x95   :  { %v28_v7 = vsub.f32 %v87_v1, %v26_v6 }
  0x96   :  { %v24_v8 = vpop.xlane.xlu0 %23 }
  0x97   :  { %v27_v9 = vmul.f32 0.03125, %v24_v8  ;;  %v30_v10 = vmul.f32 %v28_v7, %v28_v7 }
  0x99   :  { %v29_v11 = vsub.f32 %v88_v2, %v27_v9  ;;  %v32_v12 = vsel %vm18_vm0, %v30_v10, 0.0 }
  0x9a   :  { %33 = vadd.xlane.f32.xlu1 %v32_v12 }
  0x9b   :  { %v31_v13 = vmul.f32 %v29_v11, %v29_v11 }
  0x9d   :  { %v35_v14 = vsel %vm18_vm0, %v31_v13, 0.0 }
  0x9e   :  { %36 = vadd.xlane.f32.xlu1 %v35_v14 }
 0x127   :  { %v34_v15 = vpop.xlane.xlu1 %33 }
 0x128   :  { %v38_v16 = vmul.f32 0.03125, %v34_v15 }
 0x12a   :  { %v40_v17 = vadd.f32 1e-05, %v38_v16 }
 0x12b   :  { %v37_v18 = vpop.xlane.xlu1 %36 }
 0x12c   :  { %89 = vrsqrt.f32 %v40_v17  ;;  %v39_v19 = vmul.f32 0.03125, %v37_v18 }
 0x12e   :  { %v41_v20 = vadd.f32 1e-05, %v39_v19 }
 0x130   :  { %91 = vrsqrt.f32 %v41_v20 }
 0x136   :  { %v90_v21 = vpop.eup %89 }
 0x137   :  { %v44_v23 = vmul.f32 %v90_v21, %v28_v7 }
 0x139   :  { %v53_v25 = vmul.f32 %v79_v22, %v44_v23 }
 0x13a   :  { %v92_v26 = vpop.eup %91 }
 0x13b   :  { %v62_v27 = vadd.f32 %v80_v24, %v53_v25  ;;  %v45_v28 = vmul.f32 %v92_v26, %v29_v11 }
 0x13d   :  { %v83_v29 = vpack.c.bf16 %v62_v27, %v62_v27  ;;  %v54_v30 = vmul.f32 %v79_v22, %v45_v28 }
 0x13f   :  { %73 = vst.msk [vmem:[%s135_s3] sm:$0xf] %vm72_vm1, %v83_v29  ;;  %v63_v31 = vadd.f32 %v80_v24, %v54_v30 }
 0x141   :  { %v84_v32 = vpack.c.bf16 %v63_v31, %v63_v31 }
 0x143   :  { %74 = vst.msk [vmem:[%s135_s3 + $0x4] sm:$0xf] %vm72_vm1, %v84_v32 }

// kernel: _lambda_.19
= control target key start
LH: loop header
LB: loop body
LE: loop exit
PB: predicated region body
PF: predicated region fallthrough
CT: control target
= control target key end

     0   :  { %v39_v0 = vlaneseq  ;;  %v670_v2 = vmov 1966171168   ;;  %vm165_vm0 = vcmask 253952   ;;  %vm672_vm1 = vmmov 0   ;;  %s893_s0 = inlined_call_operand.vmem [shape: bf16[16,32], index: 0, kind: input, shape index: {}]   ;;  %s894_s1 = inlined_call_operand.vmem [shape: f8e4m3fn[32,64], index: 1, kind: input, shape index: {}]   ;;  %s895_s2 = inlined_call_operand.vmem [shape: f32[1,64], index: 2, kind: input, shape index: {}]   ;;  %s896_s3 = inlined_call_operand.vmem [shape: f32[1,64], index: 3, kind: input, shape index: {}]   ;;  %s897_s4 = inlined_call_operand.vmem [shape: bf16[16,64], index: 4, kind: output, shape index: {}]  }
   0x1   :  { %v617_v1 = vld [vmem:[%s893_s0] sm:$0xff]   ;;  %v37_v3 = vunpack.c.l.s4 %v670_v2  ;;  %vm22_vm2 = vcmask 523264   ;;  %vm455_vm3 = vcmask 1041409   ;;  %vm458_vm4 = vcmask 1042434  }
   0x2   :  { %v619_v4 = vunpack.c.h.bf16 %v617_v1  ;;  %v40_v5 = vshrl.u32 %v39_v0, 7  ;;  %v618_v6 = vunpack.c.l.bf16 %v617_v1  ;;  %vm461_vm5 = vcmask 1043459  }
   0x3   :  { %v38_v7 = vunpack.c.0.s8 %v37_v3  ;;  %v671_v3 = vmov 0.0   ;;  %vm464_vm6 = vcmask 1044484   ;;  %vm467_vm7 = vcmask 1045509  }
   0x4   :  { %v84_v8 = vcombine.high %v619_v4, %v619_v4  ;;  %v35_v9 = vcombine.high %v618_v6, %v618_v6  ;;  %623 = vmatprep.subr.bf16.mxu0 %v671_v3  ;;  %627 = vmatprep.mubr.msk.bf16.mxu0 %vm672_vm1, %v671_v3  ;;  %23 = vst.msk [vmem:[#allocation2] sm:$0xff] %vm22_vm2, %v671_v3  ;;  %24 = vst.msk [vmem:[#allocation2 + $0x8] sm:$0xff] %vm22_vm2, %v671_v3  ;;  %vm470_vm8 = vcmask 1046534   ;;  %vm473_vm9 = vcmask 1047559  }
   0x5   :  { %v41_v10 = vsub.s32 %v38_v7, %v40_v5  ;;  %vm491_vm10 = vcmask 261120   ;;  %vm602_vm11 = vcmask 519168  }
   0x7   :  { %v98_v11 = vrot.slane %v84_v8, %v41_v10  ;;  %v42_v12 = vrot.slane %v618_v6, %v41_v10  ;;  %v91_v13 = vrot.slane %v619_v4, %v41_v10  ;;  %v49_v14 = vrot.slane %v35_v9, %v41_v10  ;;  %v494_v4 = vld [vmem:[%s894_s1] sm:$0xff] }
   0x8   :  { %v495_v5 = vunpack.c.0.f8e4m3fn %v494_v4  ;;  %v496_v6 = vunpack.c.1.f8e4m3fn %v494_v4  ;;  %v497_v7 = vunpack.c.2.f8e4m3fn %v494_v4  ;;  %v498_v8 = vunpack.c.3.f8e4m3fn %v494_v4 }
   0x9   :  { %v701_v15 = vrot.slane %v98_v11, %v41_v10  ;;  %v703_v16 = vrot.slane %v42_v12, %v41_v10  ;;  %v50_v17 = vcombine.high %v42_v12, %v42_v12  ;;  %v705_v18 = vrot.slane %v91_v13, %v41_v10 }
   0xa   :  { %v707_v19 = vrot.slane %v49_v14, %v41_v10  ;;  %v99_v20 = vcombine.high %v91_v13, %v91_v13  ;;  %v100_v37 = vcombine.high %v98_v11, %v98_v11  ;;  %v51_v38 = vcombine.high %v49_v14, %v49_v14 }
   0xb   :  { %v161_v21 = vand.u32 2147483647, %v701_v15  ;;  %v149_v22 = vand.u32 2147483647, %v703_v16  ;;  %v157_v23 = vand.u32 2147483647, %v705_v18  ;;  %v714_v24 = vcombine.high %v703_v16, %v703_v16 }
   0xc   :  { %v718_v25 = vcombine.high %v705_v18, %v705_v18  ;;  %v720_v26 = vrot.slane %v50_v17, %v41_v10  ;;  %v153_v30 = vand.u32 2147483647, %v707_v19  ;;  %v726_v31 = vrot.slane %v99_v20, %v41_v10 }
   0xd   :  { %v202_v27 = vsel %vm165_vm0, %v161_v21, -inf  ;;  %v166_v28 = vsel %vm165_vm0, %v149_v22, -inf  ;;  %v151_v29 = vand.u32 2147483647, %v714_v24  ;;  %v190_v32 = vsel %vm165_vm0, %v157_v23, -inf }
   0xe   :  { %203 = vmax.xlane.f32.xlu1 %v202_v27  ;;  %167 = vmax.xlane.f32.xlu0 %v166_v28  ;;  %v159_v34 = vand.u32 2147483647, %v718_v25  ;;  %v733_v35 = vcombine.high %v720_v26, %v720_v26  ;;  %v178_v36 = vsel %vm165_vm0, %v153_v30, -inf  ;;  %v150_v41 = vand.u32 2147483647, %v720_v26 }
   0xf   :  { %v172_v33 = vsel %vm165_vm0, %v151_v29, -inf  ;;  %v741_v42 = vcombine.high %v726_v31, %v726_v31  ;;  %v158_v43 = vand.u32 2147483647, %v726_v31  ;;  %v744_v44 = vrot.slane %v100_v37, %v41_v10 }
  0x10   :  { %v196_v39 = vsel %vm165_vm0, %v159_v34, -inf  ;;  %v152_v40 = vand.u32 2147483647, %v733_v35  ;;  %v169_v46 = vsel %vm165_vm0, %v150_v41, -inf  ;;  %v749_v48 = vrot.slane %v51_v38, %v41_v10 }
  0x11   :  { %v160_v47 = vand.u32 2147483647, %v741_v42  ;;  %v193_v49 = vsel %vm165_vm0, %v158_v43, -inf  ;;  %v162_v50 = vand.u32 2147483647, %v744_v44  ;;  %v757_v53 = vcombine.high %v701_v15, %v701_v15 }
  0x12   :  { %191 = vmax.xlane.f32.xlu0 %v190_v32  ;;  %173 = vmax.xlane.f32.xlu1 %v172_v33  ;;  %v175_v45 = vsel %vm165_vm0, %v152_v40, -inf  ;;  %v154_v52 = vand.u32 2147483647, %v749_v48  ;;  %v761_v54 = vcombine.high %v707_v19, %v707_v19  ;;  %v766_v56 = vcombine.high %v744_v44, %v744_v44 }
  0x13   :  { %v199_v51 = vsel %vm165_vm0, %v160_v47, -inf  ;;  %v205_v55 = vsel %vm165_vm0, %v162_v50, -inf  ;;  %v163_v58 = vand.u32 2147483647, %v757_v53  ;;  %v773_v60 = vcombine.high %v749_v48, %v749_v48 }
  0x14   :  { %v181_v57 = vsel %vm165_vm0, %v154_v52, -inf  ;;  %v155_v59 = vand.u32 2147483647, %v761_v54  ;;  %v164_v63 = vand.u32 2147483647, %v766_v56  ;;  %v499_v9 = vpack.c.bf16 %v496_v6, %v495_v5 }
  0x15   :  { %v208_v61 = vsel %vm165_vm0, %v163_v58, -inf  ;;  %v156_v0 = vand.u32 2147483647, %v773_v60  ;;  %v500_v10 = vpack.c.bf16 %v498_v8, %v497_v7 }
  0x16   :  { %197 = vmax.xlane.f32.xlu1 %v196_v39  ;;  %179 = vmax.xlane.f32.xlu0 %v178_v36  ;;  %v184_v62 = vsel %vm165_vm0, %v155_v59, -inf  ;;  %v211_v1 = vsel %vm165_vm0, %v164_v63, -inf }
  0x17   :  { %v187_v2 = vsel %vm165_vm0, %v156_v0, -inf  ;;  %624 = vmatpush3.bf16.msra.mxu0 %v499_v9 }
  0x18   :  { %625 = vmatprep.subr.bf16.mxu0 %v671_v3 }
  0x1a   :  { %176 = vmax.xlane.f32.xlu1 %v175_v45  ;;  %170 = vmax.xlane.f32.xlu0 %v169_v46 }
  0x1b   :  { %626 = vmatpush3.bf16.msra.mxu0 %v500_v10 }
  0x1e   :  { %200 = vmax.xlane.f32.xlu1 %v199_v51  ;;  %194 = vmax.xlane.f32.xlu0 %v193_v49 }
  0x22   :  { %206 = vmax.xlane.f32.xlu1 %v205_v55  ;;  %182 = vmax.xlane.f32.xlu0 %v181_v57 }
  0x26   :  { %209 = vmax.xlane.f32.xlu1 %v208_v61  ;;  %185 = vmax.xlane.f32.xlu0 %v184_v62 }
  0x2a   :  { %212 = vmax.xlane.f32.xlu1 %v211_v1  ;;  %188 = vmax.xlane.f32.xlu0 %v187_v2 }
  0x9b   :  { %v204_v11 = vpop.xlane.xlu1 %203  ;;  %v168_v12 = vpop.xlane.xlu0 %167 }
  0x9c   :  { %v226_v17 = vmax.f32 %v204_v11, 1e-12  ;;  %v214_v22 = vmax.f32 %v168_v12, 1e-12 }
  0x9e   :  { %v786_v23 = vmul.f32 0.002232143, %v226_v17  ;;  %v788_v33 = vmul.f32 0.002232143, %v214_v22 }
  0x9f   :  { %v192_v13 = vpop.xlane.xlu0 %191  ;;  %v174_v14 = vpop.xlane.xlu1 %173 }
  0xa0   :  { %v222_v27 = vmax.f32 %v192_v13, 1e-12  ;;  %634 = vrcp.f32 %v786_v23  ;;  %v216_v37 = vmax.f32 %v174_v14, 1e-12 }
  0xa2   :  { %v793_v36 = vmul.f32 0.002232143, %v222_v27  ;;  %v804_v49 = vmul.f32 0.002232143, %v216_v37 }
  0xa3   :  { %v198_v20 = vpop.xlane.xlu1 %197  ;;  %v180_v21 = vpop.xlane.xlu0 %179 }
  0xa4   :  { %v224_v30 = vmax.f32 %v198_v20, 1e-12  ;;  %v218_v52 = vmax.f32 %v180_v21, 1e-12 }
  0xa6   :  { %v795_v40 = vmul.f32 0.002232143, %v224_v30  ;;  %v814_v62 = vmul.f32 0.002232143, %v218_v52 }
  0xa7   :  { %v177_v28 = vpop.xlane.xlu1 %176  ;;  %v171_v29 = vpop.xlane.xlu0 %170 }
  0xa8   :  { %v215_v32 = vmax.f32 %v171_v29, 1e-12  ;;  %v217_v45 = vmax.f32 %v177_v28, 1e-12 }
  0xaa   :  { %v790_v34 = vmul.f32 0.002232143, %v215_v32  ;;  %v807_v57 = vmul.f32 0.002232143, %v217_v45  ;;  %v635_v63 = vpop.eup %634 }
  0xab   :  { %v201_v38 = vpop.xlane.xlu1 %200  ;;  %v195_v39 = vpop.xlane.xlu0 %194  ;;  %v271_v4 = vmul.f32 %v635_v63, %v701_v15 }
  0xac   :  { %v225_v41 = vmax.f32 %v201_v38, 1e-12  ;;  %v223_v43 = vmax.f32 %v195_v39, 1e-12  ;;  %636 = vrcp.f32 %v790_v34 }
  0xad   :  { %638 = vrcp.f32 %v788_v33  ;;  %v350_v12 = vpack.c.f32.eXmY %v271_v4, %v271_v4, 61788 }
  0xae   :  { %v799_v46 = vmul.f32 0.002232143, %v225_v41  ;;  %v801_v47 = vmul.f32 0.002232143, %v223_v43  ;;  %640 = vrcp.f32 %v793_v36 }
  0xaf   :  { %v207_v50 = vpop.xlane.xlu1 %206  ;;  %v183_v51 = vpop.xlane.xlu0 %182  ;;  %642 = vrcp.f32 %v795_v40 }
  0xb0   :  { %v227_v55 = vmax.f32 %v207_v50, 1e-12  ;;  %644 = vrcp.f32 %v801_v47  ;;  %v219_v58 = vmax.f32 %v183_v51, 1e-12 }
  0xb1   :  { %646 = vrcp.f32 %v799_v46 }
  0xb2   :  { %v811_v59 = vmul.f32 0.002232143, %v227_v55  ;;  %648 = vrcp.f32 %v804_v49  ;;  %v817_v0 = vmul.f32 0.002232143, %v219_v58 }
  0xb3   :  { %v210_v61 = vpop.xlane.xlu1 %209  ;;  %650 = vrcp.f32 %v807_v57  ;;  %v186_v22 = vpop.xlane.xlu0 %185 }
  0xb4   :  { %652 = vrcp.f32 %v811_v59  ;;  %v228_v1 = vmax.f32 %v210_v61, 1e-12  ;;  %v220_v51 = vmax.f32 %v186_v22, 1e-12 }
  0xb5   :  { %654 = vrcp.f32 %v814_v62 }
  0xb6   :  { %v637_v2 = vpop.eup %636  ;;  %656 = vrcp.f32 %v817_v0  ;;  %v824_v8 = vmul.f32 0.002232143, %v228_v1 }
  0xb7   :  { %v639_v3 = vpop.eup %638  ;;  %v249_v7 = vmul.f32 %v637_v2, %v720_v26  ;;  %v213_v38 = vpop.xlane.xlu1 %212  ;;  %v836_v2 = vmul.f32 0.002232143, %v220_v51 }
  0xb8   :  { %v641_v5 = vpop.eup %640  ;;  %v247_v10 = vmul.f32 %v639_v3, %v703_v16  ;;  %658 = vrcp.f32 %v824_v8  ;;  %v354_v16 = vpack.c.b8 %v350_v12, %v350_v12  ;;  %v229_v58 = vmax.f32 %v213_v38, 1e-12  ;;  %v189_v61 = vpop.xlane.xlu0 %188 }
  0xb9   :  { %v643_v6 = vpop.eup %642  ;;  %v263_v15 = vmul.f32 %v641_v5, %v705_v18  ;;  %v284_v20 = vpack.c.f32.eXmY %v249_v7, %v249_v7, 61788  ;;  %660 = vrcp.f32 %v836_v2 }
  0xba   :  { %v645_v9 = vpop.eup %644  ;;  %v267_v17 = vmul.f32 %v643_v6, %v718_v25  ;;  %v278_v27 = vpack.c.f32.eXmY %v247_v10, %v247_v10, 61788  ;;  %v386_v52 = vunpack.c.0.f8e4m3fn %v354_v16  ;;  %v839_v5 = vmul.f32 0.002232143, %v229_v58 }
  0xbb   :  { %v647_v11 = vpop.eup %646  ;;  %v265_v13 = vmul.f32 %v645_v9, %v726_v31  ;;  %v326_v31 = vpack.c.f32.eXmY %v263_v15, %v263_v15, 61788  ;;  %v288_v39 = vpack.c.b8 %v284_v20, %v284_v20  ;;  %v221_v9 = vmax.f32 %v189_v61, 1e-12 }
  0xbc   :  { %v649_v14 = vpop.eup %648  ;;  %v269_v28 = vmul.f32 %v647_v11, %v741_v42  ;;  %v338_v37 = vpack.c.f32.eXmY %v267_v17, %v267_v17, 61788  ;;  %v282_v43 = vpack.c.b8 %v278_v27, %v278_v27  ;;  %662 = vrcp.f32 %v839_v5 }
  0xbd   :  { %v332_v21 = vpack.c.f32.eXmY %v265_v13, %v265_v13, 61788  ;;  %v651_v26 = vpop.eup %650  ;;  %v251_v30 = vmul.f32 %v649_v14, %v714_v24  ;;  %v330_v24 = vpack.c.b8 %v326_v31, %v326_v31  ;;  %v402_v13 = vmul.f32 %v386_v52, %v786_v23 }
  0xbe   :  { %v653_v29 = vpop.eup %652  ;;  %v253_v25 = vmul.f32 %v651_v26, %v733_v35  ;;  %v344_v45 = vpack.c.f32.eXmY %v269_v28, %v269_v28, 61788  ;;  %v342_v63 = vpack.c.b8 %v338_v37, %v338_v37  ;;  %v375_v35 = vunpack.c.0.f8e4m3fn %v288_v39 }
  0xbf   :  { %v336_v32 = vpack.c.b8 %v332_v21, %v332_v21  ;;  %v655_v18 = vpop.eup %654  ;;  %v273_v50 = vmul.f32 %v653_v29, %v744_v44  ;;  %v290_v42 = vpack.c.f32.eXmY %v251_v30, %v251_v30, 61788  ;;  %v374_v10 = vunpack.c.0.f8e4m3fn %v282_v43 }
  0xc0   :  { %v657_v41 = vpop.eup %656  ;;  %v255_v1 = vmul.f32 %v655_v18, %v707_v19  ;;  %v296_v3 = vpack.c.f32.eXmY %v253_v25, %v253_v25, 61788  ;;  %v348_v44 = vpack.c.b8 %v344_v45, %v344_v45  ;;  %v384_v14 = vunpack.c.0.f8e4m3fn %v342_v63 }
  0xc1   :  { %v383_v55 = vunpack.c.0.f8e4m3fn %v336_v32  ;;  %v257_v4 = vmul.f32 %v657_v41, %v749_v48  ;;  %v356_v7 = vpack.c.f32.eXmY %v273_v50, %v273_v50, 61788  ;;  %v294_v11 = vpack.c.b8 %v290_v42, %v290_v42 }
  0xc2   :  { %v659_v6 = vpop.eup %658  ;;  %v302_v15 = vpack.c.f32.eXmY %v255_v1, %v255_v1, 61788  ;;  %v382_v48 = vunpack.c.0.f8e4m3fn %v330_v24  ;;  %v300_v17 = vpack.c.b8 %v296_v3, %v296_v3  ;;  %v391_v22 = vmul.f32 %v375_v35, %v790_v34 }
  0xc3   :  { %v399_v12 = vmul.f32 %v383_v55, %v801_v47  ;;  %v275_v19 = vmul.f32 %v659_v6, %v757_v53  ;;  %v308_v20 = vpack.c.f32.eXmY %v257_v4, %v257_v4, 61788  ;;  %v385_v26 = vunpack.c.0.f8e4m3fn %v348_v44  ;;  %v661_v41 = vpop.eup %660 }
  0xc4   :  { %v360_v27 = vpack.c.b8 %v356_v7, %v356_v7  ;;  %v847_v28 = vmul.f32 0.002232143, %v221_v9  ;;  %v390_v47 = vmul.f32 %v374_v10, %v788_v33  ;;  %v376_v29 = vunpack.c.0.f8e4m3fn %v294_v11 }
  0xc5   :  { %v362_v21 = vpack.c.f32.eXmY %v275_v19, %v275_v19, 61788  ;;  %v415_v53 = vpack.c.bf16 %v399_v12, %v399_v12  ;;  %v400_v23 = vmul.f32 %v384_v14, %v795_v40  ;;  %v306_v16 = vpack.c.b8 %v302_v15, %v302_v15 }
  0xc6   :  { %664 = vrcp.f32 %v847_v28  ;;  %v418_v32 = vpack.c.bf16 %v402_v13, %v402_v13  ;;  %v398_v31 = vmul.f32 %v382_v48, %v793_v36  ;;  %v312_v37 = vpack.c.b8 %v308_v20, %v308_v20  ;;  %v663_v55 = vpop.eup %662 }
  0xc7   :  { %v366_v30 = vpack.c.b8 %v362_v21, %v362_v21  ;;  %v377_v38 = vunpack.c.0.f8e4m3fn %v300_v17  ;;  %v407_v34 = vpack.c.bf16 %v391_v22, %v391_v22  ;;  %v401_v18 = vmul.f32 %v385_v26, %v799_v46 }
  0xc8   :  { %v387_v25 = vunpack.c.0.f8e4m3fn %v360_v27  ;;  %v406_v39 = vpack.c.bf16 %v390_v47, %v390_v47  ;;  %v447_v33 = vunpack.c.l.b16 %v415_v53  ;;  %v392_v43 = vmul.f32 %v376_v29, %v804_v49 }
  0xc9   :  { %v416_v40 = vpack.c.bf16 %v400_v23, %v400_v23  ;;  %v378_v45 = vunpack.c.0.f8e4m3fn %v306_v16  ;;  %v388_v50 = vunpack.c.0.f8e4m3fn %v366_v30  ;;  %v855_v51 = vunpack.c.l.b16 %v418_v32 }
  0xca   :  { %v414_v52 = vpack.c.bf16 %v398_v31, %v398_v31  ;;  %v379_v36 = vunpack.c.0.f8e4m3fn %v312_v37  ;;  %v259_v42 = vmul.f32 %v661_v41, %v761_v54  ;;  %v393_v46 = vmul.f32 %v377_v38, %v807_v57 }
  0xcb   :  { %v439_v58 = vunpack.c.l.b16 %v407_v34  ;;  %v417_v61 = vpack.c.bf16 %v401_v18, %v401_v18  ;;  %v403_v24 = vmul.f32 %v387_v25, %v811_v59  ;;  %v438_v63 = vunpack.c.l.b16 %v406_v39 }
  0xcc   :  { %v475_v1 = vrot.slane %v447_v33, 7  ;;  %v314_v49 = vpack.c.f32.eXmY %v259_v42, %v259_v42, 61788  ;;  %v277_v3 = vmul.f32 %v663_v55, %v766_v56  ;;  %v408_v35 = vpack.c.bf16 %v392_v43, %v392_v43 }
  0xcd   :  { %v448_v4 = vunpack.c.l.b16 %v416_v40  ;;  %v394_v6 = vmul.f32 %v378_v45, %v814_v62  ;;  %v404_v44 = vmul.f32 %v388_v50, %v824_v8  ;;  %v446_v7 = vunpack.c.l.b16 %v414_v52 }
  0xce   :  { %v395_v54 = vmul.f32 %v379_v36, %v817_v0  ;;  %v318_v9 = vpack.c.b8 %v314_v49, %v314_v49  ;;  %v368_v57 = vpack.c.f32.eXmY %v277_v3, %v277_v3, 61788  ;;  %v409_v11 = vpack.c.bf16 %v393_v46, %v393_v46 }
  0xcf   :  { %v454_v12 = vrot.slane %v439_v58, 7  ;;  %v449_v59 = vunpack.c.l.b16 %v417_v61  ;;  %v419_v19 = vpack.c.bf16 %v403_v24, %v403_v24  ;;  %v476_v13 = vsel %vm455_vm3, %v475_v1, %v446_v7  ;;  %v502_v7 = vld [vmem:[#allocation2 + $0x8] sm:$0xff] }
  0xd0   :  { %v665_v10 = vpop.eup %664  ;;  %v380_v14 = vunpack.c.0.f8e4m3fn %v318_v9  ;;  %v372_v56 = vpack.c.b8 %v368_v57, %v368_v57  ;;  %v440_v48 = vunpack.c.l.b16 %v408_v35  ;;  %v477_v62 = vrot.slane %v448_v4, 6 }
  0xd1   :  { %v261_v15 = vmul.f32 %v665_v10, %v773_v60  ;;  %v410_v17 = vpack.c.bf16 %v394_v6, %v394_v6  ;;  %v420_v8 = vpack.c.bf16 %v404_v44, %v404_v44  ;;  %v411_v20 = vpack.c.bf16 %v395_v54, %v395_v54  ;;  %v501_v6 = vld [vmem:[#allocation2] sm:$0xff] }
  0xd2   :  { %v396_v0 = vmul.f32 %v380_v14, %v836_v2  ;;  %v389_v21 = vunpack.c.0.f8e4m3fn %v372_v56  ;;  %v441_v26 = vunpack.c.l.b16 %v409_v11  ;;  %v456_v27 = vsel %vm455_vm3, %v454_v12, %v438_v63  ;;  %v610_v12 = vld [vmem:[%s895_s2] ss:$0 sm:$0xff] }
  0xd3   :  { %v320_v22 = vpack.c.f32.eXmY %v261_v15, %v261_v15, 61788  ;;  %v479_v47 = vrot.slane %v449_v59, 5  ;;  %v478_v29 = vsel %vm458_vm4, %v477_v62, %v476_v13  ;;  %v451_v53 = vunpack.c.l.b16 %v419_v19  ;;  %v611_v19 = vld [vmem:[%s896_s3] ss:$0 sm:$0xff] }
  0xd4   :  { %v412_v23 = vpack.c.bf16 %v396_v0, %v396_v0  ;;  %v405_v16 = vmul.f32 %v389_v21, %v839_v5  ;;  %v457_v30 = vrot.slane %v440_v48, 6  ;;  %v452_v32 = vunpack.c.l.b16 %v420_v8 }
  0xd5   :  { %v324_v60 = vpack.c.b8 %v320_v22, %v320_v22  ;;  %v480_v31 = vsel %vm461_vm5, %v479_v47, %v478_v29  ;;  %v443_v2 = vunpack.c.l.b16 %v411_v20  ;;  %v481_v34 = vrot.slane %v855_v51, 4 }
  0xd6   :  { %v421_v37 = vpack.c.bf16 %v405_v16, %v405_v16  ;;  %v442_v18 = vunpack.c.l.b16 %v410_v17  ;;  %v459_v25 = vsel %vm458_vm4, %v457_v30, %v456_v27  ;;  %v444_v39 = vunpack.c.l.b16 %v412_v23 }
  0xd7   :  { %v381_v38 = vunpack.c.0.f8e4m3fn %v324_v60  ;;  %v460_v33 = vrot.slane %v441_v26, 5  ;;  %v483_v41 = vrot.slane %v451_v53, 3  ;;  %v482_v40 = vsel %vm464_vm6, %v481_v34, %v480_v31 }
  0xd8   :  { %v453_v43 = vunpack.c.l.b16 %v421_v37  ;;  %v485_v45 = vrot.slane %v452_v32, 2  ;;  %v466_v52 = vrot.slane %v443_v2, 3  ;;  %v463_v51 = vrot.slane %v442_v18, 4 }
  0xd9   :  { %v397_v5 = vmul.f32 %v381_v38, %v847_v28  ;;  %v462_v50 = vsel %vm461_vm5, %v460_v33, %v459_v25  ;;  %v469_v55 = vrot.slane %v444_v39, 2  ;;  %v484_v46 = vsel %vm467_vm7, %v483_v41, %v482_v40 }
  0xda   :  { %v487_v36 = vrot.slane %v453_v43, 1  ;;  %v465_v61 = vsel %vm464_vm6, %v463_v51, %v462_v50  ;;  %v486_v24 = vsel %vm470_vm8, %v485_v45, %v484_v46 }
  0xdb   :  { %v413_v42 = vpack.c.bf16 %v397_v5, %v397_v5  ;;  %v468_v28 = vsel %vm467_vm7, %v466_v52, %v465_v61 }
  0xdc   :  { %v488_v1 = vsel %vm473_vm9, %v487_v36, %v486_v24  ;;  %v471_v49 = vsel %vm470_vm8, %v469_v55, %v468_v28 }
  0xdd   :  { %v445_v58 = vunpack.c.l.b16 %v413_v42 }
  0xdf   :  { %v472_v63 = vrot.slane %v445_v58, 1 }
  0xe1   :  { %v474_v3 = vsel %vm473_vm9, %v472_v63, %v471_v49 }
  0xe2   :  { %v489_v35 = vpack.c.b16 %v488_v1, %v474_v3 }
  0xe4   :  { %492 = vst.msk [vmem:[#allocation3] sm:$0xff] %vm491_vm10, %v489_v35 }
  0xeb   :  { %v493_v4 = vld [vmem:[#allocation3] sm:$0xff] }
  0xec   :  { %628 = vmatmul.mubr.msk.bf16.vlgmr.msra.gmra.mrb[0].mxu0 %vm491_vm10, %v493_v4 }
 0x1bf   :  { %v541_v44 = vpop.f32.mrb[0].mxu0 }
 0x1c0   :  { %v548_v54 = vadd.f32 %v541_v44, %v501_v6  ;;  %v629_v9 = vpop.f32.mrb[1].mxu0 }
 0x1c1   :  { %v544_v57 = vpop.f32.mrb[2].mxu0 }
 0x1c2   :  { %551 = vst.msk [vmem:[#allocation2] sm:$0xff] %vm22_vm2, %v548_v54  ;;  %v549_v10 = vadd.f32 %v544_v57, %v502_v7  ;;  %v630_v11 = vpop.f32.mrb[3].mxu0 }
 0x1c4   :  { %552 = vst.msk [vmem:[#allocation2 + $0x8] sm:$0xff] %vm22_vm2, %v549_v10 }
 0x1c9   :  { %v556_v59 = vld [vmem:[#allocation2] sm:$0xff] }
 0x1ca   :  { %v565_v13 = vmul.f32 %v610_v12, %v556_v59 }
 0x1cb   :  { %v557_v14 = vld [vmem:[#allocation2 + $0x8] sm:$0xff] }
 0x1cc   :  { %v574_v56 = vadd.f32 %v611_v19, %v565_v13  ;;  %v566_v15 = vmul.f32 %v610_v12, %v557_v14 }
 0x1ce   :  { %v578_v48 = vmul.f32 0.044715, %v574_v56  ;;  %v575_v62 = vadd.f32 %v611_v19, %v566_v15  ;;  %v576_v53 = vmul.f32 0.5, %v574_v56 }
 0x1d0   :  { %v580_v17 = vmul.f32 %v578_v48, %v574_v56  ;;  %v579_v8 = vmul.f32 0.044715, %v575_v62  ;;  %v577_v30 = vmul.f32 0.5, %v575_v62 }
 0x1d2   :  { %v582_v20 = vmul.f32 %v580_v17, %v574_v56  ;;  %v581_v0 = vmul.f32 %v579_v8, %v575_v62 }
 0x1d4   :  { %v584_v21 = vadd.f32 %v582_v20, %v574_v56  ;;  %v583_v22 = vmul.f32 %v581_v0, %v575_v62 }
 0x1d6   :  { %v586_v26 = vmul.f32 0.7978846, %v584_v21  ;;  %v585_v27 = vadd.f32 %v583_v22, %v575_v62 }
 0x1d8   :  { %666 = vtanh.f32 %v586_v26  ;;  %v587_v47 = vmul.f32 0.7978846, %v585_v27 }
 0x1da   :  { %668 = vtanh.f32 %v587_v47 }
 0x1e2   :  { %v667_v29 = vpop.eup %666 }
 0x1e3   :  { %v590_v23 = vadd.f32 1.0, %v667_v29 }
 0x1e4   :  { %v669_v16 = vpop.eup %668 }
 0x1e5   :  { %v592_v60 = vmul.f32 %v590_v23, %v576_v53  ;;  %v591_v32 = vadd.f32 1.0, %v669_v16 }
 0x1e7   :  { %v614_v31 = vpack.c.bf16 %v592_v60, %v592_v60  ;;  %v593_v2 = vmul.f32 %v591_v32, %v577_v30 }
 0x1e9   :  { %603 = vst.msk [vmem:[%s897_s4] sm:$0xf] %vm602_vm11, %v614_v31  ;;  %v615_v37 = vpack.c.bf16 %v593_v2, %v593_v2 }
 0x1eb   :  { %604 = vst.msk [vmem:[%s897_s4 + $0x4] sm:$0xf] %vm602_vm11, %v615_v37 }

// kernel: _lambda_.20
= control target key start
LH: loop header
LB: loop body
LE: loop exit
PB: predicated region body
PF: predicated region fallthrough
CT: control target
= control target key end

     0   :  { %v42_v0 = vlaneseq  ;;  %v674_v2 = vmov 1966171168   ;;  %vm168_vm0 = vcmask 516096   ;;  %vm676_vm1 = vmmov 0   ;;  %s908_s0 = inlined_call_operand.vmem [shape: bf16[16,64], index: 0, kind: input, shape index: {}]   ;;  %s909_s1 = inlined_call_operand.vmem [shape: f8e4m3fn[64,32], index: 1, kind: input, shape index: {}]   ;;  %s910_s2 = inlined_call_operand.vmem [shape: f32[1,32], index: 2, kind: input, shape index: {}]   ;;  %s911_s4 = inlined_call_operand.vmem [shape: bf16[16,32], index: 4, kind: input, shape index: {}]   ;;  %s912_s3 = inlined_call_operand.vmem [shape: f32[1,32], index: 3, kind: input, shape index: {}]   ;;  %s913_s5 = inlined_call_operand.vmem [shape: bf16[16,32], index: 5, kind: output, shape index: {}]  }
   0x1   :  { %v615_v1 = vld [vmem:[%s908_s0] sm:$0xff]   ;;  %v40_v3 = vunpack.c.l.s4 %v674_v2  ;;  %vm25_vm2 = vcmask 261120   ;;  %vm458_vm3 = vcmask 1041409   ;;  %vm461_vm4 = vcmask 1042434  }
   0x2   :  { %v617_v4 = vunpack.c.h.bf16 %v615_v1  ;;  %v43_v5 = vshrl.u32 %v42_v0, 7  ;;  %v616_v6 = vunpack.c.l.bf16 %v615_v1  ;;  %vm464_vm5 = vcmask 1043459  }
   0x3   :  { %v41_v7 = vunpack.c.0.s8 %v40_v3  ;;  %v497_v3 = vld [vmem:[%s909_s1] sm:$0xff]  ;;  %vm467_vm6 = vcmask 1044484   ;;  %vm470_vm7 = vcmask 1045509   ;;  %vm473_vm8 = vcmask 1046534  }
   0x4   :  { %v87_v8 = vcombine.high %v617_v4, %v617_v4  ;;  %v38_v9 = vcombine.high %v616_v6, %v616_v6  ;;  %vm476_vm9 = vcmask 1047559   ;;  %vm494_vm10 = vcmask 523264  }
   0x5   :  { %v44_v10 = vsub.s32 %v41_v7, %v43_v5  ;;  %v500_v5 = vunpack.c.1.f8e4m3fn %v497_v3  ;;  %v675_v7 = vmov 0.0   ;;  %vm600_vm11 = vcmask 257024  }
   0x6   :  { %627 = vmatprep.subr.bf16.mxu0 %v675_v7  ;;  %635 = vmatprep.mubr.msk.bf16.mxu0 %vm676_vm1, %v675_v7  ;;  %26 = vst.msk [vmem:[#allocation2] sm:$0xff] %vm25_vm2, %v675_v7  ;;  %27 = vst.msk [vmem:[#allocation2 + $0x8] sm:$0xff] %vm25_vm2, %v675_v7 }
   0x7   :  { %v101_v11 = vrot.slane %v87_v8, %v44_v10  ;;  %v45_v12 = vrot.slane %v616_v6, %v44_v10  ;;  %v94_v13 = vrot.slane %v617_v4, %v44_v10  ;;  %v52_v14 = vrot.slane %v38_v9, %v44_v10 }
   0x8   :  { %v499_v4 = vunpack.c.0.f8e4m3fn %v497_v3  ;;  %v501_v8 = vunpack.c.2.f8e4m3fn %v497_v3  ;;  %v502_v9 = vunpack.c.3.f8e4m3fn %v497_v3 }
   0x9   :  { %v710_v15 = vrot.slane %v101_v11, %v44_v10  ;;  %v712_v16 = vrot.slane %v45_v12, %v44_v10  ;;  %v53_v17 = vcombine.high %v45_v12, %v45_v12  ;;  %v714_v18 = vrot.slane %v94_v13, %v44_v10 }
   0xa   :  { %v716_v19 = vrot.slane %v52_v14, %v44_v10  ;;  %v102_v20 = vcombine.high %v94_v13, %v94_v13  ;;  %v103_v37 = vcombine.high %v101_v11, %v101_v11  ;;  %v54_v38 = vcombine.high %v52_v14, %v52_v14 }
   0xb   :  { %v164_v21 = vand.u32 2147483647, %v710_v15  ;;  %v152_v22 = vand.u32 2147483647, %v712_v16  ;;  %v160_v23 = vand.u32 2147483647, %v714_v18  ;;  %v723_v24 = vcombine.high %v712_v16, %v712_v16 }
   0xc   :  { %v727_v25 = vcombine.high %v714_v18, %v714_v18  ;;  %v729_v26 = vrot.slane %v53_v17, %v44_v10  ;;  %v156_v30 = vand.u32 2147483647, %v716_v19  ;;  %v735_v31 = vrot.slane %v102_v20, %v44_v10 }
   0xd   :  { %v205_v27 = vsel %vm168_vm0, %v164_v21, -inf  ;;  %v169_v28 = vsel %vm168_vm0, %v152_v22, -inf  ;;  %v154_v29 = vand.u32 2147483647, %v723_v24  ;;  %v193_v32 = vsel %vm168_vm0, %v160_v23, -inf }
   0xe   :  { %206 = vmax.xlane.f32.xlu1 %v205_v27  ;;  %170 = vmax.xlane.f32.xlu0 %v169_v28  ;;  %v162_v34 = vand.u32 2147483647, %v727_v25  ;;  %v742_v35 = vcombine.high %v729_v26, %v729_v26  ;;  %v181_v36 = vsel %vm168_vm0, %v156_v30, -inf  ;;  %v153_v41 = vand.u32 2147483647, %v729_v26 }
   0xf   :  { %v175_v33 = vsel %vm168_vm0, %v154_v29, -inf  ;;  %v750_v42 = vcombine.high %v735_v31, %v735_v31  ;;  %v161_v43 = vand.u32 2147483647, %v735_v31  ;;  %v753_v44 = vrot.slane %v103_v37, %v44_v10 }
  0x10   :  { %v199_v39 = vsel %vm168_vm0, %v162_v34, -inf  ;;  %v155_v40 = vand.u32 2147483647, %v742_v35  ;;  %v172_v46 = vsel %vm168_vm0, %v153_v41, -inf  ;;  %v758_v48 = vrot.slane %v54_v38, %v44_v10  ;;  %v498_v10 = vld [vmem:[%s909_s1 + $0x8] sm:$0xff] }
  0x11   :  { %v163_v47 = vand.u32 2147483647, %v750_v42  ;;  %v196_v49 = vsel %vm168_vm0, %v161_v43, -inf  ;;  %v165_v50 = vand.u32 2147483647, %v753_v44  ;;  %v766_v53 = vcombine.high %v710_v15, %v710_v15 }
  0x12   :  { %194 = vmax.xlane.f32.xlu0 %v193_v32  ;;  %176 = vmax.xlane.f32.xlu1 %v175_v33  ;;  %v178_v45 = vsel %vm168_vm0, %v155_v40, -inf  ;;  %v157_v52 = vand.u32 2147483647, %v758_v48  ;;  %v770_v54 = vcombine.high %v716_v19, %v716_v19  ;;  %v775_v56 = vcombine.high %v753_v44, %v753_v44 }
  0x13   :  { %v202_v51 = vsel %vm168_vm0, %v163_v47, -inf  ;;  %v208_v55 = vsel %vm168_vm0, %v165_v50, -inf  ;;  %v166_v58 = vand.u32 2147483647, %v766_v53  ;;  %v782_v60 = vcombine.high %v758_v48, %v758_v48 }
  0x14   :  { %v184_v57 = vsel %vm168_vm0, %v157_v52, -inf  ;;  %v158_v59 = vand.u32 2147483647, %v770_v54  ;;  %v167_v63 = vand.u32 2147483647, %v775_v56  ;;  %v507_v6 = vpack.c.bf16 %v500_v5, %v499_v4 }
  0x15   :  { %v211_v61 = vsel %vm168_vm0, %v166_v58, -inf  ;;  %v159_v0 = vand.u32 2147483647, %v782_v60  ;;  %v508_v11 = vpack.c.bf16 %v502_v9, %v501_v8  ;;  %v503_v12 = vunpack.c.0.f8e4m3fn %v498_v10 }
  0x16   :  { %200 = vmax.xlane.f32.xlu1 %v199_v39  ;;  %182 = vmax.xlane.f32.xlu0 %v181_v36  ;;  %v187_v62 = vsel %vm168_vm0, %v158_v59, -inf  ;;  %v214_v1 = vsel %vm168_vm0, %v167_v63, -inf  ;;  %v504_v13 = vunpack.c.1.f8e4m3fn %v498_v10  ;;  %v505_v14 = vunpack.c.2.f8e4m3fn %v498_v10 }
  0x17   :  { %v190_v2 = vsel %vm168_vm0, %v159_v0, -inf  ;;  %628 = vmatpush3.bf16.msra.mxu0 %v507_v6  ;;  %v506_v17 = vunpack.c.3.f8e4m3fn %v498_v10 }
  0x18   :  { %629 = vmatprep.subr.bf16.mxu0 %v675_v7  ;;  %v509_v20 = vpack.c.bf16 %v504_v13, %v503_v12 }
  0x19   :  { %v510_v21 = vpack.c.bf16 %v506_v17, %v505_v14 }
  0x1a   :  { %179 = vmax.xlane.f32.xlu1 %v178_v45  ;;  %173 = vmax.xlane.f32.xlu0 %v172_v46 }
  0x1b   :  { %630 = vmatpush3.bf16.msra.mxu0 %v508_v11 }
  0x1c   :  { %631 = vmatprep.subr.bf16.mxu0 %v675_v7 }
  0x1e   :  { %203 = vmax.xlane.f32.xlu1 %v202_v51  ;;  %197 = vmax.xlane.f32.xlu0 %v196_v49 }
  0x1f   :  { %632 = vmatpush3.bf16.msra.mxu0 %v509_v20 }
  0x20   :  { %633 = vmatprep.subr.bf16.mxu0 %v675_v7 }
  0x22   :  { %209 = vmax.xlane.f32.xlu1 %v208_v55  ;;  %185 = vmax.xlane.f32.xlu0 %v184_v57 }
  0x23   :  { %634 = vmatpush3.bf16.msra.mxu0 %v510_v21 }
  0x26   :  { %212 = vmax.xlane.f32.xlu1 %v211_v61  ;;  %188 = vmax.xlane.f32.xlu0 %v187_v62 }
  0x2a   :  { %215 = vmax.xlane.f32.xlu1 %v214_v1  ;;  %191 = vmax.xlane.f32.xlu0 %v190_v2 }
  0x9b   :  { %v207_v22 = vpop.xlane.xlu1 %206  ;;  %v171_v23 = vpop.xlane.xlu0 %170 }
  0x9c   :  { %v229_v29 = vmax.f32 %v207_v22, 1e-12  ;;  %v217_v33 = vmax.f32 %v171_v23, 1e-12 }
  0x9e   :  { %v798_v34 = vmul.f32 0.002232143, %v229_v29  ;;  %v800_v41 = vmul.f32 0.002232143, %v217_v33 }
  0x9f   :  { %v195_v27 = vpop.xlane.xlu0 %194  ;;  %v177_v28 = vpop.xlane.xlu1 %176 }
  0xa0   :  { %v225_v36 = vmax.f32 %v195_v27, 1e-12  ;;  %642 = vrcp.f32 %v798_v34  ;;  %v219_v46 = vmax.f32 %v177_v28, 1e-12 }
  0xa2   :  { %v805_v45 = vmul.f32 0.002232143, %v225_v36  ;;  %v816_v59 = vmul.f32 0.002232143, %v219_v46 }
  0xa3   :  { %v201_v30 = vpop.xlane.xlu1 %200  ;;  %v183_v32 = vpop.xlane.xlu0 %182 }
  0xa4   :  { %v227_v39 = vmax.f32 %v201_v30, 1e-12  ;;  %v221_v63 = vmax.f32 %v183_v32, 1e-12 }
  0xa6   :  { %v807_v50 = vmul.f32 0.002232143, %v227_v39  ;;  %v826_v5 = vmul.f32 0.002232143, %v221_v63 }
  0xa7   :  { %v180_v37 = vpop.xlane.xlu1 %179  ;;  %v174_v38 = vpop.xlane.xlu0 %173 }
  0xa8   :  { %v218_v40 = vmax.f32 %v174_v38, 1e-12  ;;  %v220_v55 = vmax.f32 %v180_v37, 1e-12 }
  0xaa   :  { %v802_v43 = vmul.f32 0.002232143, %v218_v40  ;;  %v819_v1 = vmul.f32 0.002232143, %v220_v55  ;;  %v643_v6 = vpop.eup %642 }
  0xab   :  { %v204_v47 = vpop.xlane.xlu1 %203  ;;  %v198_v49 = vpop.xlane.xlu0 %197  ;;  %v274_v11 = vmul.f32 %v643_v6, %v710_v15 }
  0xac   :  { %v228_v51 = vmax.f32 %v204_v47, 1e-12  ;;  %v226_v52 = vmax.f32 %v198_v49, 1e-12  ;;  %644 = vrcp.f32 %v802_v43 }
  0xad   :  { %646 = vrcp.f32 %v800_v41  ;;  %v353_v23 = vpack.c.f32.eXmY %v274_v11, %v274_v11, 61788 }
  0xae   :  { %v811_v57 = vmul.f32 0.002232143, %v228_v51  ;;  %v813_v58 = vmul.f32 0.002232143, %v226_v52  ;;  %648 = vrcp.f32 %v805_v45 }
  0xaf   :  { %v210_v61 = vpop.xlane.xlu1 %209  ;;  %v186_v62 = vpop.xlane.xlu0 %185  ;;  %650 = vrcp.f32 %v807_v50 }
  0xb0   :  { %v230_v0 = vmax.f32 %v210_v61, 1e-12  ;;  %652 = vrcp.f32 %v813_v58  ;;  %v222_v2 = vmax.f32 %v186_v62, 1e-12 }
  0xb1   :  { %654 = vrcp.f32 %v811_v57 }
  0xb2   :  { %v823_v3 = vmul.f32 0.002232143, %v230_v0  ;;  %656 = vrcp.f32 %v816_v59  ;;  %v829_v7 = vmul.f32 0.002232143, %v222_v2 }
  0xb3   :  { %v213_v4 = vpop.xlane.xlu1 %212  ;;  %658 = vrcp.f32 %v819_v1  ;;  %v189_v33 = vpop.xlane.xlu0 %188 }
  0xb4   :  { %660 = vrcp.f32 %v823_v3  ;;  %v231_v8 = vmax.f32 %v213_v4, 1e-12  ;;  %v223_v62 = vmax.f32 %v189_v33, 1e-12 }
  0xb5   :  { %662 = vrcp.f32 %v826_v5 }
  0xb6   :  { %v645_v9 = vpop.eup %644  ;;  %664 = vrcp.f32 %v829_v7  ;;  %v836_v17 = vmul.f32 0.002232143, %v231_v8 }
  0xb7   :  { %v647_v10 = vpop.eup %646  ;;  %v252_v14 = vmul.f32 %v645_v9, %v729_v26  ;;  %v216_v47 = vpop.xlane.xlu1 %215  ;;  %v848_v9 = vmul.f32 0.002232143, %v223_v62 }
  0xb8   :  { %v649_v12 = vpop.eup %648  ;;  %v250_v21 = vmul.f32 %v647_v10, %v712_v16  ;;  %666 = vrcp.f32 %v836_v17  ;;  %v357_v16 = vpack.c.b8 %v353_v23, %v353_v23  ;;  %v232_v2 = vmax.f32 %v216_v47, 1e-12  ;;  %v192_v4 = vpop.xlane.xlu0 %191 }
  0xb9   :  { %v651_v13 = vpop.eup %650  ;;  %v266_v15 = vmul.f32 %v649_v12, %v714_v18  ;;  %v287_v30 = vpack.c.f32.eXmY %v252_v14, %v252_v14, 61788  ;;  %668 = vrcp.f32 %v848_v9 }
  0xba   :  { %v653_v20 = vpop.eup %652  ;;  %v270_v29 = vmul.f32 %v651_v13, %v727_v25  ;;  %v281_v36 = vpack.c.f32.eXmY %v250_v21, %v250_v21, 61788  ;;  %v389_v63 = vunpack.c.0.f8e4m3fn %v357_v16  ;;  %v851_v12 = vmul.f32 0.002232143, %v232_v2 }
  0xbb   :  { %v655_v22 = vpop.eup %654  ;;  %v268_v27 = vmul.f32 %v653_v20, %v735_v31  ;;  %v329_v31 = vpack.c.f32.eXmY %v266_v15, %v266_v15, 61788  ;;  %v291_v49 = vpack.c.b8 %v287_v30, %v287_v30  ;;  %v224_v20 = vmax.f32 %v192_v4, 1e-12 }
  0xbc   :  { %v657_v28 = vpop.eup %656  ;;  %v272_v37 = vmul.f32 %v655_v22, %v750_v42  ;;  %v341_v46 = vpack.c.f32.eXmY %v270_v29, %v270_v29, 61788  ;;  %v285_v52 = vpack.c.b8 %v281_v36, %v281_v36  ;;  %670 = vrcp.f32 %v851_v12 }
  0xbd   :  { %v335_v32 = vpack.c.f32.eXmY %v268_v27, %v268_v27, 61788  ;;  %v659_v26 = vpop.eup %658  ;;  %v254_v39 = vmul.f32 %v657_v28, %v723_v24  ;;  %v333_v24 = vpack.c.b8 %v329_v31, %v329_v31  ;;  %v405_v27 = vmul.f32 %v389_v63, %v798_v34 }
  0xbe   :  { %v661_v38 = vpop.eup %660  ;;  %v256_v25 = vmul.f32 %v659_v26, %v742_v35  ;;  %v347_v55 = vpack.c.f32.eXmY %v272_v37, %v272_v37, 61788  ;;  %v345_v6 = vpack.c.b8 %v341_v46, %v341_v46  ;;  %v378_v35 = vunpack.c.0.f8e4m3fn %v291_v49 }
  0xbf   :  { %v339_v40 = vpack.c.b8 %v335_v32, %v335_v32  ;;  %v663_v18 = vpop.eup %662  ;;  %v276_v61 = vmul.f32 %v661_v38, %v753_v44  ;;  %v293_v42 = vpack.c.f32.eXmY %v254_v39, %v254_v39, 61788  ;;  %v377_v21 = vunpack.c.0.f8e4m3fn %v285_v52 }
  0xc0   :  { %v665_v51 = vpop.eup %664  ;;  %v258_v8 = vmul.f32 %v663_v18, %v716_v19  ;;  %v299_v10 = vpack.c.f32.eXmY %v256_v25, %v256_v25, 61788  ;;  %v351_v44 = vpack.c.b8 %v347_v55, %v347_v55  ;;  %v387_v28 = vunpack.c.0.f8e4m3fn %v345_v6 }
  0xc1   :  { %v386_v0 = vunpack.c.0.f8e4m3fn %v339_v40  ;;  %v260_v11 = vmul.f32 %v665_v51, %v758_v48  ;;  %v359_v14 = vpack.c.f32.eXmY %v276_v61, %v276_v61, 61788  ;;  %v297_v22 = vpack.c.b8 %v293_v42, %v293_v42 }
  0xc2   :  { %v667_v13 = vpop.eup %666  ;;  %v305_v15 = vpack.c.f32.eXmY %v258_v8, %v258_v8, 61788  ;;  %v385_v48 = vunpack.c.0.f8e4m3fn %v333_v24  ;;  %v303_v29 = vpack.c.b8 %v299_v10, %v299_v10  ;;  %v394_v33 = vmul.f32 %v378_v35, %v802_v43 }
  0xc3   :  { %v402_v23 = vmul.f32 %v386_v0, %v813_v58  ;;  %v278_v19 = vmul.f32 %v667_v13, %v766_v53  ;;  %v311_v30 = vpack.c.f32.eXmY %v260_v11, %v260_v11, 61788  ;;  %v388_v26 = vunpack.c.0.f8e4m3fn %v351_v44  ;;  %v669_v51 = vpop.eup %668 }
  0xc4   :  { %v363_v36 = vpack.c.b8 %v359_v14, %v359_v14  ;;  %v859_v37 = vmul.f32 0.002232143, %v224_v20  ;;  %v393_v58 = vmul.f32 %v377_v21, %v800_v41  ;;  %v379_v38 = vunpack.c.0.f8e4m3fn %v297_v22 }
  0xc5   :  { %v365_v32 = vpack.c.f32.eXmY %v278_v19, %v278_v19, 61788  ;;  %v418_v53 = vpack.c.bf16 %v402_v23, %v402_v23  ;;  %v403_v34 = vmul.f32 %v387_v28, %v807_v50  ;;  %v309_v16 = vpack.c.b8 %v305_v15, %v305_v15 }
  0xc6   :  { %672 = vrcp.f32 %v859_v37  ;;  %v421_v40 = vpack.c.bf16 %v405_v27, %v405_v27  ;;  %v401_v31 = vmul.f32 %v385_v48, %v805_v45  ;;  %v315_v46 = vpack.c.b8 %v311_v30, %v311_v30  ;;  %v671_v0 = vpop.eup %670 }
  0xc7   :  { %v369_v39 = vpack.c.b8 %v365_v32, %v365_v32  ;;  %v380_v47 = vunpack.c.0.f8e4m3fn %v303_v29  ;;  %v410_v43 = vpack.c.bf16 %v394_v33, %v394_v33  ;;  %v404_v18 = vmul.f32 %v388_v26, %v811_v57 }
  0xc8   :  { %v390_v25 = vunpack.c.0.f8e4m3fn %v363_v36  ;;  %v409_v49 = vpack.c.bf16 %v393_v58, %v393_v58  ;;  %v450_v41 = vunpack.c.l.b16 %v418_v53  ;;  %v395_v52 = vmul.f32 %v379_v38, %v816_v59 }
  0xc9   :  { %v419_v50 = vpack.c.bf16 %v403_v34, %v403_v34  ;;  %v381_v55 = vunpack.c.0.f8e4m3fn %v309_v16  ;;  %v391_v61 = vunpack.c.0.f8e4m3fn %v369_v39  ;;  %v867_v62 = vunpack.c.l.b16 %v421_v40 }
  0xca   :  { %v417_v63 = vpack.c.bf16 %v401_v31, %v401_v31  ;;  %v382_v45 = vunpack.c.0.f8e4m3fn %v315_v46  ;;  %v262_v42 = vmul.f32 %v669_v51, %v770_v54  ;;  %v396_v57 = vmul.f32 %v380_v47, %v819_v1 }
  0xcb   :  { %v442_v2 = vunpack.c.l.b16 %v410_v43  ;;  %v420_v4 = vpack.c.bf16 %v404_v18, %v404_v18  ;;  %v406_v24 = vmul.f32 %v390_v25, %v823_v3  ;;  %v441_v6 = vunpack.c.l.b16 %v409_v49 }
  0xcc   :  { %v478_v8 = vrot.slane %v450_v41, 7  ;;  %v317_v59 = vpack.c.f32.eXmY %v262_v42, %v262_v42, 61788  ;;  %v280_v10 = vmul.f32 %v671_v0, %v775_v56  ;;  %v411_v35 = vpack.c.bf16 %v395_v52, %v395_v52 }
  0xcd   :  { %v451_v11 = vunpack.c.l.b16 %v419_v50  ;;  %v397_v13 = vmul.f32 %v381_v55, %v826_v5  ;;  %v407_v44 = vmul.f32 %v391_v61, %v836_v17  ;;  %v449_v14 = vunpack.c.l.b16 %v417_v63 }
  0xce   :  { %v398_v54 = vmul.f32 %v382_v45, %v829_v7  ;;  %v321_v20 = vpack.c.b8 %v317_v59, %v317_v59  ;;  %v371_v1 = vpack.c.f32.eXmY %v280_v10, %v280_v10, 61788  ;;  %v412_v22 = vpack.c.bf16 %v396_v57, %v396_v57 }
  0xcf   :  { %v457_v23 = vrot.slane %v442_v2, 7  ;;  %v452_v3 = vunpack.c.l.b16 %v420_v4  ;;  %v422_v19 = vpack.c.bf16 %v406_v24, %v406_v24  ;;  %v479_v27 = vsel %vm458_vm3, %v478_v8, %v449_v14  ;;  %v512_v14 = vld [vmem:[#allocation2 + $0x8] sm:$0xff] }
  0xd0   :  { %v673_v21 = vpop.eup %672  ;;  %v383_v28 = vunpack.c.0.f8e4m3fn %v321_v20  ;;  %v375_v56 = vpack.c.b8 %v371_v1, %v371_v1  ;;  %v443_v48 = vunpack.c.l.b16 %v411_v35  ;;  %v480_v5 = vrot.slane %v451_v11, 6 }
  0xd1   :  { %v264_v15 = vmul.f32 %v673_v21, %v782_v60  ;;  %v413_v29 = vpack.c.bf16 %v397_v13, %v397_v13  ;;  %v423_v17 = vpack.c.bf16 %v407_v44, %v407_v44  ;;  %v414_v30 = vpack.c.bf16 %v398_v54, %v398_v54  ;;  %v511_v13 = vld [vmem:[#allocation2] sm:$0xff] }
  0xd2   :  { %v399_v7 = vmul.f32 %v383_v28, %v848_v9  ;;  %v392_v32 = vunpack.c.0.f8e4m3fn %v375_v56  ;;  %v444_v26 = vunpack.c.l.b16 %v412_v22  ;;  %v459_v36 = vsel %vm458_vm3, %v457_v23, %v441_v6  ;;  %v608_v23 = vld [vmem:[%s910_s2] ss:$0 sm:$0xff] }
  0xd3   :  { %v323_v33 = vpack.c.f32.eXmY %v264_v15, %v264_v15, 61788  ;;  %v482_v58 = vrot.slane %v452_v3, 5  ;;  %v481_v38 = vsel %vm461_vm4, %v480_v5, %v479_v27  ;;  %v454_v53 = vunpack.c.l.b16 %v422_v19  ;;  %v619_v3 = vld [vmem:[%s911_s4] sm:$0xff]  }
  0xd4   :  { %v415_v34 = vpack.c.bf16 %v399_v7, %v399_v7  ;;  %v408_v16 = vmul.f32 %v392_v32, %v851_v12  ;;  %v460_v39 = vrot.slane %v443_v48, 6  ;;  %v455_v40 = vunpack.c.l.b16 %v423_v17  ;;  %v609_v27 = vld [vmem:[%s912_s3] ss:$0 sm:$0xff] }
  0xd5   :  { %v327_v60 = vpack.c.b8 %v323_v33, %v323_v33  ;;  %v483_v31 = vsel %vm464_vm5, %v482_v58, %v481_v38  ;;  %v446_v9 = vunpack.c.l.b16 %v414_v30  ;;  %v484_v43 = vrot.slane %v867_v62, 4 }
  0xd6   :  { %v424_v46 = vpack.c.bf16 %v408_v16, %v408_v16  ;;  %v445_v18 = vunpack.c.l.b16 %v413_v29  ;;  %v462_v25 = vsel %vm461_vm4, %v460_v39, %v459_v36  ;;  %v447_v49 = vunpack.c.l.b16 %v415_v34 }
  0xd7   :  { %v384_v47 = vunpack.c.0.f8e4m3fn %v327_v60  ;;  %v463_v41 = vrot.slane %v444_v26, 5  ;;  %v486_v51 = vrot.slane %v454_v53, 3  ;;  %v485_v50 = vsel %vm467_vm6, %v484_v43, %v483_v31 }
  0xd8   :  { %v456_v52 = vunpack.c.l.b16 %v424_v46  ;;  %v488_v55 = vrot.slane %v455_v40, 2  ;;  %v469_v63 = vrot.slane %v446_v9, 3  ;;  %v466_v62 = vrot.slane %v445_v18, 4 }
  0xd9   :  { %v400_v12 = vmul.f32 %v384_v47, %v859_v37  ;;  %v465_v61 = vsel %vm464_vm5, %v463_v41, %v462_v25  ;;  %v472_v0 = vrot.slane %v447_v49, 2  ;;  %v487_v57 = vsel %vm470_vm7, %v486_v51, %v485_v50 }
  0xda   :  { %v490_v45 = vrot.slane %v456_v52, 1  ;;  %v468_v4 = vsel %vm467_vm6, %v466_v62, %v465_v61  ;;  %v489_v24 = vsel %vm473_vm8, %v488_v55, %v487_v57  ;;  %v620_v56 = vunpack.c.l.bf16 %v619_v3 }
  0xdb   :  { %v416_v42 = vpack.c.bf16 %v400_v12, %v400_v12  ;;  %v471_v37 = vsel %vm470_vm7, %v469_v63, %v468_v4  ;;  %v621_v29 = vunpack.c.h.bf16 %v619_v3 }
  0xdc   :  { %v491_v8 = vsel %vm476_vm9, %v490_v45, %v489_v24  ;;  %v474_v59 = vsel %vm473_vm8, %v472_v0, %v471_v37 }
  0xdd   :  { %v448_v2 = vunpack.c.l.b16 %v416_v42 }
  0xdf   :  { %v475_v6 = vrot.slane %v448_v2, 1 }
  0xe1   :  { %v477_v10 = vsel %vm476_vm9, %v475_v6, %v474_v59 }
  0xe2   :  { %v492_v35 = vpack.c.b16 %v491_v8, %v477_v10 }
  0xe4   :  { %495 = vst.msk [vmem:[#allocation3] sm:$0xff] %vm494_vm10, %v492_v35 }
  0xeb   :  { %v496_v11 = vld [vmem:[#allocation3] sm:$0xff] }
  0xec   :  { %636 = vmatmul.mubr.msk.bf16.vlgmr.msra.gmra.mrb[0].mxu0 %vm494_vm10, %v496_v11 }
 0x1bf   :  { %v551_v44 = vpop.f32.mrb[0].mxu0 }
 0x1c0   :  { %v558_v54 = vadd.f32 %v551_v44, %v511_v13  ;;  %v637_v20 = vpop.f32.mrb[1].mxu0 }
 0x1c1   :  { %v554_v1 = vpop.f32.mrb[2].mxu0 }
 0x1c2   :  { %561 = vst.msk [vmem:[#allocation2] sm:$0xff] %vm25_vm2, %v558_v54  ;;  %v559_v21 = vadd.f32 %v554_v1, %v512_v14  ;;  %v638_v22 = vpop.f32.mrb[3].mxu0 }
 0x1c4   :  { %562 = vst.msk [vmem:[#allocation2 + $0x8] sm:$0xff] %vm25_vm2, %v559_v21 }
 0x1c9   :  { %v566_v19 = vld [vmem:[#allocation2] sm:$0xff] }
 0x1ca   :  { %v575_v28 = vmul.f32 %v608_v23, %v566_v19 }
 0x1cb   :  { %v567_v15 = vld [vmem:[#allocation2 + $0x8] sm:$0xff] }
 0x1cc   :  { %v584_v48 = vadd.f32 %v609_v27, %v575_v28  ;;  %v576_v5 = vmul.f32 %v608_v23, %v567_v15 }
 0x1ce   :  { %v590_v17 = vadd.f32 %v620_v56, %v584_v48  ;;  %v585_v30 = vadd.f32 %v609_v27, %v576_v5 }
 0x1d0   :  { %v612_v7 = vpack.c.bf16 %v590_v17, %v590_v17  ;;  %v591_v32 = vadd.f32 %v621_v29, %v585_v30 }
 0x1d2   :  { %601 = vst.msk [vmem:[%s913_s5] sm:$0xf] %vm600_vm11, %v612_v7  ;;  %v613_v33 = vpack.c.bf16 %v591_v32, %v591_v32 }
 0x1d4   :  { %602 = vst.msk [vmem:[%s913_s5 + $0x4] sm:$0xf] %vm600_vm11, %v613_v33 }

// kernel: _lambda_.29
= control target key start
LH: loop header
LB: loop body
LE: loop exit
PB: predicated region body
PF: predicated region fallthrough
CT: control target
= control target key end

     0   :  { %vm19_vm0 = vcmask 261120   ;;  %s170_s0 = inlined_call_operand.vmem [shape: bf16[16,32], index: 0, kind: input, shape index: {}]   ;;  %s171_s1 = inlined_call_operand.vmem [shape: f32[1,32], index: 1, kind: input, shape index: {}]   ;;  %s172_s2 = inlined_call_operand.vmem [shape: f32[1,32], index: 2, kind: input, shape index: {}]   ;;  %s173_s3 = inlined_call_operand.hbm [shape: f32[16,32], index: 3, kind: output, shape index: {}]  }
   0x1   :  { %v86_v0 = vld [vmem:[%s170_s0] sm:$0xff]  }
   0x2   :  { %8 = vsyncpa [#allocation3], 0  ;;  %v87_v1 = vunpack.c.l.bf16 %v86_v0  ;;  %v88_v2 = vunpack.c.h.bf16 %v86_v0  ;;  %v83_v22 = vld [vmem:[%s171_s1] ss:$0 sm:$0xff]  ;;  %s120_s17 = smov [#allocation2]  }
   0x3   :  { %v84_v24 = vld [vmem:[%s172_s2] ss:$0 sm:$0xff]  ;;  %s72_s18 = sshll.u32 %s120_s17, 4  ;;  %s73_s18 = int_to_ptr.vmem [resolvable:$true] %s72_s18 }
   0x4   :  { %v20_v3 = vsel %vm19_vm0, %v87_v1, 0.0  ;;  %v23_v4 = vsel %vm19_vm0, %v88_v2, 0.0  ;;  %s96_s19 = scalar_lea.vmem %s73_s18, 256  ;;  %p101_p1 = scmp.lt.s32.totalorder %s73_s18, %s73_s18 }
   0x5   :  { %21 = vadd.xlane.f32.xlu0 %v20_v3  ;;  %p97_p0 = scmp.ne.s32.totalorder %s73_s18, %s96_s19  ;;  %p102_p2 = scmp.lt.s32.totalorder %s96_s19, %s96_s19 }
   0x7   :  { %p103_p3 = por %p102_p2, %p101_p1 }
   0x9   :  { %24 = vadd.xlane.f32.xlu0 %v23_v4  ;;  %p104_p4 = pnand %p103_p3, %p97_p0 }
  0x92   :  { %v22_v5 = vpop.xlane.xlu0 %21 }
  0x93   :  { %v27_v6 = vmul.f32 0.03125, %v22_v5 }
  0x95   :  { %v29_v7 = vsub.f32 %v87_v1, %v27_v6 }
  0x96   :  { %v25_v8 = vpop.xlane.xlu0 %24 }
  0x97   :  { %v28_v9 = vmul.f32 0.03125, %v25_v8  ;;  %v31_v10 = vmul.f32 %v29_v7, %v29_v7 }
  0x99   :  { %v30_v11 = vsub.f32 %v88_v2, %v28_v9  ;;  %v33_v12 = vsel %vm19_vm0, %v31_v10, 0.0 }
  0x9a   :  { %34 = vadd.xlane.f32.xlu1 %v33_v12 }
  0x9b   :  { %v32_v13 = vmul.f32 %v30_v11, %v30_v11 }
  0x9d   :  { %v36_v14 = vsel %vm19_vm0, %v32_v13, 0.0 }
  0x9e   :  { %37 = vadd.xlane.f32.xlu1 %v36_v14 }
 0x127   :  { %v35_v15 = vpop.xlane.xlu1 %34 }
 0x128   :  { %v39_v16 = vmul.f32 0.03125, %v35_v15 }
 0x12a   :  { %v41_v17 = vadd.f32 1e-05, %v39_v16 }
 0x12b   :  { %v38_v18 = vpop.xlane.xlu1 %37 }
 0x12c   :  { %92 = vrsqrt.f32 %v41_v17  ;;  %v40_v19 = vmul.f32 0.03125, %v38_v18 }
 0x12e   :  { %v42_v20 = vadd.f32 1e-05, %v40_v19 }
 0x130   :  { %94 = vrsqrt.f32 %v42_v20 }
 0x136   :  { %v93_v21 = vpop.eup %92 }
 0x137   :  { %v45_v23 = vmul.f32 %v93_v21, %v29_v7 }
 0x139   :  { %v54_v25 = vmul.f32 %v83_v22, %v45_v23 }
 0x13a   :  { %v95_v26 = vpop.eup %94 }
 0x13b   :  { %v46_v27 = vmul.f32 %v95_v26, %v30_v11  ;;  %v63_v28 = vadd.f32 %v84_v24, %v54_v25 }
 0x13d   :  { %v55_v29 = vmul.f32 %v83_v22, %v46_v27  ;;  %65 = vst.msk [vmem:[#allocation2] sm:$0xff] %vm19_vm0, %v63_v28 }
 0x13f   :  { %v64_v30 = vadd.f32 %v84_v24, %v55_v29 }
 0x141   :  { %66 = vst.msk [vmem:[#allocation2 + $0x8] sm:$0xff] %vm19_vm0, %v64_v30 }
 0x142   :  { %107 = shalt.err (!%p104_p4)
}
 0x143   :  { %s108_s20 = scalar_lea.hbm %s173_s3, 256 }
 0x144   :  { %p109_p5 = scmp.ne.s32.totalorder %s173_s3, %s108_s20  ;;  %p112_p6 = scmp.lt.u32.totalorder %s108_s20, %s173_s3 }
 0x146   :  { %p114_p7 = pnand %p112_p6, %p109_p5 }
 0x148   :  { %117 = shalt.err (!%p114_p7)
}
 0x149   :  { %s121_s25 = smov 128   ;;  %s122_s26 = smov 8  }
 0x14a   :  { %78 = dma.vmem_to_hbm [thread:$0]  %s73_s18, 256, %s173_s3, [#allocation3], %s121_s25, %s121_s25, %s122_s26  }
 0x14b   :  { %118 = dma.done.wait [#allocation3], 256  }
 0x14c   :  { %119 = vsyncadd [#allocation3], 4294967040 }
 0x14d   :  { %82 = vsyncpa [#allocation3], 1 }

</bundles_post_ra>
